<compile_context>
chip_gen: v7x
topology: tpu7x:2x2x1
jax: 0.10.0
libtpu: 0.0.40
codegen_flags: <defaults>
</compile_context>

<pallas_src>
import functools

import jax
import jax.numpy as jnp
from jax import lax
from jax.experimental import pallas as pl
from jax.experimental.pallas import tpu as pltpu


def _round_up(x, m):
    return ((x + m - 1) // m) * m


def _cdiv(a, b):
    return (a + b - 1) // b


def _dtype_bytes(dt):
    return jnp.dtype(dt).itemsize


def _vmem_tile_bytes(shape, dtype):
    """Rough VMEM footprint of one block (lane dim padded to 128, sublane dim to 8)."""
    shape = list(shape)
    if len(shape) >= 1:
        shape[-1] = _round_up(int(shape[-1]), 128)
    if len(shape) >= 2:
        shape[-2] = _round_up(int(shape[-2]), 8)
    n = 1
    for s in shape:
        n *= int(s)
    return n * _dtype_bytes(dtype)


def _tpu_vmem_capacity_bytes():
    try:
        return int(pltpu.get_tpu_info().vmem_capacity_bytes)
    except Exception:
        return 64 * 1024 * 1024  # conservative default (v7x per-TC VMEM)


_VMEM_CAP = _tpu_vmem_capacity_bytes()
_VMEM_LIMIT = max(32 * 1024 * 1024, min(int(_VMEM_CAP * 0.70), 96 * 1024 * 1024))
_VMEM_BUDGET = _VMEM_LIMIT - 6 * 1024 * 1024


# ---------------------------------------------------------------------------
# Path 1 kernel: fused direct conv (stride 1), im2col folded into the kernel.
# ---------------------------------------------------------------------------
def _direct_conv_kernel(x_ref, w_ref, scale_ref, shift_ref, o_ref, *, KH, KW, OH, OW, relu):
    # x_ref:     (1, Hp, Wp, Cin)  bf16 zero-padded NHWC image (one batch element)
    # w_ref:     (KH, KW, Cin, TN) bf16 HWIO weights
    # scale_ref: (1, TN) f32 folded BN scale; shift_ref: (1, TN) f32 folded bias/BN shift
    # o_ref:     (1, OH*OW, TN)
    cin = x_ref.shape[-1]
    tn = o_ref.shape[-1]
    acc = None
    for kh in range(KH):            # static unrolled loop over the filter taps
        for kw in range(KW):
            xs = x_ref[0, pl.ds(kh, OH), pl.ds(kw, OW), :]      # (OH, OW, Cin) shifted window
            xs = xs.reshape(OH * OW, cin)
            wk = w_ref[kh, kw, :, :]                            # (Cin, TN)
            part = jnp.dot(xs, wk, preferred_element_type=jnp.float32)
            acc = part if acc is None else acc + part
    y = acc * scale_ref[...] + shift_ref[...]
    if relu:
        y = jnp.maximum(y, 0.0)
    o_ref[...] = y.reshape(1, OH * OW, tn).astype(o_ref.dtype)


def _pick_direct_tn(N, Hp, Wp, Cin, KH, KW, OH, OW, coutp, out_dtype):
    """Largest Cout tile for the direct-conv path that fits VMEM; None if it can't fit."""
    cands = []
    for c in (coutp, 512, 256, 128):
        if c <= coutp and coutp % c == 0 and c not in cands:
            cands.append(c)
    # With a single image, prefer >= 2 Cout tiles so both v7x TensorCores get work.
    if N == 1 and coutp >= 256:
        halved = [c for c in cands if c <= coutp // 2]
        if halved:
            cands = halved
    ohw = OH * OW
    for tn in cands:
        tot = (_vmem_tile_bytes((1, Hp, Wp, Cin), jnp.bfloat16) * 2        # image (dbl-buffered)
               + _vmem_tile_bytes((KH * KW, Cin, tn), jnp.bfloat16) * 2    # weights
               + _vmem_tile_bytes((1, ohw, tn), out_dtype) * 2             # output block
               + _vmem_tile_bytes((ohw, tn), jnp.float32)                  # f32 accumulator
               + _vmem_tile_bytes((ohw, Cin), jnp.bfloat16) * 2            # sliced windows (rough)
               + (2 << 20))
        if tot <= _VMEM_BUDGET:
            return tn
    return None


def _fused_direct_conv(x_pad, w_hwio, scale, shift, *, KH, KW, OH, OW, TN, relu,
                       out_dtype=jnp.float32):
    N, Hp, Wp, Cin = x_pad.shape
    kh, kw, cin_w, coutp = w_hwio.shape
    assert (kh, kw, cin_w) == (KH, KW, Cin) and coutp % TN == 0
    nn = coutp // TN
    ohw = OH * OW

    out_bytes = _dtype_bytes(out_dtype)
    weight_reads = 1 if nn == 1 else N
    cost = pl.CostEstimate(
        flops=2 * N * ohw * Cin * KH * KW * coutp,
        transcendentals=0,
        bytes_accessed=(N * Hp * Wp * Cin * 2
                        + weight_reads * KH * KW * Cin * coutp * 2
                        + N * ohw * coutp * out_bytes))

    kernel = functools.partial(_direct_conv_kernel, KH=KH, KW=KW, OH=OH, OW=OW, relu=relu)
    return pl.pallas_call(
        kernel,
        out_shape=jax.ShapeDtypeStruct((N, ohw, coutp), out_dtype),
        grid_spec=pltpu.PrefetchScalarGridSpec(
            num_scalar_prefetch=0,
            grid=(N, nn),
            in_specs=[
                pl.BlockSpec((1, Hp, Wp, Cin), lambda n, j: (n, 0, 0, 0)),
                pl.BlockSpec((KH, KW, Cin, TN), lambda n, j: (0, 0, 0, j)),
                pl.BlockSpec((1, TN), lambda n, j: (0, j)),
                pl.BlockSpec((1, TN), lambda n, j: (0, j)),
            ],
            out_specs=pl.BlockSpec((1, ohw, TN), lambda n, j: (n, 0, j)),
        ),
        compiler_params=pltpu.CompilerParams(
            dimension_semantics=("parallel", "parallel"),
            vmem_limit_bytes=_VMEM_LIMIT),
        cost_estimate=cost,
    )(x_pad, w_hwio, scale, shift)


# ---------------------------------------------------------------------------
# Path 2 kernels: im2col patches @ weight, fused scale/shift/ReLU epilogue.
# ---------------------------------------------------------------------------
def _epilogue(acc, scale_ref, shift_ref, relu):
    y = acc * scale_ref[...] + shift_ref[...]
    if relu:
        y = jnp.maximum(y, 0.0)
    return y


def _conv_matmul_kernel_nk1(p_ref, w_ref, scale_ref, shift_ref, o_ref, *, relu):
    # Single-K-step fast path: no accumulator scratch, no RMW.
    acc = jnp.dot(p_ref[...], w_ref[...], preferred_element_type=jnp.float32)
    o_ref[...] = _epilogue(acc, scale_ref, shift_ref, relu).astype(o_ref.dtype)


def _conv_matmul_kernel_acc(p_ref, w_ref, scale_ref, shift_ref, o_ref, acc_ref, *, relu):
    k = pl.program_id(2)

    @pl.when(k == 0)
    def _():
        acc_ref[...] = jnp.zeros_like(acc_ref)

    acc_ref[...] += jnp.dot(p_ref[...], w_ref[...], preferred_element_type=jnp.float32)

    @pl.when(k == pl.num_programs(2) - 1)
    def _():
        o_ref[...] = _epilogue(acc_ref[...], scale_ref, shift_ref, relu).astype(o_ref.dtype)


def _tile_k_candidates(K):
    cands = []
    if K <= 8192:
        cands.append(K)             # single K step (nk == 1 fast path)
    for cap in (4096, 2048, 1024, 512):
        start = min(cap, (K // 128) * 128)
        for t in range(start, 127, -128):
            if t % 128 == 0 and K % t == 0:
                if t not in cands:
                    cands.append(t)
                break
    if not cands:
        cands.append(K)             # last resort: one big K step
    return cands


def _select_matmul_tiles(M, K, coutp, out_dtype):
    m_full = _round_up(M, 8)
    tn_cands = []
    for c in (coutp, 1024, 512, 256, 128):
        if c <= coutp and coutp % c == 0 and c not in tn_cands:
            tn_cands.append(c)
    for tk in _tile_k_candidates(K):
        nk = K // tk
        for tn in tn_cands:
            for tm in (2048, 1024, 512, 256, 128):
                tm_eff = min(tm, m_full)
                tot = (_vmem_tile_bytes((tm_eff, tk), jnp.bfloat16) * 2
                       + _vmem_tile_bytes((tk, tn), jnp.bfloat16) * 2
                       + _vmem_tile_bytes((tm_eff, tn), out_dtype) * 2
                       + (_vmem_tile_bytes((tm_eff, tn), jnp.float32) if nk > 1 else 0)
                       + (2 << 20))
                if tot <= _VMEM_BUDGET:
                    return tm_eff, tn, tk
    return min(128, m_full), 128, _tile_k_candidates(K)[-1]


def _fused_conv_matmul(patches, w_mat, scale, shift, *, relu, out_dtype=jnp.float32):
    """patches: (M, K) bf16; w_mat: (K, Coutp) bf16; scale/shift: (1, Coutp) f32."""
    M, K = patches.shape
    kdim, coutp = w_mat.shape
    assert kdim == K and coutp % 128 == 0

    tm, tn, tk = _select_matmul_tiles(M, K, coutp, out_dtype)
    nn = coutp // tn
    nk = K // tk
    nm = _cdiv(M, tm)
    # Keep at least 2 grid tiles (counting Cout tiles too) when M is big enough so the
    # v7x megacore can shard work; round to 256 so MXU tiles stay full width.
    if nm * nn < 2 and M > 512:
        tm = min(_round_up(_cdiv(M, 2), 256), _round_up(M, 8))
        nm = _cdiv(M, tm)

    out_bytes = _dtype_bytes(out_dtype)

    if nk == 1:
        cost = pl.CostEstimate(
            flops=2 * M * K * coutp, transcendentals=0,
            bytes_accessed=nn * M * K * 2 + K * coutp * 2 + M * coutp * out_bytes)
        return pl.pallas_call(
            functools.partial(_conv_matmul_kernel_nk1, relu=relu),
            out_shape=jax.ShapeDtypeStruct((M, coutp), out_dtype),
            grid_spec=pltpu.PrefetchScalarGridSpec(
                num_scalar_prefetch=0,
                grid=(nn, nm),              # Cout outer -> weight block constant across M tiles
                in_specs=[
                    pl.BlockSpec((tm, tk), lambda j, i: (i, 0)),
                    pl.BlockSpec((tk, tn), lambda j, i: (0, j)),
                    pl.BlockSpec((1, tn), lambda j, i: (0, j)),
                    pl.BlockSpec((1, tn), lambda j, i: (0, j)),
                ],
                out_specs=pl.BlockSpec((tm, tn), lambda j, i: (i, j)),
            ),
            compiler_params=pltpu.CompilerParams(
                dimension_semantics=("parallel", "parallel"),
                vmem_limit_bytes=_VMEM_LIMIT),
            cost_estimate=cost,
        )(patches, w_mat, scale, shift)

    cost = pl.CostEstimate(
        flops=2 * M * K * coutp, transcendentals=0,
        bytes_accessed=nn * M * K * 2 + nm * K * coutp * 2 + M * coutp * out_bytes)
    return pl.pallas_call(
        functools.partial(_conv_matmul_kernel_acc, relu=relu),
        out_shape=jax.ShapeDtypeStruct((M, coutp), out_dtype),
        grid_spec=pltpu.PrefetchScalarGridSpec(
            num_scalar_prefetch=0,
            grid=(nm, nn, nk),
            in_specs=[
                pl.BlockSpec((tm, tk), lambda i, j, k: (i, k)),
                pl.BlockSpec((tk, tn), lambda i, j, k: (k, j)),
                pl.BlockSpec((1, tn), lambda i, j, k: (0, j)),
                pl.BlockSpec((1, tn), lambda i, j, k: (0, j)),
            ],
            out_specs=pl.BlockSpec((tm, tn), lambda i, j, k: (i, j)),
            scratch_shapes=[pltpu.VMEM((tm, tn), jnp.float32)],
        ),
        compiler_params=pltpu.CompilerParams(
            dimension_semantics=("parallel", "parallel", "arbitrary"),
            vmem_limit_bytes=_VMEM_LIMIT),
        cost_estimate=cost,
    )(patches, w_mat, scale, shift)


# ---------------------------------------------------------------------------
# Module equivalent of backbone_swin.Conv2d (conv -> bn(eval) -> relu)
# ---------------------------------------------------------------------------
class Conv2dPallas:
    def __init__(self, in_channels, out_channels, kernel_size, padding,
                 stride=1, relu=True, bn=False, *, key=None):
        self.in_channels = in_channels
        self.out_channels = out_channels
        self.kh = self.kw = int(kernel_size)
        self.padding = int(padding)
        self.stride = int(stride)
        self.relu = relu
        self.bn = bn
        self.eps = 1e-3

        if key is None:
            key = jax.random.PRNGKey(0)
        k_w, k_b, k_g, k_beta, k_m, k_v = jax.random.split(key, 6)

        fan_in = in_channels * self.kh * self.kw
        bound = 1.0 / jnp.sqrt(fan_in)
        self.weight = jax.random.uniform(
            k_w, (out_channels, in_channels, self.kh, self.kw), jnp.float32, -bound, bound)
        self.bias = jax.random.uniform(k_b, (out_channels,), jnp.float32, -bound, bound)

        if bn:
            self.gamma = 1.0 + 0.1 * jax.random.normal(k_g, (out_channels,), jnp.float32)
            self.beta = 0.1 * jax.random.normal(k_beta, (out_channels,), jnp.float32)
            self.running_mean = 0.1 * jax.random.normal(k_m, (out_channels,), jnp.float32)
            self.running_var = jnp.abs(
                1.0 + 0.1 * jax.random.normal(k_v, (out_channels,), jnp.float32))
        else:
            self.gamma = self.beta = self.running_mean = self.running_var = None

    def _folded_scale_shift(self):
        if self.bn:
            inv_std = 1.0 / jnp.sqrt(self.running_var + self.eps)
            scale = self.gamma * inv_std
            shift = (self.bias - self.running_mean) * scale + self.beta
        else:
            scale = jnp.ones((self.out_channels,), jnp.float32)
            shift = self.bias
        return scale.reshape(1, -1), shift.reshape(1, -1)

    def __call__(self, x_nchw):
        N, C, H, W = x_nchw.shape
        assert C == self.in_channels
        KH, KW, s, p = self.kh, self.kw, self.stride, self.padding
        OH = (H + 2 * p - KH) // s + 1
        OW = (W + 2 * p - KW) // s + 1

        coutp = _round_up(self.out_channels, 128)
        pad_c = coutp - self.out_channels
        scale, shift = self._folded_scale_shift()
        scale = jnp.pad(scale, ((0, 0), (0, pad_c)))
        shift = jnp.pad(shift, ((0, 0), (0, pad_c)))

        # NCHW -> NHWC bf16 (MXU-native) before any padding/patch work.
        x_nhwc = jnp.transpose(x_nchw, (0, 2, 3, 1)).astype(jnp.bfloat16)

        tn = None
        if s == 1:
            Hp, Wp = H + 2 * p, W + 2 * p
            tn = _pick_direct_tn(N, Hp, Wp, C, KH, KW, OH, OW, coutp, jnp.float32)

        if tn is not None:
            # ---- Path 1: fully fused direct conv (no materialized im2col). ----
            x_pad = x_nhwc if p == 0 else jnp.pad(
                x_nhwc, ((0, 0), (p, p), (p, p), (0, 0)))
            w_hwio = jnp.transpose(self.weight, (2, 3, 1, 0)).astype(jnp.bfloat16)
            w_hwio = jnp.pad(w_hwio, ((0, 0), (0, 0), (0, 0), (0, pad_c)))
            out = _fused_direct_conv(x_pad, w_hwio, scale, shift, KH=KH, KW=KW,
                                     OH=OH, OW=OW, TN=tn, relu=self.relu,
                                     out_dtype=jnp.float32)
            out = out.reshape(N, OH, OW, coutp)
        else:
            # ---- Path 2: im2col (one XLA op) + fused Pallas matmul. ----
            patches = lax.conv_general_dilated_patches(
                x_nhwc, filter_shape=(KH, KW), window_strides=(s, s),
                padding=[(p, p), (p, p)],
                dimension_numbers=("NHWC", "HWIO", "NHWC"))
            _, oh2, ow2, K = patches.shape
            patches = patches.reshape(N * oh2 * ow2, K)
            # (Cout, Cin, KH, KW) flattened matches the patches' Cin-major feature order.
            w_mat = self.weight.reshape(self.out_channels, -1).T.astype(jnp.bfloat16)
            w_mat = jnp.pad(w_mat, ((0, 0), (0, pad_c)))
            out = _fused_conv_matmul(patches, w_mat, scale, shift,
                                     relu=self.relu, out_dtype=jnp.float32)
            out = out.reshape(N, OH, OW, coutp)

        out = out[..., :self.out_channels]
        # TODO(synk): keep NHWC / bf16 downstream to avoid this extra HBM transpose pass.
        return jnp.transpose(out, (0, 3, 1, 2))


# ---------------------------------------------------------------------------
# Reference (plain JAX, same bf16 MXU inputs) for sanity checking
# ---------------------------------------------------------------------------
def _reference_forward(mod: Conv2dPallas, x_nchw):
    y = lax.conv_general_dilated(
        x_nchw.astype(jnp.bfloat16), mod.weight.astype(jnp.bfloat16),
        window_strides=(mod.stride, mod.stride),
        padding=[(mod.padding, mod.padding), (mod.padding, mod.padding)],
        dimension_numbers=("NCHW", "OIHW", "NCHW"),
        preferred_element_type=jnp.float32)
    y = y + mod.bias.reshape(1, -1, 1, 1)
    if mod.bn:
        inv_std = 1.0 / jnp.sqrt(mod.running_var + mod.eps)
        y = (y - mod.running_mean.reshape(1, -1, 1, 1)) * \
            (mod.gamma * inv_std).reshape(1, -1, 1, 1) + mod.beta.reshape(1, -1, 1, 1)
    if mod.relu:
        y = jnp.maximum(y, 0.0)
    return y


if __name__ == "__main__":
    key = jax.random.PRNGKey(0)
    k_x, k_p1, k_p2 = jax.random.split(key, 3)

    # Small shapes: N=2, Cin=4, H=W=16, Cout=8.
    x = jax.random.normal(k_x, (2, 4, 16, 16), jnp.float32)

    # 3x3, pad 1, stride 1, BN + ReLU -> fused direct-conv path.
    mod1 = Conv2dPallas(4, 8, kernel_size=3, padding=1, stride=1,
                        relu=True, bn=True, key=k_p1)
    y1 = jax.block_until_ready(jax.jit(mod1.__call__)(x))
    y1_ref = jax.block_until_ready(_reference_forward(mod1, x))
    assert y1.shape == (2, 8, 16, 16), y1.shape
    assert jnp.allclose(y1, y1_ref, atol=1e-2, rtol=1e-2), "mismatch (bn+relu, direct path)"

    # 3x3, pad 1, stride 2, plain conv -> im2col + matmul fallback path.
    mod2 = Conv2dPallas(4, 8, kernel_size=3, padding=1, stride=2,
                        relu=False, bn=False, key=k_p2)
    y2 = jax.block_until_ready(jax.jit(mod2.__call__)(x))
    y2_ref = jax.block_until_ready(_reference_forward(mod2, x))
    assert y2.shape == (2, 8, 8, 8), y2.shape
    assert jnp.allclose(y2, y2_ref, atol=1e-2, rtol=1e-2), "mismatch (plain conv, matmul path)"

    print("KERNEL_OK")
</pallas_src>

<mosaic_0001>
module attributes {stable_mosaic.version = 11 : i64} {
  func.func @_direct_conv_kernel(%arg0: i32, %arg1: i32, %arg2: memref<1x18x18x4xbf16, #tpu.memory_space<vmem>>, %arg3: memref<3x3x4x128xbf16, #tpu.memory_space<vmem>>, %arg4: memref<1x128xf32, #tpu.memory_space<vmem>>, %arg5: memref<1x128xf32, #tpu.memory_space<vmem>>, %arg6: memref<1x256x128xf32, #tpu.memory_space<vmem>>) attributes {dimension_semantics = [#tpu.dimension_semantics<parallel>, #tpu.dimension_semantics<parallel>], iteration_bounds = array<i64: 2, 1>, scalar_prefetch = 0 : i64, scratch_operands = 0 : i64, tpu.core_type = #tpu.core_type<tc>, window_params = [{transform_indices = @transform_0, window_bounds = array<i64: 1, 18, 18, 4>}, {transform_indices = @transform_1, window_bounds = array<i64: 3, 3, 4, 128>}, {transform_indices = @transform_2, window_bounds = array<i64: 1, 128>}, {transform_indices = @transform_3, window_bounds = array<i64: 1, 128>}, {transform_indices = @transform_4, window_bounds = array<i64: 1, 256, 128>}]} {
    %c0 = arith.constant 0 : index
    %c0_0 = arith.constant 0 : index
    %c0_1 = arith.constant 0 : index
    %c0_2 = arith.constant 0 : index
    %0 = vector.load %arg2[%c0, %c0_0, %c0_1, %c0_2] : memref<1x18x18x4xbf16, #tpu.memory_space<vmem>>, vector<1x16x16x4xbf16>
    %1 = vector.shape_cast %0 : vector<1x16x16x4xbf16> to vector<16x16x4xbf16>
    %2 = vector.shape_cast %1 : vector<16x16x4xbf16> to vector<256x4xbf16>
    %c0_3 = arith.constant 0 : index
    %c0_4 = arith.constant 0 : index
    %c0_5 = arith.constant 0 : index
    %c0_6 = arith.constant 0 : index
    %3 = vector.load %arg3[%c0_3, %c0_4, %c0_5, %c0_6] : memref<3x3x4x128xbf16, #tpu.memory_space<vmem>>, vector<1x1x4x128xbf16>
    %4 = vector.shape_cast %3 : vector<1x1x4x128xbf16> to vector<4x128xbf16>
    %cst = arith.constant dense<0.000000e+00> : vector<256x128xf32>
    %5 = tpu.matmul %2, %4, %cst {dimension_numbers = #tpu.dot_dimension_numbers<[1], [0], [0], [1], [0, 0, 1, 1], [], []>} : vector<256x4xbf16>, vector<4x128xbf16>, vector<256x128xf32> -> vector<256x128xf32>
    %c0_7 = arith.constant 0 : index
    %c0_8 = arith.constant 0 : index
    %c1 = arith.constant 1 : index
    %c0_9 = arith.constant 0 : index
    %6 = vector.load %arg2[%c0_7, %c0_8, %c1, %c0_9] : memref<1x18x18x4xbf16, #tpu.memory_space<vmem>>, vector<1x16x16x4xbf16>
    %7 = vector.shape_cast %6 : vector<1x16x16x4xbf16> to vector<16x16x4xbf16>
    %8 = vector.shape_cast %7 : vector<16x16x4xbf16> to vector<256x4xbf16>
    %c0_10 = arith.constant 0 : index
    %c1_11 = arith.constant 1 : index
    %c0_12 = arith.constant 0 : index
    %c0_13 = arith.constant 0 : index
    %9 = vector.load %arg3[%c0_10, %c1_11, %c0_12, %c0_13] : memref<3x3x4x128xbf16, #tpu.memory_space<vmem>>, vector<1x1x4x128xbf16>
    %10 = vector.shape_cast %9 : vector<1x1x4x128xbf16> to vector<4x128xbf16>
    %cst_14 = arith.constant dense<0.000000e+00> : vector<256x128xf32>
    %11 = tpu.matmul %8, %10, %cst_14 {dimension_numbers = #tpu.dot_dimension_numbers<[1], [0], [0], [1], [0, 0, 1, 1], [], []>} : vector<256x4xbf16>, vector<4x128xbf16>, vector<256x128xf32> -> vector<256x128xf32>
    %12 = arith.addf %5, %11 : vector<256x128xf32>
    %c0_15 = arith.constant 0 : index
    %c0_16 = arith.constant 0 : index
    %c2 = arith.constant 2 : index
    %c0_17 = arith.constant 0 : index
    %13 = vector.load %arg2[%c0_15, %c0_16, %c2, %c0_17] : memref<1x18x18x4xbf16, #tpu.memory_space<vmem>>, vector<1x16x16x4xbf16>
    %14 = vector.shape_cast %13 : vector<1x16x16x4xbf16> to vector<16x16x4xbf16>
    %15 = vector.shape_cast %14 : vector<16x16x4xbf16> to vector<256x4xbf16>
    %c0_18 = arith.constant 0 : index
    %c2_19 = arith.constant 2 : index
    %c0_20 = arith.constant 0 : index
    %c0_21 = arith.constant 0 : index
    %16 = vector.load %arg3[%c0_18, %c2_19, %c0_20, %c0_21] : memref<3x3x4x128xbf16, #tpu.memory_space<vmem>>, vector<1x1x4x128xbf16>
    %17 = vector.shape_cast %16 : vector<1x1x4x128xbf16> to vector<4x128xbf16>
    %cst_22 = arith.constant dense<0.000000e+00> : vector<256x128xf32>
    %18 = tpu.matmul %15, %17, %cst_22 {dimension_numbers = #tpu.dot_dimension_numbers<[1], [0], [0], [1], [0, 0, 1, 1], [], []>} : vector<256x4xbf16>, vector<4x128xbf16>, vector<256x128xf32> -> vector<256x128xf32>
    %19 = arith.addf %12, %18 : vector<256x128xf32>
    %c0_23 = arith.constant 0 : index
    %c1_24 = arith.constant 1 : index
    %c0_25 = arith.constant 0 : index
    %c0_26 = arith.constant 0 : index
    %20 = vector.load %arg2[%c0_23, %c1_24, %c0_25, %c0_26] : memref<1x18x18x4xbf16, #tpu.memory_space<vmem>>, vector<1x16x16x4xbf16>
    %21 = vector.shape_cast %20 : vector<1x16x16x4xbf16> to vector<16x16x4xbf16>
    %22 = vector.shape_cast %21 : vector<16x16x4xbf16> to vector<256x4xbf16>
    %c1_27 = arith.constant 1 : index
    %c0_28 = arith.constant 0 : index
    %c0_29 = arith.constant 0 : index
    %c0_30 = arith.constant 0 : index
    %23 = vector.load %arg3[%c1_27, %c0_28, %c0_29, %c0_30] : memref<3x3x4x128xbf16, #tpu.memory_space<vmem>>, vector<1x1x4x128xbf16>
    %24 = vector.shape_cast %23 : vector<1x1x4x128xbf16> to vector<4x128xbf16>
    %cst_31 = arith.constant dense<0.000000e+00> : vector<256x128xf32>
    %25 = tpu.matmul %22, %24, %cst_31 {dimension_numbers = #tpu.dot_dimension_numbers<[1], [0], [0], [1], [0, 0, 1, 1], [], []>} : vector<256x4xbf16>, vector<4x128xbf16>, vector<256x128xf32> -> vector<256x128xf32>
    %26 = arith.addf %19, %25 : vector<256x128xf32>
    %c0_32 = arith.constant 0 : index
    %c1_33 = arith.constant 1 : index
    %c1_34 = arith.constant 1 : index
    %c0_35 = arith.constant 0 : index
    %27 = vector.load %arg2[%c0_32, %c1_33, %c1_34, %c0_35] : memref<1x18x18x4xbf16, #tpu.memory_space<vmem>>, vector<1x16x16x4xbf16>
    %28 = vector.shape_cast %27 : vector<1x16x16x4xbf16> to vector<16x16x4xbf16>
    %29 = vector.shape_cast %28 : vector<16x16x4xbf16> to vector<256x4xbf16>
    %c1_36 = arith.constant 1 : index
    %c1_37 = arith.constant 1 : index
    %c0_38 = arith.constant 0 : index
    %c0_39 = arith.constant 0 : index
    %30 = vector.load %arg3[%c1_36, %c1_37, %c0_38, %c0_39] : memref<3x3x4x128xbf16, #tpu.memory_space<vmem>>, vector<1x1x4x128xbf16>
    %31 = vector.shape_cast %30 : vector<1x1x4x128xbf16> to vector<4x128xbf16>
    %cst_40 = arith.constant dense<0.000000e+00> : vector<256x128xf32>
    %32 = tpu.matmul %29, %31, %cst_40 {dimension_numbers = #tpu.dot_dimension_numbers<[1], [0], [0], [1], [0, 0, 1, 1], [], []>} : vector<256x4xbf16>, vector<4x128xbf16>, vector<256x128xf32> -> vector<256x128xf32>
    %33 = arith.addf %26, %32 : vector<256x128xf32>
    %c0_41 = arith.constant 0 : index
    %c1_42 = arith.constant 1 : index
    %c2_43 = arith.constant 2 : index
    %c0_44 = arith.constant 0 : index
    %34 = vector.load %arg2[%c0_41, %c1_42, %c2_43, %c0_44] : memref<1x18x18x4xbf16, #tpu.memory_space<vmem>>, vector<1x16x16x4xbf16>
    %35 = vector.shape_cast %34 : vector<1x16x16x4xbf16> to vector<16x16x4xbf16>
    %36 = vector.shape_cast %35 : vector<16x16x4xbf16> to vector<256x4xbf16>
    %c1_45 = arith.constant 1 : index
    %c2_46 = arith.constant 2 : index
    %c0_47 = arith.constant 0 : index
    %c0_48 = arith.constant 0 : index
    %37 = vector.load %arg3[%c1_45, %c2_46, %c0_47, %c0_48] : memref<3x3x4x128xbf16, #tpu.memory_space<vmem>>, vector<1x1x4x128xbf16>
    %38 = vector.shape_cast %37 : vector<1x1x4x128xbf16> to vector<4x128xbf16>
    %cst_49 = arith.constant dense<0.000000e+00> : vector<256x128xf32>
    %39 = tpu.matmul %36, %38, %cst_49 {dimension_numbers = #tpu.dot_dimension_numbers<[1], [0], [0], [1], [0, 0, 1, 1], [], []>} : vector<256x4xbf16>, vector<4x128xbf16>, vector<256x128xf32> -> vector<256x128xf32>
    %40 = arith.addf %33, %39 : vector<256x128xf32>
    %c0_50 = arith.constant 0 : index
    %c2_51 = arith.constant 2 : index
    %c0_52 = arith.constant 0 : index
    %c0_53 = arith.constant 0 : index
    %41 = vector.load %arg2[%c0_50, %c2_51, %c0_52, %c0_53] : memref<1x18x18x4xbf16, #tpu.memory_space<vmem>>, vector<1x16x16x4xbf16>
    %42 = vector.shape_cast %41 : vector<1x16x16x4xbf16> to vector<16x16x4xbf16>
    %43 = vector.shape_cast %42 : vector<16x16x4xbf16> to vector<256x4xbf16>
    %c2_54 = arith.constant 2 : index
    %c0_55 = arith.constant 0 : index
    %c0_56 = arith.constant 0 : index
    %c0_57 = arith.constant 0 : index
    %44 = vector.load %arg3[%c2_54, %c0_55, %c0_56, %c0_57] : memref<3x3x4x128xbf16, #tpu.memory_space<vmem>>, vector<1x1x4x128xbf16>
    %45 = vector.shape_cast %44 : vector<1x1x4x128xbf16> to vector<4x128xbf16>
    %cst_58 = arith.constant dense<0.000000e+00> : vector<256x128xf32>
    %46 = tpu.matmul %43, %45, %cst_58 {dimension_numbers = #tpu.dot_dimension_numbers<[1], [0], [0], [1], [0, 0, 1, 1], [], []>} : vector<256x4xbf16>, vector<4x128xbf16>, vector<256x128xf32> -> vector<256x128xf32>
    %47 = arith.addf %40, %46 : vector<256x128xf32>
    %c0_59 = arith.constant 0 : index
    %c2_60 = arith.constant 2 : index
    %c1_61 = arith.constant 1 : index
    %c0_62 = arith.constant 0 : index
    %48 = vector.load %arg2[%c0_59, %c2_60, %c1_61, %c0_62] : memref<1x18x18x4xbf16, #tpu.memory_space<vmem>>, vector<1x16x16x4xbf16>
    %49 = vector.shape_cast %48 : vector<1x16x16x4xbf16> to vector<16x16x4xbf16>
    %50 = vector.shape_cast %49 : vector<16x16x4xbf16> to vector<256x4xbf16>
    %c2_63 = arith.constant 2 : index
    %c1_64 = arith.constant 1 : index
    %c0_65 = arith.constant 0 : index
    %c0_66 = arith.constant 0 : index
    %51 = vector.load %arg3[%c2_63, %c1_64, %c0_65, %c0_66] : memref<3x3x4x128xbf16, #tpu.memory_space<vmem>>, vector<1x1x4x128xbf16>
    %52 = vector.shape_cast %51 : vector<1x1x4x128xbf16> to vector<4x128xbf16>
    %cst_67 = arith.constant dense<0.000000e+00> : vector<256x128xf32>
    %53 = tpu.matmul %50, %52, %cst_67 {dimension_numbers = #tpu.dot_dimension_numbers<[1], [0], [0], [1], [0, 0, 1, 1], [], []>} : vector<256x4xbf16>, vector<4x128xbf16>, vector<256x128xf32> -> vector<256x128xf32>
    %54 = arith.addf %47, %53 : vector<256x128xf32>
    %c0_68 = arith.constant 0 : index
    %c2_69 = arith.constant 2 : index
    %c2_70 = arith.constant 2 : index
    %c0_71 = arith.constant 0 : index
    %55 = vector.load %arg2[%c0_68, %c2_69, %c2_70, %c0_71] : memref<1x18x18x4xbf16, #tpu.memory_space<vmem>>, vector<1x16x16x4xbf16>
    %56 = vector.shape_cast %55 : vector<1x16x16x4xbf16> to vector<16x16x4xbf16>
    %57 = vector.shape_cast %56 : vector<16x16x4xbf16> to vector<256x4xbf16>
    %c2_72 = arith.constant 2 : index
    %c2_73 = arith.constant 2 : index
    %c0_74 = arith.constant 0 : index
    %c0_75 = arith.constant 0 : index
    %58 = vector.load %arg3[%c2_72, %c2_73, %c0_74, %c0_75] : memref<3x3x4x128xbf16, #tpu.memory_space<vmem>>, vector<1x1x4x128xbf16>
    %59 = vector.shape_cast %58 : vector<1x1x4x128xbf16> to vector<4x128xbf16>
    %cst_76 = arith.constant dense<0.000000e+00> : vector<256x128xf32>
    %60 = tpu.matmul %57, %59, %cst_76 {dimension_numbers = #tpu.dot_dimension_numbers<[1], [0], [0], [1], [0, 0, 1, 1], [], []>} : vector<256x4xbf16>, vector<4x128xbf16>, vector<256x128xf32> -> vector<256x128xf32>
    %61 = arith.addf %54, %60 : vector<256x128xf32>
    %c0_77 = arith.constant 0 : index
    %c0_78 = arith.constant 0 : index
    %62 = vector.load %arg4[%c0_77, %c0_78] : memref<1x128xf32, #tpu.memory_space<vmem>>, vector<1x128xf32>
    %63 = vector.broadcast %62 : vector<1x128xf32> to vector<256x128xf32>
    %64 = arith.mulf %61, %63 : vector<256x128xf32>
    %c0_79 = arith.constant 0 : index
    %c0_80 = arith.constant 0 : index
    %65 = vector.load %arg5[%c0_79, %c0_80] : memref<1x128xf32, #tpu.memory_space<vmem>>, vector<1x128xf32>
    %66 = vector.broadcast %65 : vector<1x128xf32> to vector<256x128xf32>
    %67 = arith.addf %64, %66 : vector<256x128xf32>
    %cst_81 = arith.constant 0.000000e+00 : f32
    %68 = vector.broadcast %cst_81 : f32 to vector<256x128xf32>
    %69 = arith.maximumf %67, %68 : vector<256x128xf32>
    %70 = vector.shape_cast %69 : vector<256x128xf32> to vector<1x256x128xf32>
    %c0_82 = arith.constant 0 : index
    %c0_83 = arith.constant 0 : index
    %c0_84 = arith.constant 0 : index
    %71 = vector.load %arg6[%c0_82, %c0_83, %c0_84] : memref<1x256x128xf32, #tpu.memory_space<vmem>>, vector<1x256x128xf32>
    tpu.vector_store %arg6[%c0_82, %c0_83, %c0_84], %70 {strides = array<i32>} : memref<1x256x128xf32, #tpu.memory_space<vmem>>, vector<1x256x128xf32>,
    return
  }
  func.func @transform_0(%arg0: i32, %arg1: i32) -> (i32, i32, i32, i32) {
    %c0_i32 = arith.constant 0 : i32
    %c0_i32_0 = arith.constant 0 : i32
    %c0_i32_1 = arith.constant 0 : i32
    %c0_i32_2 = arith.constant 0 : i32
    return %arg0, %c0_i32, %c0_i32_0, %c0_i32_1 : i32, i32, i32, i32
  }
  func.func @transform_1(%arg0: i32, %arg1: i32) -> (i32, i32, i32, i32) {
    %c0_i32 = arith.constant 0 : i32
    %c0_i32_0 = arith.constant 0 : i32
    %c0_i32_1 = arith.constant 0 : i32
    %c0_i32_2 = arith.constant 0 : i32
    return %c0_i32, %c0_i32_0, %c0_i32_1, %arg1 : i32, i32, i32, i32
  }
  func.func @transform_2(%arg0: i32, %arg1: i32) -> (i32, i32) {
    %c0_i32 = arith.constant 0 : i32
    %c0_i32_0 = arith.constant 0 : i32
    return %c0_i32, %arg1 : i32, i32
  }
  func.func @transform_3(%arg0: i32, %arg1: i32) -> (i32, i32) {
    %c0_i32 = arith.constant 0 : i32
    %c0_i32_0 = arith.constant 0 : i32
    return %c0_i32, %arg1 : i32, i32
  }
  func.func @transform_4(%arg0: i32, %arg1: i32) -> (i32, i32, i32) {
    %c0_i32 = arith.constant 0 : i32
    %c0_i32_0 = arith.constant 0 : i32
    return %arg0, %c0_i32, %arg1 : i32, i32, i32
  }
}

</mosaic_0001>

<bundles_post_ra>
// kernel: a_call__.1
= control target key start
LH: loop header
LB: loop body
LE: loop exit
PB: predicated region body
PF: predicated region fallthrough
CT: control target
= control target key end

     0   :  { %s6540_s15 = smov 0   ;;  %s6542_s16 = smov 0   ;;  %s8400_s0 = inlined_call_operand.vmem [shape: bf16[2,18,18,4], index: 0, kind: input, shape index: {}]   ;;  %s8401_s1 = inlined_call_operand.vmem [shape: bf16[3,3,4,128], index: 1, kind: input, shape index: {}]   ;;  %s8402_s2 = inlined_call_operand.vmem [shape: f32[1,128], index: 2, kind: input, shape index: {}]   ;;  %s8403_s3 = inlined_call_operand.vmem [shape: f32[1,128], index: 3, kind: input, shape index: {}]   ;;  %s8404_s4 = inlined_call_operand.vmem [shape: f32[2,256,128], index: 4, kind: output, shape index: {}]  }
   0x1   :  { %s6544_s17 = smov 0  }
   0x2 LB: > { %s26_s18 = sadd.s32 1, %s6509_s16  ;;  %p5089_p0 = scmp.ge.s32.totalorder %s6513_s17, 1  ;;  %s6513_s17 = sphi %s6544_s17, %s14_s17   ;;  %s6509_s16 = sphi %s6542_s16, %s8473_s16   ;;  %s6505_s15 = sphi %s6540_s15, %s8472_s15  }
   0x3   : > { %p28_p1 = scmp.ge.s32.totalorder %s26_s18, 2  ;;  %p201_p2 = scmp.lt.s32.totalorder %s6513_s17, 3 }
   0x5   : > { %s8475_s18 = smov (%p28_p1, %s26_s18), 0  ;;  %p202_p3 = pnand %p5089_p0, %p201_p2 }
   0x7   : > { %205 = sbr.rel (%p202_p3) target bundleno = 590 (0x24e), region = 36 }
   0xe   : > { %v5093_v0 = vld [vmem:[%s8401_s1 + $0x2] sm:$0x3]  ;;  %vm799_vm0 = vcmask 1041408   ;;  %v5320_v1 = vld [vmem:[%s8401_s1 + $0x8] sm:$0x3]  ;;  %p240_p4 = scmp.lt.s32.totalorder %s6505_s15, 1 }
   0xf   : > { %6351 = vmatprep.subr.msk.bf16.mxu1 %vm799_vm0, %v5093_v0  ;;  %6355 = vmatprep.subr.msk.bf16.mxu0 %vm799_vm0, %v5320_v1  ;;  %v801_v2 = vsel %vm799_vm0, %v5093_v0, 0  ;;  %v6568_v3 = vsel %vm799_vm0, %v5320_v1, 0  ;;  %v296_v4 = vld [vmem:[%s8401_s1] sm:$0x3]  ;;  %v5385_v5 = vld [vmem:[%s8401_s1 + $0xa] sm:$0x3] }
  0x10   : > { %8418 = vst [vmem:[#allocation2_spill] sm:$0xff] %v6568_v3  ;;  %5788 = vmatpush3.bf16.msra.mxu1 %v801_v2  ;;  %5924 = vmatpush3.bf16.msra.mxu0 %v6568_v3  ;;  %s8477_s15 = smov (!%p240_p4, %s6505_s15), 1  ;;  %vm313_vm1 = vsmask.f32 3328  ;;  %vm314_vm2 = vsmask.f32 7440 }
  0x11   : > { %6352 = vmatprep.subr.msk.bf16.mxu1 %vm799_vm0, %v296_v4  ;;  %6357 = vmatprep.subr.msk.bf16.mxu0 %vm799_vm0, %v5385_v5  ;;  %s6361_s27 = smul.u32 216, %s8477_s15  ;;  %vm750_vm3 = vcmask 31744   ;;  %v6598_v17 = vsel %vm799_vm0, %v296_v4, 0  ;;  %v6604_v26 = vld [vmem:[%s8401_s1 + $0xc] sm:$0x3]  ;;  %vm6611_vm4 = vmor %vm313_vm1, %vm314_vm2  ;;  %v6617_v37 = vsel %vm799_vm0, %v5385_v5, 0 }
  0x12   : > { %v6621_v41 = vsel %vm799_vm0, %v6604_v26, 0  ;;  %vm1304_vm5 = vcmask 1042432   ;;  %vm1305_vm6 = vcmask 1046532  }
  0x13   : > { %s6585_s30 = scalar_lea.vmem %s8400_s0, %s6361_s27  ;;  %vm6837_vm7 = vmor %vm1304_vm5, %vm1305_vm6  ;;  %s5633_s27 = sshll.u32 %s8477_s15, 8 }
  0x14   : > { %v264_v6 = vld [vmem:[%s6585_s30] sm:$0xf]  ;;  %v265_v7 = vld [vmem:[%s6585_s30 + $0x4] sm:$0xf]  ;;  %v297_v8 = vld [vmem:[%s6585_s30 + $0x8] sm:$0x1] }
  0x15   : > { %v317_v9 = vshrl.u32 %v264_v6, 16  ;;  %v320_v10 = vshll.u32 %v264_v6, 16  ;;  %v326_v11 = vshll.u32 %v265_v7, 16  ;;  %v330_v12 = vshrl.u32 %v265_v7, 16  ;;  %v5272_v13 = vld [vmem:[%s6585_s30 + $0xc] sm:$0xf] }
  0x16   : > { %v336_v14 = vshll.u32 %v297_v8, 16  ;;  %v6592_v15 = vld [vmem:[%s6585_s30 + $0x10] sm:$0xf]  ;;  %v6595_v16 = vld [vmem:[%s6585_s30 + $0x14] sm:$0x1]  ;;  %v2121_v23 = vshrl.u32 %v5272_v13, 16 }
  0x17   : > { %v319_v18 = vrot.slane %v317_v9, 4  ;;  %v322_v19 = vrot.slane %v320_v10, 5  ;;  %v328_v20 = vrot.slane %v326_v11, 5  ;;  %v332_v21 = vrot.slane %v330_v12, 4  ;;  %v266_v31 = vld [vmem:[%s6585_s30 + $0xc] sm:$0xf] }
  0x18   : > { %v338_v22 = vrot.slane %v336_v14, 5  ;;  %v2124_v24 = vshll.u32 %v5272_v13, 16  ;;  %v2130_v25 = vshll.u32 %v6592_v15, 16  ;;  %v2134_v29 = vshrl.u32 %v6592_v15, 16  ;;  %v267_v36 = vld [vmem:[%s6585_s30 + $0x10] sm:$0xf] }
  0x19   : > { %v323_v27 = vor.u32 %v322_v19, %v319_v18  ;;  %v333_v28 = vor.u32 %v332_v21, %v328_v20  ;;  %v2140_v30 = vshll.u32 %v6595_v16, 16  ;;  %v2123_v33 = vrot.slane %v2121_v23, 4  ;;  %v298_v44 = vld [vmem:[%s6585_s30 + $0x14] sm:$0x1]  ;;  %v5275_v55 = vld [vmem:[%s6585_s30 + $0x18] sm:$0xf] }
  0x1a   : > { %v2126_v34 = vrot.slane %v2124_v24, 5  ;;  %v2132_v35 = vrot.slane %v2130_v25, 5  ;;  %v2136_v40 = vrot.slane %v2134_v29, 4  ;;  %v341_v45 = vshrl.u32 %v266_v31, 16  ;;  %v6630_v60 = vld [vmem:[%s6585_s30 + $0x1c] sm:$0xf] }
  0x1b   : > { %v324_v38 = vrot.slane %v323_v27, 4  ;;  %v334_v39 = vrot.slane %v333_v28, 4  ;;  %v2142_v43 = vrot.slane %v2140_v30, 5  ;;  %v344_v46 = vshll.u32 %v266_v31, 16  ;;  %v6638_v1 = vld [vmem:[%s6585_s30 + $0x20] sm:$0x1] }
  0x1c   : > { %v2127_v42 = vor.u32 %v2126_v34, %v2123_v33  ;;  %v2137_v49 = vor.u32 %v2136_v40, %v2132_v35  ;;  %v350_v50 = vshll.u32 %v267_v36, 16  ;;  %v343_v53 = vrot.slane %v341_v45, 4  ;;  %v268_v18 = vld [vmem:[%s6585_s30 + $0x18] sm:$0xf]  ;;  %v269_v23 = vld [vmem:[%s6585_s30 + $0x1c] sm:$0xf] }
  0x1d   : > { %v329_v47 = vsel %vm6611_vm4, %v324_v38, %v328_v20  ;;  %v339_v48 = vsel %vm6611_vm4, %v334_v39, %v338_v22  ;;  %v346_v54 = vrot.slane %v344_v46, 5  ;;  %v354_v58 = vshrl.u32 %v267_v36, 16  ;;  %v299_v31 = vld [vmem:[%s6585_s30 + $0x20] sm:$0x1]  ;;  %v5278_v40 = vld [vmem:[%s6585_s30 + $0x24] sm:$0xf] }
  0x1e   : > { %v5094_v51 = vcombine.low %v329_v47, %v339_v48  ;;  %v2128_v52 = vrot.slane %v2127_v42, 4  ;;  %v2138_v56 = vrot.slane %v2137_v49, 4  ;;  %v352_v57 = vrot.slane %v350_v50, 5  ;;  %v6661_v46 = vld [vmem:[%s6585_s30 + $0x28] sm:$0xf] }
  0x1f   : > { %v360_v59 = vshll.u32 %v298_v44, 16  ;;  %v2864_v62 = vrot.slane %v6592_v15, 5  ;;  %v2867_v63 = vrot.slane %v6595_v16, 5  ;;  %v347_v0 = vor.u32 %v346_v54, %v343_v53  ;;  %v6670_v54 = vld [vmem:[%s6585_s30 + $0x2c] sm:$0x1] }
  0x20   : > { %5789 = vmatprep.mubr.msk.bf16.mxu1 %vm750_vm3, %v5094_v51  ;;  %v2133_v61 = vsel %vm6611_vm4, %v2128_v52, %v2132_v35  ;;  %v2143_v2 = vsel %vm6611_vm4, %v2138_v56, %v2142_v43  ;;  %v356_v4 = vrot.slane %v354_v58, 4  ;;  %v2145_v6 = vshrl.u32 %v5275_v55, 16  ;;  %v5174_v51 = vld [vmem:[%s8401_s1 + $0x4] sm:$0x3]  ;;  %v6870_v16 = vld [vmem:[%s6585_s30 + $0x7c] sm:$0xf] }
  0x21   : > { %v362_v5 = vrot.slane %v360_v59, 5  ;;  %v5321_v7 = vcombine.low %v2133_v61, %v2143_v2  ;;  %v348_v8 = vrot.slane %v347_v0, 4  ;;  %v2148_v9 = vshll.u32 %v5275_v55, 16  ;;  %v270_v0 = vld [vmem:[%s6585_s30 + $0x24] sm:$0xf] }
  0x22   : > { %v2154_v10 = vshll.u32 %v6630_v60, 16  ;;  %v357_v11 = vor.u32 %v356_v4, %v352_v57  ;;  %v2147_v12 = vrot.slane %v2145_v6, 4  ;;  %v2158_v13 = vshrl.u32 %v6630_v60, 16 }
  0x23   : > { %v2164_v14 = vshll.u32 %v6638_v1, 16  ;;  %5925 = vmatprep.mubr.msk.bf16.mxu0 %vm750_vm3, %v5321_v7  ;;  %v353_v19 = vsel %vm6611_vm4, %v348_v8, %v352_v57  ;;  %v2150_v20 = vrot.slane %v2148_v9, 5  ;;  %v2871_v22 = vrot.slane %v6630_v60, 5  ;;  %v271_v7 = vld [vmem:[%s6585_s30 + $0x28] sm:$0xf] }
  0x24   : > { %v2156_v21 = vrot.slane %v2154_v10, 5  ;;  %v358_v24 = vrot.slane %v357_v11, 4  ;;  %v2160_v25 = vrot.slane %v2158_v13, 4  ;;  %v2874_v28 = vrot.slane %v6638_v1, 5  ;;  %v300_v13 = vld [vmem:[%s6585_s30 + $0x2c] sm:$0x1] }
  0x25   : > { %v2166_v27 = vrot.slane %v2164_v14, 5  ;;  %v2151_v29 = vor.u32 %v2150_v20, %v2147_v12  ;;  %v6654_v30 = vrot.slane %v2871_v22, 4  ;;  %v365_v33 = vshrl.u32 %v268_v18, 16 }
  0x26   : > { %v368_v34 = vshll.u32 %v268_v18, 16  ;;  %v363_v35 = vsel %vm6611_vm4, %v358_v24, %v362_v5  ;;  %v2161_v36 = vor.u32 %v2160_v25, %v2156_v21  ;;  %v374_v38 = vshll.u32 %v269_v23, 16  ;;  %v5281_v24 = vld [vmem:[%s6585_s30 + $0x30] sm:$0xf] }
  0x27   : > { %v378_v39 = vshrl.u32 %v269_v23, 16  ;;  %v5095_v42 = vcombine.low %v353_v19, %v363_v35  ;;  %v2152_v43 = vrot.slane %v2151_v29, 4  ;;  %v367_v44 = vrot.slane %v365_v33, 4  ;;  %v6690_v33 = vld [vmem:[%s6585_s30 + $0x34] sm:$0xf] }
  0x28   : > { %v370_v45 = vrot.slane %v368_v34, 5  ;;  %v2162_v47 = vrot.slane %v2161_v36, 4  ;;  %v376_v48 = vrot.slane %v374_v38, 5  ;;  %v384_v50 = vshll.u32 %v299_v31, 16 }
  0x29   : > { %v380_v49 = vrot.slane %v378_v39, 4  ;;  %5790 = vmatmul.mubr.msk.bf16.vlgmr.msra.gmra.mrb[0].mxu1 %vm750_vm3, %v5095_v42  ;;  %v2157_v52 = vsel %vm6611_vm4, %v2152_v43, %v2156_v21  ;;  %v2169_v55 = vshrl.u32 %v5278_v40, 16  ;;  %v2172_v56 = vshll.u32 %v5278_v40, 16  ;;  %v6698_v40 = vld [vmem:[%s6585_s30 + $0x38] sm:$0x1] }
  0x2a   : > { %v371_v53 = vor.u32 %v370_v45, %v367_v44  ;;  %5822 = vmatpush3.bf16.msra.mxu1 %v6598_v17  ;;  %v2167_v57 = vsel %vm6611_vm4, %v2162_v47, %v2166_v27  ;;  %v386_v59 = vrot.slane %v384_v50, 5  ;;  %v2178_v61 = vshll.u32 %v6661_v46, 16 }
  0x2b   : > { %v381_v58 = vor.u32 %v380_v49, %v376_v48  ;;  %v5322_v2 = vcombine.low %v2157_v52, %v2167_v57  ;;  %v2171_v5 = vrot.slane %v2169_v55, 4  ;;  %v2174_v6 = vrot.slane %v2172_v56, 5  ;;  %6353 = vmatprep.subr.msk.bf16.mxu1 %vm799_vm0, %v5174_v51  ;;  %v272_v52 = vld [vmem:[%s6585_s30 + $0x30] sm:$0xf] }
  0x2c   : > { %v372_v4 = vrot.slane %v371_v53, 4  ;;  %v2180_v9 = vrot.slane %v2178_v61, 5  ;;  %v2182_v17 = vshrl.u32 %v6661_v46, 16  ;;  %v2188_v10 = vshll.u32 %v6670_v54, 16 }
  0x2d   : > { %v382_v8 = vrot.slane %v381_v58, 4  ;;  %5926 = vmatmul.mubr.msk.bf16.vlgmr.msra.gmra.mrb[0].mxu0 %vm750_vm3, %v5322_v2  ;;  %v2175_v12 = vor.u32 %v2174_v6, %v2171_v5  ;;  %v389_v14 = vshrl.u32 %v270_v0, 16  ;;  %v392_v18 = vshll.u32 %v270_v0, 16  ;;  %v273_v58 = vld [vmem:[%s6585_s30 + $0x34] sm:$0xf] }
  0x2e   : > { %v377_v11 = vsel %vm6611_vm4, %v372_v4, %v376_v48  ;;  %5958 = vmatpush3.bf16.msra.mxu0 %v6617_v37  ;;  %v2184_v20 = vrot.slane %v2182_v17, 4  ;;  %v2190_v21 = vrot.slane %v2188_v10, 5  ;;  %v398_v23 = vshll.u32 %v271_v7, 16  ;;  %v301_v4 = vld [vmem:[%s6585_s30 + $0x38] sm:$0x1] }
  0x2f   : > { %v387_v19 = vsel %vm6611_vm4, %v382_v8, %v386_v59  ;;  %v2176_v27 = vrot.slane %v2175_v12, 4  ;;  %v391_v29 = vrot.slane %v389_v14, 4  ;;  %v394_v31 = vrot.slane %v392_v18, 5  ;;  %6358 = vmatprep.subr.msk.bf16.mxu0 %vm799_vm0, %v6604_v26  ;;  %v5284_v12 = vld [vmem:[%s6585_s30 + $0x3c] sm:$0xf] }
  0x30   : > { %v5096_v25 = vcombine.low %v377_v11, %v387_v19  ;;  %v2185_v34 = vor.u32 %v2184_v20, %v2180_v9  ;;  %v400_v35 = vrot.slane %v398_v23, 5  ;;  %v402_v37 = vshrl.u32 %v271_v7, 16  ;;  %v6715_v20 = vld [vmem:[%s6585_s30 + $0x40] sm:$0xf] }
  0x31   : > { %v408_v36 = vshll.u32 %v300_v13, 16  ;;  %v2181_v38 = vsel %vm6611_vm4, %v2176_v27, %v2180_v9  ;;  %v395_v39 = vor.u32 %v394_v31, %v391_v29  ;;  %v2193_v42 = vshrl.u32 %v5281_v24, 16 }
  0x32   : > { %5793 = vmatprep.mubr.msk.bf16.mxu1 %vm750_vm3, %v5096_v25  ;;  %v2196_v43 = vshll.u32 %v5281_v24, 16  ;;  %v2186_v44 = vrot.slane %v2185_v34, 4  ;;  %v404_v45 = vrot.slane %v402_v37, 4  ;;  %v2202_v26 = vshll.u32 %v6690_v33, 16  ;;  %v6720_v34 = vld [vmem:[%s6585_s30 + $0x44] sm:$0x1] }
  0x33   : > { %v410_v47 = vrot.slane %v408_v36, 5  ;;  %v396_v48 = vrot.slane %v395_v39, 4  ;;  %v2195_v49 = vrot.slane %v2193_v42, 4  ;;  %v2206_v51 = vshrl.u32 %v6690_v33, 16  ;;  %v274_v42 = vld [vmem:[%s6585_s30 + $0x3c] sm:$0xf] }
  0x34   : > { %v2198_v50 = vrot.slane %v2196_v43, 5  ;;  %v2191_v53 = vsel %vm6611_vm4, %v2186_v44, %v2190_v21  ;;  %v405_v55 = vor.u32 %v404_v45, %v400_v35  ;;  %v2204_v56 = vrot.slane %v2202_v26, 5  ;;  %v275_v26 = vld [vmem:[%s6585_s30 + $0x40] sm:$0xf] }
  0x35   : > { %v2212_v57 = vshll.u32 %v6698_v40, 16  ;;  %v5323_v59 = vcombine.low %v2181_v38, %v2191_v53  ;;  %v401_v61 = vsel %vm6611_vm4, %v396_v48, %v400_v35  ;;  %v2208_v2 = vrot.slane %v2206_v51, 4 }
  0x36   : > { %v2199_v0 = vor.u32 %v2198_v50, %v2195_v49  ;;  %v406_v5 = vrot.slane %v405_v55, 4  ;;  %v413_v7 = vshrl.u32 %v272_v52, 16  ;;  %v416_v8 = vshll.u32 %v272_v52, 16 }
  0x37   : > { %v2214_v6 = vrot.slane %v2212_v57, 5  ;;  %5929 = vmatprep.mubr.msk.bf16.mxu0 %vm750_vm3, %v5323_v59  ;;  %v2209_v17 = vor.u32 %v2208_v2, %v2204_v56  ;;  %v422_v10 = vshll.u32 %v273_v58, 16  ;;  %v426_v11 = vshrl.u32 %v273_v58, 16  ;;  %v5287_v2 = vld [vmem:[%s6585_s30 + $0x48] sm:$0xf] }
  0x38   : > { %v2200_v9 = vrot.slane %v2199_v0, 4  ;;  %v411_v13 = vsel %vm6611_vm4, %v406_v5, %v410_v47  ;;  %v415_v14 = vrot.slane %v413_v7, 4  ;;  %v418_v18 = vrot.slane %v416_v8, 5  ;;  %v6738_v8 = vld [vmem:[%s6585_s30 + $0x4c] sm:$0xf] }
  0x39   : > { %v432_v19 = vshll.u32 %v301_v4, 16  ;;  %v5097_v21 = vcombine.low %v401_v61, %v411_v13  ;;  %v2210_v24 = vrot.slane %v2209_v17, 4  ;;  %v424_v25 = vrot.slane %v422_v10, 5  ;;  %v302_v61 = vld [vmem:[%s6585_s30 + $0x44] sm:$0x1] }
  0x3a   : > { %v2205_v23 = vsel %vm6611_vm4, %v2200_v9, %v2204_v56  ;;  %v419_v27 = vor.u32 %v418_v18, %v415_v14  ;;  %v428_v29 = vrot.slane %v426_v11, 4  ;;  %v2217_v35 = vshrl.u32 %v5284_v12, 16 }
  0x3b   : > { %v434_v31 = vrot.slane %v432_v19, 5  ;;  %5794 = vmatmul.mubr.msk.bf16.gmra.mrb[4].mxu1 %vm750_vm3, %v5097_v21  ;;  %v2215_v37 = vsel %vm6611_vm4, %v2210_v24, %v2214_v6  ;;  %v2220_v36 = vshll.u32 %v5284_v12, 16  ;;  %v2226_v38 = vshll.u32 %v6715_v20, 16 }
  0x3c   : > { %v2230_v39 = vshrl.u32 %v6715_v20, 16  ;;  %v5324_v43 = vcombine.low %v2205_v23, %v2215_v37  ;;  %v420_v44 = vrot.slane %v419_v27, 4  ;;  %v429_v45 = vor.u32 %v428_v29, %v424_v25  ;;  %v6746_v23 = vld [vmem:[%s6585_s30 + $0x50] sm:$0x1]  ;;  %v6750_v27 = vld [vmem:[%s6585_s30 + $0x48] sm:$0xf] }
  0x3d   : > { %v2219_v47 = vrot.slane %v2217_v35, 4  ;;  %v2222_v48 = vrot.slane %v2220_v36, 5  ;;  %v2228_v49 = vrot.slane %v2226_v38, 5  ;;  %v2236_v51 = vshll.u32 %v6720_v34, 16  ;;  %v6753_v36 = vld [vmem:[%s6585_s30 + $0x4c] sm:$0xf] }
  0x3e   : > { %v2232_v50 = vrot.slane %v2230_v39, 4  ;;  %5930 = vmatmul.mubr.msk.bf16.gmra.mrb[4].mxu0 %vm750_vm3, %v5324_v43  ;;  %v425_v52 = vsel %vm6611_vm4, %v420_v44, %v424_v25  ;;  %v430_v53 = vrot.slane %v429_v45, 4  ;;  %v437_v55 = vshrl.u32 %v274_v42, 16 }
  0x3f   : > { %v440_v56 = vshll.u32 %v274_v42, 16  ;;  %v2223_v57 = vor.u32 %v2222_v48, %v2219_v47  ;;  %v2238_v59 = vrot.slane %v2236_v51, 5  ;;  %v446_v0 = vshll.u32 %v275_v26, 16 }
  0x40   : > { %v2233_v58 = vor.u32 %v2232_v50, %v2228_v49  ;;  %v435_v4 = vsel %vm6611_vm4, %v430_v53, %v434_v31  ;;  %v439_v5 = vrot.slane %v437_v55, 4  ;;  %v450_v7 = vshrl.u32 %v275_v26, 16  ;;  %v303_v26 = vld [vmem:[%s6585_s30 + $0x50] sm:$0x1]  ;;  %v5290_v53 = vld [vmem:[%s6585_s30 + $0x54] sm:$0xf] }
  0x41   : > { %v442_v6 = vrot.slane %v440_v56, 5  ;;  %v5098_v9 = vcombine.low %v425_v52, %v435_v4  ;;  %v2224_v17 = vrot.slane %v2223_v57, 4  ;;  %v448_v11 = vrot.slane %v446_v0, 5  ;;  %v6769_v4 = vld [vmem:[%s6585_s30 + $0x58] sm:$0xf] }
  0x42   : > { %v2234_v10 = vrot.slane %v2233_v58, 4  ;;  %v452_v13 = vrot.slane %v450_v7, 4  ;;  %v456_v14 = vshll.u32 %v302_v61, 16  ;;  %v2241_v18 = vshrl.u32 %v5287_v2, 16 }
  0x43   : > { %v443_v12 = vor.u32 %v442_v6, %v439_v5  ;;  %5797 = vmatprep.mubr.msk.bf16.mxu1 %vm750_vm3, %v5098_v9  ;;  %v2229_v19 = vsel %vm6611_vm4, %v2224_v17, %v2228_v49  ;;  %v2244_v24 = vshll.u32 %v5287_v2, 16  ;;  %v2250_v25 = vshll.u32 %v6738_v8, 16 }
  0x44   : > { %v2239_v21 = vsel %vm6611_vm4, %v2234_v10, %v2238_v59  ;;  %v453_v35 = vor.u32 %v452_v13, %v448_v11  ;;  %v458_v37 = vrot.slane %v456_v14, 5  ;;  %v2243_v38 = vrot.slane %v2241_v18, 4 }
  0x45   : > { %v5325_v29 = vcombine.low %v2229_v19, %v2239_v21  ;;  %v444_v31 = vrot.slane %v443_v12, 4  ;;  %v2246_v39 = vrot.slane %v2244_v24, 5  ;;  %v2252_v42 = vrot.slane %v2250_v25, 5  ;;  %v6775_v12 = vld [vmem:[%s6585_s30 + $0x5c] sm:$0x1] }
  0x46   : > { %v2254_v43 = vshrl.u32 %v6738_v8, 16  ;;  %v454_v45 = vrot.slane %v453_v35, 4  ;;  %v2260_v47 = vshll.u32 %v6746_v23, 16  ;;  %v461_v48 = vshrl.u32 %v6750_v27, 16  ;;  %v6779_v24 = vld [vmem:[%s6585_s30 + $0x54] sm:$0xf] }
  0x47   : > { %5933 = vmatprep.mubr.msk.bf16.mxu0 %vm750_vm3, %v5325_v29  ;;  %v449_v44 = vsel %vm6611_vm4, %v444_v31, %v448_v11  ;;  %v2247_v49 = vor.u32 %v2246_v39, %v2243_v38  ;;  %v464_v51 = vshll.u32 %v6750_v27, 16  ;;  %v470_v52 = vshll.u32 %v6753_v36, 16 }
  0x48   : > { %v2256_v50 = vrot.slane %v2254_v43, 4  ;;  %v459_v55 = vsel %vm6611_vm4, %v454_v45, %v458_v37  ;;  %v2262_v56 = vrot.slane %v2260_v47, 5  ;;  %v463_v57 = vrot.slane %v461_v48, 4  ;;  %v6785_v37 = vld [vmem:[%s6585_s30 + $0x58] sm:$0xf] }
  0x49   : > { %v474_v58 = vshrl.u32 %v6753_v36, 16  ;;  %v5099_v59 = vcombine.low %v449_v44, %v459_v55  ;;  %v2248_v61 = vrot.slane %v2247_v49, 4  ;;  %v466_v2 = vrot.slane %v464_v51, 5 }
  0x4a   : > { %v2257_v0 = vor.u32 %v2256_v50, %v2252_v42  ;;  %v472_v5 = vrot.slane %v470_v52, 5  ;;  %v480_v7 = vshll.u32 %v303_v26, 16  ;;  %v2265_v9 = vshrl.u32 %v5290_v53, 16  ;;  %v304_v26 = vld [vmem:[%s6585_s30 + $0x5c] sm:$0x1] }
  0x4b   : > { %v476_v6 = vrot.slane %v474_v58, 4  ;;  %5798 = vmatmul.mubr.msk.bf16.gmra.mrb[8].mxu1 %vm750_vm3, %v5099_v59  ;;  %v2253_v17 = vsel %vm6611_vm4, %v2248_v61, %v2252_v42  ;;  %v467_v11 = vor.u32 %v466_v2, %v463_v57  ;;  %v2268_v13 = vshll.u32 %v5290_v53, 16  ;;  %v5293_v53 = vld [vmem:[%s6585_s30 + $0x60] sm:$0xf]  ;;  %v6799_v59 = vld [vmem:[%s6585_s30 + $0x64] sm:$0xf] }
  0x4c   : > { %v2258_v10 = vrot.slane %v2257_v0, 4  ;;  %v482_v18 = vrot.slane %v480_v7, 5  ;;  %v2267_v19 = vrot.slane %v2265_v9, 4  ;;  %v2274_v21 = vshll.u32 %v6769_v4, 16  ;;  %v6806_v9 = vld [vmem:[%s6585_s30 + $0x68] sm:$0x1] }
  0x4d   : > { %v477_v14 = vor.u32 %v476_v6, %v472_v5  ;;  %v468_v29 = vrot.slane %v467_v11, 4  ;;  %v2270_v31 = vrot.slane %v2268_v13, 5  ;;  %v2278_v35 = vshrl.u32 %v6769_v4, 16 }
  0x4e   : > { %v2263_v25 = vsel %vm6611_vm4, %v2258_v10, %v2262_v56  ;;  %v2276_v42 = vrot.slane %v2274_v21, 5  ;;  %v2284_v43 = vshll.u32 %v6775_v12, 16  ;;  %v485_v48 = vshrl.u32 %v6779_v24, 16 }
  0x4f   : > { %v5326_v38 = vcombine.low %v2253_v17, %v2263_v25  ;;  %v478_v39 = vrot.slane %v477_v14, 4  ;;  %v473_v44 = vsel %vm6611_vm4, %v468_v29, %v472_v5  ;;  %v2271_v45 = vor.u32 %v2270_v31, %v2267_v19  ;;  %v6810_v19 = vld [vmem:[%s6585_s30 + $0x60] sm:$0xf] }
  0x50   : > { %v2280_v47 = vrot.slane %v2278_v35, 4  ;;  %v2286_v50 = vrot.slane %v2284_v43, 5  ;;  %v488_v51 = vshll.u32 %v6779_v24, 16  ;;  %v494_v52 = vshll.u32 %v6785_v37, 16  ;;  %v6816_v35 = vld [vmem:[%s6585_s30 + $0x64] sm:$0xf] }
  0x51   : > { %5934 = vmatmul.mubr.msk.bf16.gmra.mrb[8].mxu0 %vm750_vm3, %v5326_v38  ;;  %v483_v49 = vsel %vm6611_vm4, %v478_v39, %v482_v18  ;;  %v2272_v56 = vrot.slane %v2271_v45, 4  ;;  %v487_v58 = vrot.slane %v485_v48, 4  ;;  %v498_v2 = vshrl.u32 %v6785_v37, 16 }
  0x52   : > { %v5100_v55 = vcombine.low %v473_v44, %v483_v49  ;;  %v2281_v57 = vor.u32 %v2280_v47, %v2276_v42  ;;  %v490_v61 = vrot.slane %v488_v51, 5  ;;  %v496_v0 = vrot.slane %v494_v52, 5 }
  0x53   : > { %v504_v5 = vshll.u32 %v304_v26, 16  ;;  %v2277_v6 = vsel %vm6611_vm4, %v2272_v56, %v2276_v42  ;;  %v2289_v17 = vshrl.u32 %v5293_v53, 16  ;;  %v2292_v10 = vshll.u32 %v5293_v53, 16 }
  0x54   : > { %5801 = vmatprep.mubr.msk.bf16.mxu1 %vm750_vm3, %v5100_v55  ;;  %v2282_v7 = vrot.slane %v2281_v57, 4  ;;  %v491_v11 = vor.u32 %v490_v61, %v487_v58  ;;  %v500_v13 = vrot.slane %v498_v2, 4  ;;  %v2298_v18 = vshll.u32 %v6799_v59, 16  ;;  %v5353_v58 = vld [vmem:[%s6585_s30 + $0xc] sm:$0xe] }
  0x55   : > { %v506_v14 = vrot.slane %v504_v5, 5  ;;  %v2291_v25 = vrot.slane %v2289_v17, 4  ;;  %v2294_v29 = vrot.slane %v2292_v10, 5  ;;  %v2302_v31 = vshrl.u32 %v6799_v59, 16 }
  0x56   : > { %v2287_v21 = vsel %vm6611_vm4, %v2282_v7, %v2286_v50  ;;  %v492_v39 = vrot.slane %v491_v11, 4  ;;  %v501_v42 = vor.u32 %v500_v13, %v496_v0  ;;  %v2300_v43 = vrot.slane %v2298_v18, 5  ;;  %v305_v50 = vld [vmem:[%s6585_s30 + $0x68] sm:$0x1] }
  0x57   : > { %v5327_v38 = vcombine.low %v2277_v6, %v2287_v21  ;;  %v2295_v44 = vor.u32 %v2294_v29, %v2291_v25  ;;  %v2304_v45 = vrot.slane %v2302_v31, 4  ;;  %v2308_v47 = vshll.u32 %v6806_v9, 16  ;;  %v6844_v29 = vld [vmem:[%s6585_s30 + $0x70] sm:$0xf] }
  0x58   : > { %v509_v26 = vshrl.u32 %v6810_v19, 16  ;;  %v497_v48 = vsel %vm6611_vm4, %v492_v39, %v496_v0  ;;  %v502_v49 = vrot.slane %v501_v42, 4  ;;  %v512_v51 = vshll.u32 %v6810_v19, 16  ;;  %v6831_v0 = vld [vmem:[%s6585_s30 + $0x6c] sm:$0xf] }
  0x59   : > { %5937 = vmatprep.mubr.msk.bf16.mxu0 %vm750_vm3, %v5327_v38  ;;  %v518_v52 = vshll.u32 %v6816_v35, 16  ;;  %v2296_v53 = vrot.slane %v2295_v44, 4  ;;  %v2305_v55 = vor.u32 %v2304_v45, %v2300_v43  ;;  %v2310_v56 = vrot.slane %v2308_v47, 5 }
  0x5a   : > { %v511_v57 = vrot.slane %v509_v26, 4  ;;  %v507_v61 = vsel %vm6611_vm4, %v502_v49, %v506_v14  ;;  %v514_v2 = vrot.slane %v512_v51, 5  ;;  %v522_v6 = vshrl.u32 %v6816_v35, 16  ;;  %v306_v26 = vld [vmem:[%s6585_s30 + $0x74] sm:$0x1] }
  0x5b   : > { %v520_v5 = vrot.slane %v518_v52, 5  ;;  %v5101_v7 = vcombine.low %v497_v48, %v507_v61  ;;  %v2301_v17 = vsel %vm6611_vm4, %v2296_v53, %v2300_v43  ;;  %v2306_v10 = vrot.slane %v2305_v55, 4  ;;  %v5354_v48 = vld [vmem:[%s6585_s30 + $0x18] sm:$0xe] }
  0x5c   : > { %v528_v11 = vshll.u32 %v305_v50, 16  ;;  %v515_v14 = vor.u32 %v514_v2, %v511_v57  ;;  %v524_v18 = vrot.slane %v522_v6, 4  ;;  %v5369_v21 = vrot.slane %v5353_v58, 9  ;;  %v6863_v53 = vld [vmem:[%s6585_s30 + $0x78] sm:$0xf] }
  0x5d   : > { %v2866_v25 = vrot.slane %v2864_v62, 4  ;;  %5802 = vmatmul.mubr.msk.bf16.gmra.mrb[12].mxu1 %vm750_vm3, %v5101_v7  ;;  %v2311_v31 = vsel %vm6611_vm4, %v2306_v10, %v2310_v56  ;;  %v533_v39 = vshrl.u32 %v6831_v0, 16  ;;  %v536_v42 = vshll.u32 %v6831_v0, 16  ;;  %v307_v57 = vld [vmem:[%s6585_s30 + $0x80] sm:$0x1] }
  0x5e   : > { %v530_v38 = vrot.slane %v528_v11, 5  ;;  %v5328_v43 = vcombine.low %v2301_v17, %v2311_v31  ;;  %v516_v44 = vrot.slane %v515_v14, 4  ;;  %v525_v45 = vor.u32 %v524_v18, %v520_v5  ;;  %v5355_v10 = vld [vmem:[%s6585_s30 + $0x24] sm:$0xe] }
  0x5f   : > { %v2865_v47 = vsel %vm6837_vm7, %v5369_v21, %v2864_v62  ;;  %v2868_v49 = vsel %vm6837_vm7, %v2866_v25, %v2867_v63  ;;  %v535_v50 = vrot.slane %v533_v39, 4  ;;  %v538_v51 = vrot.slane %v536_v42, 5  ;;  %v6889_v39 = vld [vmem:[%s6585_s30 + $0x84] sm:$0xf] }
  0x60   : > { %v542_v52 = vshll.u32 %v6844_v29, 16  ;;  %5938 = vmatmul.mubr.msk.bf16.gmra.mrb[12].mxu0 %vm750_vm3, %v5328_v43  ;;  %v521_v15 = vsel %vm6611_vm4, %v516_v44, %v520_v5  ;;  %v526_v62 = vrot.slane %v525_v45, 4  ;;  %v5386_v55 = vcombine.low %v2865_v47, %v2868_v49  ;;  %v6897_v43 = vld [vmem:[%s6585_s30 + $0x88] sm:$0xf] }
  0x61   : > { %v546_v56 = vshrl.u32 %v6844_v29, 16  ;;  %v539_v63 = vor.u32 %v538_v51, %v535_v50  ;;  %v552_v61 = vshll.u32 %v306_v26, 16  ;;  %v5370_v2 = vrot.slane %v5354_v48, 9 }
  0x62   : > { %v544_v58 = vrot.slane %v542_v52, 5  ;;  %v531_v6 = vsel %vm6611_vm4, %v526_v62, %v530_v38  ;;  %5959 = vmatprep.mubr.msk.bf16.mxu0 %vm750_vm3, %v5386_v55  ;;  %v2875_v5 = vsel %vm6837_vm7, %v6654_v30, %v2874_v28  ;;  %v557_v17 = vshrl.u32 %v6863_v53, 16  ;;  %v308_v52 = vld [vmem:[%s6585_s30 + $0x8c] sm:$0x1] }
  0x63   : > { %v548_v7 = vrot.slane %v546_v56, 4  ;;  %v5102_v11 = vcombine.low %v521_v15, %v531_v6  ;;  %v540_v14 = vrot.slane %v539_v63, 4  ;;  %v554_v18 = vrot.slane %v552_v61, 5 }
  0x64   : > { %v2872_v21 = vsel %vm6837_vm7, %v5370_v2, %v2871_v22  ;;  %v559_v38 = vrot.slane %v557_v17, 4  ;;  %v560_v1 = vshll.u32 %v6863_v53, 16  ;;  %v566_v30 = vshll.u32 %v6870_v16, 16  ;;  %v6902_v22 = vld [vmem:[%s8401_s1 + $0xe] sm:$0x3] }
  0x65   : > { %v549_v25 = vor.u32 %v548_v7, %v544_v58  ;;  %v5387_v31 = vcombine.low %v2872_v21, %v2875_v5  ;;  %5805 = vmatprep.mubr.msk.bf16.mxu1 %vm750_vm3, %v5102_v11  ;;  %v545_v28 = vsel %vm6611_vm4, %v540_v14, %v544_v58  ;;  %v570_v60 = vshrl.u32 %v6870_v16, 16  ;;  %v6921_v5 = vld [vmem:[%s6585_s30 + $0x90] sm:$0xf] }
  0x66   : > { %v576_v42 = vshll.u32 %v307_v57, 16  ;;  %v562_v45 = vrot.slane %v560_v1, 5  ;;  %v5371_v47 = vrot.slane %v5355_v10, 9  ;;  %v2878_v26 = vrot.slane %v6661_v46, 5  ;;  %v5356_v57 = vld [vmem:[%s6585_s30 + $0x30] sm:$0xe] }
  0x67   : > { %v550_v44 = vrot.slane %v549_v25, 4  ;;  %v568_v48 = vrot.slane %v566_v30, 5  ;;  %v572_v49 = vrot.slane %v570_v60, 4  ;;  %v2881_v51 = vrot.slane %v6670_v54, 5  ;;  %v6933_v30 = vld [vmem:[%s6585_s30 + $0x94] sm:$0xf] }
  0x68   : > { %v578_v50 = vrot.slane %v576_v42, 5  ;;  %5960 = vmatmul.mubr.msk.bf16.vlgmr.msra.gmra.mrb[0].mxu0 %vm750_vm3, %v5387_v31  ;;  %v563_v62 = vor.u32 %v562_v45, %v559_v38  ;;  %v2879_v55 = vsel %vm6837_vm7, %v5371_v47, %v2878_v26  ;;  %v2880_v56 = vrot.slane %v2878_v26, 4  ;;  %v309_v60 = vld [vmem:[%s6585_s30 + $0x98] sm:$0x1]  ;;  %v5357_v26 = vld [vmem:[%s6585_s30 + $0x3c] sm:$0xe] }
  0x69   : > { %v555_v15 = vsel %vm6611_vm4, %v550_v44, %v554_v18  ;;  %5992 = vmatpush3.bf16.msra.mxu0 %v6621_v41  ;;  %v573_v46 = vor.u32 %v572_v49, %v568_v48  ;;  %v581_v58 = vshrl.u32 %v6889_v39, 16  ;;  %v584_v54 = vshll.u32 %v6889_v39, 16 }
  0x6a   : > { %v5103_v63 = vcombine.low %v545_v28, %v555_v15  ;;  %v564_v61 = vrot.slane %v563_v62, 4  ;;  %v2882_v2 = vsel %vm6837_vm7, %v2880_v56, %v2881_v51  ;;  %v590_v6 = vshll.u32 %v6897_v43, 16  ;;  %6359 = vmatprep.subr.msk.bf16.mxu0 %vm799_vm0, %v6902_v22 }
  0x6b   : > { %v594_v7 = vshrl.u32 %v6897_v43, 16  ;;  %v574_v41 = vrot.slane %v573_v46, 4  ;;  %v5388_v17 = vcombine.low %v2879_v55, %v2882_v2  ;;  %v583_v10 = vrot.slane %v581_v58, 4  ;;  %v6953_v46 = vld [vmem:[%s6585_s30 + $0xa0] sm:$0xf] }
  0x6c   : > { %5806 = vmatmul.mubr.msk.bf16.gmra.mrb[16].mxu1 %vm750_vm3, %v5103_v63  ;;  %v586_v11 = vrot.slane %v584_v54, 5  ;;  %v569_v14 = vsel %vm6611_vm4, %v564_v61, %v568_v48  ;;  %v592_v18 = vrot.slane %v590_v6, 5  ;;  %v600_v25 = vshll.u32 %v308_v52, 16  ;;  %v6942_v52 = vld [vmem:[%s6585_s30 + $0x9c] sm:$0xf] }
  0x6d   : > { %v596_v21 = vrot.slane %v594_v7, 4  ;;  %v579_v31 = vsel %vm6611_vm4, %v574_v41, %v578_v50  ;;  %5963 = vmatprep.mubr.msk.bf16.mxu0 %vm750_vm3, %v5388_v17  ;;  %v5372_v1 = vrot.slane %v5356_v57, 9  ;;  %v2885_v28 = vrot.slane %v6690_v33, 5 }
  0x6e   : > { %v587_v38 = vor.u32 %v586_v11, %v583_v10  ;;  %v5104_v42 = vcombine.low %v569_v14, %v579_v31  ;;  %v602_v45 = vrot.slane %v600_v25, 5  ;;  %v2888_v47 = vrot.slane %v6698_v40, 5  ;;  %v310_v10 = vld [vmem:[%s6585_s30 + $0xa4] sm:$0x1]  ;;  %v5358_v11 = vld [vmem:[%s6585_s30 + $0x48] sm:$0xe] }
  0x6f   : > { %v597_v44 = vor.u32 %v596_v21, %v592_v18  ;;  %v2886_v49 = vsel %vm6837_vm7, %v5372_v1, %v2885_v28  ;;  %v2887_v50 = vrot.slane %v2885_v28, 4  ;;  %v605_v51 = vshrl.u32 %v6921_v5, 16 }
  0x70   : > { %v588_v48 = vrot.slane %v587_v38, 4  ;;  %5809 = vmatprep.mubr.msk.bf16.mxu1 %vm750_vm3, %v5104_v42  ;;  %v608_v15 = vshll.u32 %v6921_v5, 16  ;;  %v614_v62 = vshll.u32 %v6933_v30, 16  ;;  %v618_v40 = vshrl.u32 %v6933_v30, 16 }
  0x71   : > { %v598_v33 = vrot.slane %v597_v44, 4  ;;  %v2889_v56 = vsel %vm6837_vm7, %v2887_v50, %v2888_v47  ;;  %v607_v57 = vrot.slane %v605_v51, 4  ;;  %v624_v63 = vshll.u32 %v309_v60, 16 }
  0x72   : > { %v593_v55 = vsel %vm6611_vm4, %v588_v48, %v592_v18  ;;  %v5389_v54 = vcombine.low %v2886_v49, %v2889_v56  ;;  %v610_v61 = vrot.slane %v608_v15, 5  ;;  %v616_v2 = vrot.slane %v614_v62, 5  ;;  %v6979_v56 = vld [vmem:[%s6585_s30 + $0xac] sm:$0xf] }
  0x73   : > { %v603_v58 = vsel %vm6611_vm4, %v598_v33, %v602_v45  ;;  %v620_v7 = vrot.slane %v618_v40, 4  ;;  %v626_v41 = vrot.slane %v624_v63, 5  ;;  %v5373_v17 = vrot.slane %v5357_v26, 9  ;;  %v6974_v33 = vld [vmem:[%s6585_s30 + $0xa8] sm:$0xf] }
  0x74   : > { %v5105_v6 = vcombine.low %v593_v55, %v603_v58  ;;  %5964 = vmatmul.mubr.msk.bf16.gmra.mrb[4].mxu0 %vm750_vm3, %v5389_v54  ;;  %v611_v14 = vor.u32 %v610_v61, %v607_v57  ;;  %v2892_v18 = vrot.slane %v6715_v20, 5  ;;  %v2895_v21 = vrot.slane %v6720_v34, 5  ;;  %v311_v61 = vld [vmem:[%s6585_s30 + $0xb0] sm:$0x1] }
  0x75   : > { %v629_v25 = vshrl.u32 %v6942_v52, 16  ;;  %v621_v31 = vor.u32 %v620_v7, %v616_v2  ;;  %v632_v38 = vshll.u32 %v6942_v52, 16  ;;  %v638_v1 = vshll.u32 %v6953_v46, 16 }
  0x76   : > { %5810 = vmatmul.mubr.msk.bf16.gmra.mrb[20].mxu1 %vm750_vm3, %v5105_v6  ;;  %v642_v28 = vshrl.u32 %v6953_v46, 16  ;;  %v612_v60 = vrot.slane %v611_v14, 4  ;;  %v2893_v42 = vsel %vm6837_vm7, %v5373_v17, %v2892_v18  ;;  %v2894_v20 = vrot.slane %v2892_v18, 4  ;;  %v6994_v14 = vld [vmem:[%s6585_s30 + $0xb4] sm:$0xf] }
  0x77   : > { %v631_v44 = vrot.slane %v629_v25, 4  ;;  %v622_v34 = vrot.slane %v621_v31, 4  ;;  %v634_v45 = vrot.slane %v632_v38, 5  ;;  %v640_v47 = vrot.slane %v638_v1, 5 }
  0x78   : > { %v644_v26 = vrot.slane %v642_v28, 4  ;;  %v617_v48 = vsel %vm6611_vm4, %v612_v60, %v616_v2  ;;  %v2896_v49 = vsel %vm6837_vm7, %v2894_v20, %v2895_v21  ;;  %v648_v50 = vshll.u32 %v310_v10, 16  ;;  %v5359_v2 = vld [vmem:[%s6585_s30 + $0x54] sm:$0xe] }
  0x79   : > { %v5374_v51 = vrot.slane %v5358_v11, 9  ;;  %v627_v15 = vsel %vm6611_vm4, %v622_v34, %v626_v41  ;;  %v5390_v62 = vcombine.low %v2893_v42, %v2896_v49  ;;  %v635_v40 = vor.u32 %v634_v45, %v631_v44  ;;  %v7003_v42 = vld [vmem:[%s6585_s30 + $0xb8] sm:$0xf]  ;;  %v312_v49 = vld [vmem:[%s6585_s30 + $0xbc] sm:$0x1] }
  0x7a   : > { %v645_v55 = vor.u32 %v644_v26, %v640_v47  ;;  %v5106_v57 = vcombine.low %v617_v48, %v627_v15  ;;  %v650_v63 = vrot.slane %v648_v50, 5  ;;  %v2899_v58 = vrot.slane %v6738_v8, 5 }
  0x7b   : > { %v2902_v54 = vrot.slane %v6746_v23, 5  ;;  %5967 = vmatprep.mubr.msk.bf16.mxu0 %vm750_vm3, %v5390_v62  ;;  %v636_v6 = vrot.slane %v635_v40, 4  ;;  %v653_v41 = vshrl.u32 %v6974_v33, 16  ;;  %v656_v17 = vshll.u32 %v6974_v33, 16 }
  0x7c   : > { %v646_v7 = vrot.slane %v645_v55, 4  ;;  %5813 = vmatprep.mubr.msk.bf16.mxu1 %vm750_vm3, %v5106_v57  ;;  %v2900_v10 = vsel %vm6837_vm7, %v5374_v51, %v2899_v58  ;;  %v2901_v11 = vrot.slane %v2899_v58, 4  ;;  %v662_v8 = vshll.u32 %v6979_v56, 16  ;;  %v5360_v55 = vld [vmem:[%s6585_s30 + $0x60] sm:$0xe] }
  0x7d   : > { %v666_v23 = vshrl.u32 %v6979_v56, 16  ;;  %v641_v18 = vsel %vm6611_vm4, %v636_v6, %v640_v47  ;;  %v655_v25 = vrot.slane %v653_v41, 4  ;;  %v658_v31 = vrot.slane %v656_v17, 5  ;;  %v5361_v6 = vld [vmem:[%s6585_s30 + $0x6c] sm:$0xe] }
  0x7e   : > { %v651_v21 = vsel %vm6611_vm4, %v646_v7, %v650_v63  ;;  %v2903_v1 = vsel %vm6837_vm7, %v2901_v11, %v2902_v54  ;;  %v664_v28 = vrot.slane %v662_v8, 5  ;;  %v672_v34 = vshll.u32 %v311_v61, 16  ;;  %v5297_v11 = vld [vmem:[%s6585_s30 + $0x70] sm:$0xf]  ;;  %v5298_v8 = vld [vmem:[%s6585_s30 + $0x74] sm:$0x1] }
  0x7f   : > { %v5107_v38 = vcombine.low %v641_v18, %v651_v21  ;;  %v668_v60 = vrot.slane %v666_v23, 4  ;;  %v5391_v20 = vcombine.low %v2900_v10, %v2903_v1  ;;  %v659_v44 = vor.u32 %v658_v31, %v655_v25 }
  0x80   : > { %v5375_v45 = vrot.slane %v5359_v2, 9  ;;  %v2906_v26 = vrot.slane %v6769_v4, 5  ;;  %v2909_v48 = vrot.slane %v6775_v12, 5  ;;  %v677_v50 = vshrl.u32 %v6994_v14, 16 }
  0x81   : > { %5814 = vmatmul.mubr.msk.bf16.gmra.mrb[24].mxu1 %vm750_vm3, %v5107_v38  ;;  %v669_v47 = vor.u32 %v668_v60, %v664_v28  ;;  %5968 = vmatmul.mubr.msk.bf16.gmra.mrb[8].mxu0 %vm750_vm3, %v5391_v20  ;;  %v660_v51 = vrot.slane %v659_v44, 4  ;;  %v674_v15 = vrot.slane %v672_v34, 5  ;;  %v680_v62 = vshll.u32 %v6994_v14, 16 }
  0x82   : > { %v686_v40 = vshll.u32 %v7003_v42, 16  ;;  %v2907_v4 = vsel %vm6837_vm7, %v5375_v45, %v2906_v26  ;;  %v2908_v12 = vrot.slane %v2906_v26, 4  ;;  %v679_v63 = vrot.slane %v677_v50, 4 }
  0x83   : > { %v670_v57 = vrot.slane %v669_v47, 4  ;;  %v665_v58 = vsel %vm6611_vm4, %v660_v51, %v664_v28  ;;  %v682_v54 = vrot.slane %v680_v62, 5  ;;  %v690_v2 = vshrl.u32 %v7003_v42, 16  ;;  %v5362_v47 = vld [vmem:[%s6585_s30 + $0x78] sm:$0xe] }
  0x84   : > { %v688_v61 = vrot.slane %v686_v40, 5  ;;  %v2910_v41 = vsel %vm6837_vm7, %v2908_v12, %v2909_v48  ;;  %v696_v17 = vshll.u32 %v312_v49, 16  ;;  %v5376_v10 = vrot.slane %v5360_v55, 9  ;;  %v6434_v51 = vld [vmem:[%s6585_s30] sm:$0xf] }
  0x85   : > { %v675_v7 = vsel %vm6611_vm4, %v670_v57, %v674_v15  ;;  %v5392_v18 = vcombine.low %v2907_v4, %v2910_v41  ;;  %v683_v21 = vor.u32 %v682_v54, %v679_v63  ;;  %v692_v25 = vrot.slane %v690_v2, 4  ;;  %v7041_v15 = vld [vmem:[%s6585_s30 + $0x4] sm:$0xf]  ;;  %v7045_v40 = vld [vmem:[%s6585_s30 + $0x7c] sm:$0xf] }
  0x86   : > { %v5108_v23 = vcombine.low %v665_v58, %v675_v7  ;;  %v698_v31 = vrot.slane %v696_v17, 5  ;;  %v2913_v38 = vrot.slane %v6799_v59, 5  ;;  %v2916_v1 = vrot.slane %v6806_v9, 5  ;;  %v7048_v55 = vld [vmem:[%s6585_s30 + $0x80] sm:$0x1] }
  0x87   : > { %v5377_v28 = vrot.slane %v5361_v6, 9  ;;  %5971 = vmatprep.mubr.msk.bf16.mxu0 %vm750_vm3, %v5392_v18  ;;  %v684_v60 = vrot.slane %v683_v21, 4  ;;  %v693_v20 = vor.u32 %v692_v25, %v688_v61  ;;  %v2920_v44 = vrot.slane %v5297_v11, 5  ;;  %v5303_v57 = vld [vmem:[%s6585_s30 + $0x88] sm:$0xf] }
  0x88   : > { %5817 = vmatprep.mubr.msk.bf16.mxu1 %vm750_vm3, %v5108_v23  ;;  %v2923_v34 = vrot.slane %v5298_v8, 5  ;;  %v2914_v45 = vsel %vm6837_vm7, %v5376_v10, %v2913_v38  ;;  %v2915_v59 = vrot.slane %v2913_v38, 4  ;;  %v5126_v62 = vcombine.low %v6434_v51, %v7041_v15  ;;  %v5304_v54 = vld [vmem:[%s6585_s30 + $0x8c] sm:$0x1]  ;;  %v5306_v17 = vld [vmem:[%s6585_s30 + $0x94] sm:$0xf] }
  0x89   : > { %v689_v9 = vsel %vm6611_vm4, %v684_v60, %v688_v61  ;;  %v694_v26 = vrot.slane %v693_v20, 4  ;;  %v2921_v48 = vsel %vm6837_vm7, %v5377_v28, %v2920_v44  ;;  %v2922_v49 = vrot.slane %v2920_v44, 4  ;;  %v5363_v61 = vld [vmem:[%s6585_s30 + $0x84] sm:$0xe]  ;;  %v5364_v23 = vld [vmem:[%s6585_s30 + $0x90] sm:$0xe] }
  0x8a   : > { %v2917_v50 = vsel %vm6837_vm7, %v2915_v59, %v2916_v1  ;;  %v5378_v58 = vrot.slane %v5362_v47, 9  ;;  %v2927_v7 = vrot.slane %v7045_v40, 5  ;;  %v2930_v41 = vrot.slane %v7048_v55, 5  ;;  %v5307_v25 = vld [vmem:[%s6585_s30 + $0x98] sm:$0x1] }
  0x8b   : > { %v699_v4 = vsel %vm6611_vm4, %v694_v26, %v698_v31  ;;  %v5393_v12 = vcombine.low %v2914_v45, %v2917_v50  ;;  %v2924_v63 = vsel %vm6837_vm7, %v2922_v49, %v2923_v34  ;;  %v5379_v10 = vrot.slane %v5363_v61, 9  ;;  %v5309_v31 = vld [vmem:[%s6585_s30 + $0xa0] sm:$0xf]  ;;  %v5310_v60 = vld [vmem:[%s6585_s30 + $0xa4] sm:$0x1] }
  0x8c   : > { %v5109_v2 = vcombine.low %v689_v9, %v699_v4  ;;  %v5394_v6 = vcombine.low %v2921_v48, %v2924_v63  ;;  %v2934_v11 = vrot.slane %v5303_v57, 5  ;;  %v2937_v8 = vrot.slane %v5304_v54, 5  ;;  %v5365_v20 = vld [vmem:[%s6585_s30 + $0x9c] sm:$0xe]  ;;  %v6436_v44 = vld [vmem:[%s6585_s30 + $0xc] sm:$0xf] }
  0x8d   : > { %5972 = vmatmul.mubr.msk.bf16.gmra.mrb[12].mxu0 %vm750_vm3, %v5393_v12  ;;  %v2928_v18 = vsel %vm6837_vm7, %v5378_v58, %v2927_v7  ;;  %v2929_v21 = vrot.slane %v2927_v7, 4  ;;  %v2941_v28 = vrot.slane %v5306_v17, 5  ;;  %v7075_v34 = vld [vmem:[%s6585_s30 + $0x10] sm:$0xf]  ;;  %v6438_v47 = vld [vmem:[%s6585_s30 + $0x18] sm:$0xf] }
  0x8e   : > { %5818 = vmatmul.mubr.msk.bf16.gmra.mrb[28].mxu1 %vm750_vm3, %v5109_v2  ;;  %5975 = vmatprep.mubr.msk.bf16.mxu0 %vm750_vm3, %v5394_v6  ;;  %v2935_v38 = vsel %vm6837_vm7, %v5379_v10, %v2934_v11  ;;  %v2936_v1 = vrot.slane %v2934_v11, 4  ;;  %v5127_v45 = vcombine.low %v6436_v44, %v7075_v34  ;;  %v7082_v9 = vld [vmem:[%s6585_s30 + $0x1c] sm:$0xf]  ;;  %v5380_v48 = vrot.slane %v5364_v23, 9  ;;  %v5312_v57 = vld [vmem:[%s6585_s30 + $0xac] sm:$0xf] }
  0x8f   : > { %5823 = vmatprep.mubr.msk.bf16.mxu1 %vm750_vm3, %v5126_v62  ;;  %v2931_v59 = vsel %vm6837_vm7, %v2929_v21, %v2930_v41  ;;  %v5128_v26 = vcombine.low %v6438_v47, %v7082_v9  ;;  %v2943_v51 = vrot.slane %v2941_v28, 4  ;;  %v2944_v62 = vrot.slane %v5307_v25, 5  ;;  %v6440_v54 = vld [vmem:[%s8401_s1 + $0x4] sm:$0x3]  ;;  %v5315_v2 = vld [vmem:[%s6585_s30 + $0xb8] sm:$0xf] }
  0x90   : > { %v5395_v49 = vcombine.low %v2928_v18, %v2931_v59  ;;  %v2938_v50 = vsel %vm6837_vm7, %v2936_v1, %v2937_v8  ;;  %v5381_v12 = vrot.slane %v5365_v20, 9  ;;  %v2948_v63 = vrot.slane %v5309_v31, 5  ;;  %v7097_v7 = vld [vmem:[%s8401_s1 + $0x6] sm:$0x3]  ;;  %v5313_v10 = vld [vmem:[%s6585_s30 + $0xb0] sm:$0x1] }
  0x91   : > { %v5396_v4 = vcombine.low %v2935_v38, %v2938_v50  ;;  %v2951_v58 = vrot.slane %v5310_v60, 5  ;;  %v1518_v61 = vsel %vm799_vm0, %v6440_v54, 0  ;;  %v2942_v41 = vsel %vm6837_vm7, %v5380_v48, %v2941_v28  ;;  %v5366_v11 = vld [vmem:[%s6585_s30 + $0xa8] sm:$0xe]  ;;  %v5316_v25 = vld [vmem:[%s6585_s30 + $0xbc] sm:$0x1] }
  0x92   : > { %v2950_v6 = vrot.slane %v2948_v63, 4  ;;  %v2945_v17 = vsel %vm6837_vm7, %v2943_v51, %v2944_v62  ;;  %v2955_v8 = vrot.slane %v5312_v57, 5  ;;  %v2949_v23 = vsel %vm6837_vm7, %v5381_v12, %v2948_v63  ;;  %v5367_v31 = vld [vmem:[%s6585_s30 + $0xb4] sm:$0xe]  ;;  %v6441_v38 = vld [vmem:[%s6585_s30 + $0x24] sm:$0xf] }
  0x93   : > { %v2962_v21 = vrot.slane %v5315_v2, 5  ;;  %v7118_v1 = vld [vmem:[%s6585_s30 + $0x28] sm:$0xf]  ;;  %v5397_v60 = vcombine.low %v2942_v41, %v2945_v17  ;;  %v5382_v44 = vrot.slane %v5366_v11, 9  ;;  %v2958_v59 = vrot.slane %v5313_v10, 5 }
  0x94   : > { %v2952_v18 = vsel %vm6837_vm7, %v2950_v6, %v2951_v58  ;;  %v5129_v28 = vcombine.low %v6441_v38, %v7118_v1  ;;  %v6443_v47 = vld [vmem:[%s6585_s30 + $0x30] sm:$0xf]  ;;  %v2965_v51 = vrot.slane %v5316_v25, 5  ;;  %v5318_v62 = vld [vmem:[%s6585_s30 + $0xc4] sm:$0xf]  ;;  %v2350_v25 = vshrl.u32 %v7045_v40, 16 }
  0x95   : > { %5976 = vmatmul.mubr.msk.bf16.gmra.mrb[16].mxu0 %vm750_vm3, %v5395_v49  ;;  %v5398_v20 = vcombine.low %v2949_v23, %v2952_v18  ;;  %v5383_v49 = vrot.slane %v5367_v31, 9  ;;  %v2964_v50 = vrot.slane %v2962_v21, 4  ;;  %v2956_v57 = vsel %vm6837_vm7, %v5382_v44, %v2955_v8  ;;  %v5368_v12 = vld [vmem:[%s6585_s30 + $0xc0] sm:$0xe]  ;;  %v6445_v41 = vld [vmem:[%s6585_s30 + $0x3c] sm:$0xf] }
  0x96   : > { %5824 = vmatmul.mubr.msk.bf16.vlgmr.msra.gmra.mrb[0].mxu1 %vm750_vm3, %v5127_v45  ;;  %5979 = vmatprep.mubr.msk.bf16.mxu0 %vm750_vm3, %v5396_v4  ;;  %v2957_v45 = vrot.slane %v2955_v8, 4  ;;  %v2969_v63 = vrot.slane %v5318_v62, 5  ;;  %v5384_v6 = vrot.slane %v5368_v12, 9  ;;  %v7143_v17 = vld [vmem:[%s6585_s30 + $0x40] sm:$0xf]  ;;  %v5132_v18 = vcombine.low %v6750_v27, %v6753_v36  ;;  %v6397_v62 = vld [vmem:[%s6585_s30 + $0x24] sm:$0xff]  }
  0x97   : > { %5856 = vmatpush3.bf16.msra.mxu1 %v1518_v61  ;;  %5827 = vmatprep.mubr.msk.bf16.mxu1 %vm750_vm3, %v5128_v26  ;;  %v7123_v26 = vld [vmem:[%s6585_s30 + $0x34] sm:$0xf]  ;;  %v2963_v58 = vsel %vm6837_vm7, %v5383_v49, %v2962_v21  ;;  %v2966_v54 = vsel %vm6837_vm7, %v2964_v50, %v2965_v51  ;;  %v5319_v61 = vld [vmem:[%s6585_s30 + $0xc8] sm:$0x1]  ;;  %v5131_v10 = vcombine.low %v6445_v41, %v7143_v17  ;;  %v2346_v21 = vshll.u32 %v7045_v40, 16 }
  0x98   : > { %6354 = vmatprep.subr.msk.bf16.mxu1 %vm799_vm0, %v7097_v7  ;;  %v5130_v48 = vcombine.low %v6443_v47, %v7123_v26  ;;  %v2959_v4 = vsel %vm6837_vm7, %v2957_v45, %v2958_v59  ;;  %v5400_v11 = vcombine.low %v2963_v58, %v2966_v54  ;;  %v2971_v8 = vrot.slane %v2969_v63, 4  ;;  %v1256_v45 = vld [vmem:[%s6585_s30] sm:$0xe]  ;;  %v1257_v59 = vld [vmem:[%s6585_s30 + $0xc] sm:$0xe] }
  0x99   : > { %v5399_v2 = vcombine.low %v2956_v57, %v2959_v4  ;;  %v2972_v23 = vrot.slane %v5319_v61, 5  ;;  %v2970_v31 = vsel %vm6837_vm7, %v5384_v6, %v2969_v63  ;;  %v7158_v27 = vrot.slane %v2346_v21, 5  ;;  %v1260_v41 = vld [vmem:[%s6585_s30 + $0x30] sm:$0xe] }
  0x9a   : > { %v2352_v36 = vrot.slane %v2350_v25, 4  ;;  %v5134_v44 = vcombine.low %v6810_v19, %v6816_v35  ;;  %v2356_v47 = vshll.u32 %v7048_v55, 16  ;;  %v5158_v19 = vrot.slane %v1256_v45, 9 }
  0x9b   : > { %v2973_v38 = vsel %vm6837_vm7, %v2971_v8, %v2972_v23  ;;  %8423 = vst [vmem:[#allocation3_spill] sm:$0xff] %v7158_v27  ;;  %v5159_v35 = vrot.slane %v1257_v59, 9  ;;  %v1323_v4 = vrot.slane %v7082_v9, 5  ;;  %v1330_v12 = vrot.slane %v7118_v1, 5  ;;  %v1261_v8 = vld [vmem:[%s6585_s30 + $0x3c] sm:$0xe] }
  0x9c   : > { %v5401_v40 = vcombine.low %v2970_v31, %v2973_v38  ;;  %v2353_v49 = vor.u32 %v2352_v36, %v7158_v27  ;;  %v7178_v51 = vrot.slane %v2356_v47, 5  ;;  %v5135_v58 = vcombine.low %v6831_v0, %v6844_v29  ;;  %v1262_v31 = vld [vmem:[%s6585_s30 + $0x48] sm:$0xe]  ;;  %v6451_v59 = vld [vmem:[%s6585_s30 + $0x38] sm:$0x1] }
  0x9d   : > { %5980 = vmatmul.mubr.msk.bf16.gmra.mrb[20].mxu0 %vm750_vm3, %v5397_v60  ;;  %v5133_v60 = vcombine.low %v6779_v24, %v6785_v37  ;;  %v6448_v24 = vld [vmem:[%s6585_s30 + $0x14] sm:$0x1]  ;;  %v4158_v54 = vsel %vm799_vm0, %v6902_v22, 0  ;;  %v5136_v61 = vcombine.low %v6863_v53, %v6870_v16  ;;  %v5137_v6 = vcombine.low %v6889_v39, %v6897_v43  ;;  %v6449_v16 = vld [vmem:[%s6585_s30 + $0x20] sm:$0x1] }
  0x9e   : > { %5828 = vmatmul.mubr.msk.bf16.gmra.mrb[4].mxu1 %vm750_vm3, %v5129_v28  ;;  %5983 = vmatprep.mubr.msk.bf16.mxu0 %vm750_vm3, %v5398_v20  ;;  %v1316_v28 = vrot.slane %v7075_v34, 5  ;;  %v6395_v20 = vld [vmem:[%s6585_s30 + $0x18] sm:$0xff]   ;;  %v6447_v34 = vld [vmem:[%s6585_s30 + $0x8] sm:$0x1]  ;;  %v1319_v37 = vrot.slane %v6448_v24, 5  ;;  %8424 = vst [vmem:[#allocation4_spill] sm:$0xff] %v7178_v51  ;;  %v5138_v9 = vcombine.low %v6921_v5, %v6933_v30 }
  0x9f   : > { %5831 = vmatprep.mubr.msk.bf16.mxu1 %vm750_vm3, %v5130_v48  ;;  %v1309_v48 = vrot.slane %v7041_v15, 5  ;;  %v1312_v50 = vrot.slane %v6447_v34, 5  ;;  %v1258_v15 = vld [vmem:[%s6585_s30 + $0x18] sm:$0xe]  ;;  %v7183_v63 = vrot.slane %v2353_v49, 4  ;;  %v1326_v22 = vrot.slane %v6449_v16, 5 }
  0xa0   : > { %v1318_v55 = vrot.slane %v1316_v28, 4  ;;  %v5160_v1 = vrot.slane %v1258_v15, 9  ;;  %v7205_v29 = vsel %vm6837_vm7, %v5159_v35, %v1316_v28  ;;  %v1332_v25 = vrot.slane %v1330_v12, 4  ;;  %v5483_v24 = vld [vmem:[%s6585_s30 + $0x18] sm:$0xf] }
  0xa1   : > { %v1311_v57 = vrot.slane %v1309_v48, 4  ;;  %8425 = vst [vmem:[#allocation5_spill] sm:$0xff] %v7183_v63  ;;  %v7201_v0 = vsel %vm6837_vm7, %v5158_v19, %v1309_v48  ;;  %v1340_v47 = vrot.slane %v6451_v59, 5  ;;  %v7242_v49 = vsel %vm799_vm0, %v7097_v7, 0  ;;  %v5484_v7 = vld [vmem:[%s6585_s30 + $0x1c] sm:$0xf] }
  0xa2   : > { %v7209_v53 = vsel %vm6837_vm7, %v1318_v55, %v1319_v37  ;;  %v7246_v34 = vsel %vm6837_vm7, %v5160_v1, %v1323_v4  ;;  %v6401_v37 = vld [vmem:[%s6585_s30 + $0x3c] sm:$0xff]   ;;  %v5163_v35 = vrot.slane %v1261_v8, 9  ;;  %v6452_v55 = vld [vmem:[%s6585_s30 + $0x44] sm:$0x1]  ;;  %v3679_v8 = vshll.u32 %v5483_v24, 16 }
  0xa3   : > { %v7220_v23 = vsel %vm6837_vm7, %v1311_v57, %v1312_v50  ;;  %v1263_v50 = vld [vmem:[%s6585_s30 + $0x54] sm:$0xe]  ;;  %v1347_v15 = vrot.slane %v6452_v55, 5  ;;  %v5487_v39 = vld [vmem:[%s6585_s30 + $0x28] sm:$0xf] }
  0xa4   : > { %v6459_v5 = vld [vmem:[%s6585_s30 + $0x70] sm:$0xf] }
  0xa5   : > { %5984 = vmatmul.mubr.msk.bf16.gmra.mrb[24].mxu0 %vm750_vm3, %v5399_v2  ;;  %v1259_v2 = vld [vmem:[%s6585_s30 + $0x24] sm:$0xe]  ;;  %v1372_v30 = vrot.slane %v6459_v5, 5 }
  0xa6   : > { %5832 = vmatmul.mubr.msk.bf16.gmra.mrb[8].mxu1 %vm750_vm3, %v5131_v10  ;;  %5987 = vmatprep.mubr.msk.bf16.mxu0 %vm750_vm3, %v5400_v11  ;;  %v1337_v10 = vrot.slane %v7123_v26, 5  ;;  %v6399_v11 = vld [vmem:[%s6585_s30 + $0x30] sm:$0xff]   ;;  %v5161_v21 = vrot.slane %v1259_v2, 9 }
  0xa7   : > { %5835 = vmatprep.mubr.msk.bf16.mxu1 %vm750_vm3, %v5132_v18  ;;  %v7216_v26 = vld [vmem:[%s8401_s1 + $0x10] sm:$0x3]  ;;  %v1325_v18 = vrot.slane %v1323_v4, 4  ;;  %v1374_v48 = vrot.slane %v1372_v30, 4 }
  0xa8   : > { %v1339_v45 = vrot.slane %v1337_v10, 4  ;;  %v7253_v19 = vsel %vm6837_vm7, %v5161_v21, %v1330_v12  ;;  %v3689_v21 = vshrl.u32 %v5484_v7, 16 }
  0xa9   : > { %v7262_v4 = vsel %vm6837_vm7, %v1325_v18, %v1326_v22  ;;  %v3676_v22 = vshrl.u32 %v5483_v24, 16  ;;  %v3685_v18 = vshll.u32 %v5484_v7, 16  ;;  %v5486_v24 = vld [vmem:[%s6585_s30 + $0x24] sm:$0xf] }
  0xaa   : > { %v7275_v1 = vsel %vm6837_vm7, %v1339_v45, %v1340_v47 }
  0xab   : > { %v3678_v43 = vrot.slane %v3676_v22, 4  ;;  %v7317_v7 = vrot.slane %v3685_v18, 5  ;;  %v3703_v22 = vshll.u32 %v5486_v24, 16  ;;  %v3713_v18 = vshrl.u32 %v5487_v39, 16 }
  0xad   : > { %5988 = vmatmul.mubr.msk.bf16.gmra.mrb[28].mxu0 %vm750_vm3, %v5401_v40  ;;  %v6450_v40 = vld [vmem:[%s6585_s30 + $0x2c] sm:$0x1]  ;;  %v3705_v27 = vrot.slane %v3703_v22, 5 }
  0xae   : > { %5836 = vmatmul.mubr.msk.bf16.gmra.mrb[12].mxu1 %vm750_vm3, %v5133_v60  ;;  %5993 = vmatprep.mubr.msk.bf16.mxu0 %vm750_vm3, %v6395_v20  ;;  %v1333_v28 = vrot.slane %v6450_v40, 5  ;;  %v1344_v60 = vrot.slane %v7143_v17, 5  ;;  %v6455_v40 = vld [vmem:[%s6585_s30 + $0x50] sm:$0x1]  ;;  %v6460_v17 = vld [vmem:[%s6585_s30 + $0x74] sm:$0x1] }
  0xaf   : > { %5839 = vmatprep.mubr.msk.bf16.mxu1 %vm750_vm3, %v5134_v44  ;;  %v5162_v44 = vrot.slane %v1260_v41, 9  ;;  %v5165_v41 = vrot.slane %v1263_v50, 9  ;;  %v1264_v50 = vld [vmem:[%s6585_s30 + $0x60] sm:$0xe]  ;;  %v5488_v20 = vld [vmem:[%s6585_s30 + $0x2c] sm:$0x1] }
  0xb0   : > { %v1346_v12 = vrot.slane %v1344_v60, 4  ;;  %v7288_v45 = vsel %vm6837_vm7, %v5163_v35, %v1344_v60  ;;  %v6456_v35 = vld [vmem:[%s6585_s30 + $0x5c] sm:$0x1] }
  0xb1   : > { %v7271_v2 = vsel %vm6837_vm7, %v5162_v44, %v1337_v10  ;;  %v1361_v55 = vrot.slane %v6456_v35, 5  ;;  %v1265_v35 = vld [vmem:[%s6585_s30 + $0x6c] sm:$0xe] }
  0xb2   : > { %v7292_v59 = vsel %vm6837_vm7, %v1346_v12, %v1347_v15  ;;  %v6457_v15 = vld [vmem:[%s6585_s30 + $0x64] sm:$0xf]  ;;  %v3691_v12 = vrot.slane %v3689_v21, 4  ;;  %v5167_v5 = vrot.slane %v1265_v35, 9 }
  0xb3   : > { %v6407_v21 = vld [vmem:[%s6585_s30 + $0x60] sm:$0xff]  }
  0xb5   : > { %5994 = vmatmul.mubr.msk.bf16.vlgmr.msra.gmra.mrb[0].mxu0 %vm750_vm3, %v6397_v62  ;;  %v6453_v62 = vld [vmem:[%s6585_s30 + $0x4c] sm:$0xf] }
  0xb6   : > { %5840 = vmatmul.mubr.msk.bf16.gmra.mrb[16].mxu1 %vm750_vm3, %v5135_v58  ;;  %6026 = vmatpush3.bf16.msra.mxu0 %v4158_v54  ;;  %v1351_v57 = vrot.slane %v6453_v62, 5  ;;  %v7266_v58 = vsel %vm6837_vm7, %v1332_v25, %v1333_v28  ;;  %v5164_v54 = vrot.slane %v1262_v31, 9  ;;  %v1354_v28 = vrot.slane %v6455_v40, 5 }
  0xb7   : > { %5843 = vmatprep.mubr.msk.bf16.mxu1 %vm750_vm3, %v5136_v61  ;;  %5997 = vmatprep.mubr.msk.bf16.mxu0 %vm750_vm3, %v6399_v11  ;;  %v6403_v61 = vld [vmem:[%s6585_s30 + $0x48] sm:$0xff]   ;;  %v6454_v11 = vld [vmem:[%s6585_s30 + $0x58] sm:$0xf]  ;;  %v1365_v62 = vrot.slane %v6457_v15, 5  ;;  %v5490_v15 = vld [vmem:[%s6585_s30 + $0x34] sm:$0xf] }
  0xb8   : > { %6360 = vmatprep.subr.msk.bf16.mxu0 %vm799_vm0, %v7216_v26  ;;  %v1358_v16 = vrot.slane %v6454_v11, 5  ;;  %v1353_v31 = vrot.slane %v1351_v57, 4  ;;  %v7296_v47 = vsel %vm6837_vm7, %v5164_v54, %v1351_v57  ;;  %v5485_v57 = vld [vmem:[%s6585_s30 + $0x20] sm:$0x1]  ;;  %v5489_v54 = vld [vmem:[%s6585_s30 + $0x30] sm:$0xf] }
  0xb9   : > { %v5166_v11 = vrot.slane %v1264_v50, 9  ;;  %v3727_v50 = vshll.u32 %v5489_v54, 16  ;;  %v3695_v25 = vshll.u32 %v5485_v57, 16  ;;  %v3733_v36 = vshll.u32 %v5490_v15, 16 }
  0xba   : > { %v7307_v60 = vsel %vm6837_vm7, %v5165_v41, %v1358_v16  ;;  %v7323_v41 = vsel %vm6837_vm7, %v1353_v31, %v1354_v28  ;;  %v1367_v31 = vrot.slane %v1365_v62, 4  ;;  %v3724_v28 = vshrl.u32 %v5489_v54, 16 }
  0xbb   : > { %v7365_v35 = vrot.slane %v3733_v36, 5 }
  0xbd   : > { %5998 = vmatmul.mubr.msk.bf16.gmra.mrb[4].mxu0 %vm750_vm3, %v6401_v37  ;;  %v1360_v37 = vrot.slane %v1358_v16, 4  ;;  %v6458_v16 = vld [vmem:[%s6585_s30 + $0x68] sm:$0x1] }
  0xbe   : > { %5844 = vmatmul.mubr.msk.bf16.gmra.mrb[20].mxu1 %vm750_vm3, %v5137_v6  ;;  %6001 = vmatprep.mubr.msk.bf16.mxu0 %vm750_vm3, %v6403_v61  ;;  %v3681_v6 = vrot.slane %v3679_v8, 5  ;;  %v6405_v61 = vld [vmem:[%s6585_s30 + $0x54] sm:$0xff]   ;;  %v1368_v40 = vrot.slane %v6458_v16, 5  ;;  %v3709_v8 = vshll.u32 %v5487_v39, 16  ;;  %v3692_v16 = vor.u32 %v3691_v12, %v7317_v7 }
  0xbf   : > { %5847 = vmatprep.mubr.msk.bf16.mxu1 %vm750_vm3, %v5138_v9  ;;  %v3700_v9 = vshrl.u32 %v5486_v24, 16  ;;  %v7332_v44 = vsel %vm6837_vm7, %v1360_v37, %v1361_v55  ;;  %v1375_v24 = vrot.slane %v6460_v17, 5  ;;  %v3737_v39 = vshrl.u32 %v5490_v15, 16 }
  0xc0   : > { %v3682_v10 = vor.u32 %v3681_v6, %v3678_v43  ;;  %v7338_v37 = vrot.slane %v3709_v8, 5  ;;  %v3715_v55 = vrot.slane %v3713_v18, 4  ;;  %v8426_v43 = vcombine.low %v6942_v52, %v6953_v46  ;;  %v6461_v8 = vld [vmem:[%s6585_s30 + $0x7c] sm:$0xf]  ;;  %v7374_v18 = vld [vmem:[%s6585_s30 + $0x38] sm:$0x1] }
  0xc1   : > { %v3702_v38 = vrot.slane %v3700_v9, 4  ;;  %v7347_v17 = vsel %vm6837_vm7, %v5166_v11, %v1365_v62  ;;  %v7351_v57 = vsel %vm6837_vm7, %v1367_v31, %v1368_v40  ;;  %v3726_v6 = vrot.slane %v3724_v28, 4  ;;  %8428 = vst [vmem:[#allocation6_spill] sm:$0xff] %v7374_v18 }
  0xc2   : > { %v3729_v12 = vrot.slane %v3727_v50, 5  ;;  %v8427_v52 = vcombine.low %v6974_v33, %v6979_v56  ;;  %v3683_v46 = vrot.slane %v3682_v10, 4  ;;  %v3693_v54 = vrot.slane %v3692_v16, 4  ;;  %v6409_v33 = vld [vmem:[%s6585_s30 + $0x6c] sm:$0xff]   ;;  %v1267_v16 = vld [vmem:[%s6585_s30 + $0x84] sm:$0xe] }
  0xc3   : > { %v3719_v62 = vshll.u32 %v5488_v20, 16  ;;  %v7359_v11 = vsel %vm6837_vm7, %v5167_v5, %v1372_v30  ;;  %v7363_v40 = vsel %vm6837_vm7, %v1374_v48, %v1375_v24  ;;  %v3739_v9 = vrot.slane %v3737_v39, 4  ;;  %v6410_v48 = vld [vmem:[%s6585_s30 + $0x78] sm:$0xff]  }
  0xc4   : > { %v3706_v10 = vor.u32 %v3705_v27, %v3702_v38  ;;  %v3716_v20 = vor.u32 %v3715_v55, %v7338_v37  ;;  %v1379_v30 = vrot.slane %v6461_v8, 5  ;;  %v3730_v38 = vor.u32 %v3729_v12, %v3726_v6  ;;  %v5492_v5 = vld [vmem:[%s6585_s30 + $0x3c] sm:$0xf] }
  0xc5   : > { %6002 = vmatmul.mubr.msk.bf16.gmra.mrb[8].mxu0 %vm750_vm3, %v6405_v61  ;;  %v3697_v61 = vrot.slane %v3695_v25, 5  ;;  %v1266_v25 = vld [vmem:[%s6585_s30 + $0x78] sm:$0xe]  ;;  %v7390_v50 = vrot.slane %v3719_v62, 5  ;;  %v3740_v39 = vor.u32 %v3739_v9, %v7365_v35  ;;  %v3743_v55 = vshll.u32 %v7374_v18, 16 }
  0xc6   : > { %5848 = vmatmul.mubr.msk.bf16.gmra.mrb[24].mxu1 %vm750_vm3, %v8426_v43  ;;  %6005 = vmatprep.mubr.msk.bf16.mxu0 %vm750_vm3, %v6407_v21  ;;  %v3688_v21 = vsel %vm6611_vm4, %v3683_v46, %v7317_v7  ;;  %v5168_v24 = vrot.slane %v1266_v25, 9  ;;  %v6462_v43 = vld [vmem:[%s6585_s30 + $0x88] sm:$0xf]  ;;  %v7398_v7 = vld [vmem:[%s6585_s30 + $0x40] sm:$0xf]  ;;  %v3707_v12 = vrot.slane %v3706_v10, 4  ;;  %v8430_v62 = vcombine.low %v6994_v14, %v7003_v42 }
  0xc7   : > { %5851 = vmatprep.mubr.msk.bf16.mxu1 %vm750_vm3, %v8427_v52  ;;  %v3698_v31 = vsel %vm6611_vm4, %v3693_v54, %v3697_v61  ;;  %v1386_v6 = vrot.slane %v6462_v43, 5  ;;  %8429 = vst [vmem:[#allocation7_spill] sm:$0xff] %v7398_v7  ;;  %v3717_v52 = vrot.slane %v3716_v20, 4  ;;  %v1381_v46 = vrot.slane %v1379_v30, 4  ;;  %v6463_v54 = vld [vmem:[%s6585_s30 + $0x80] sm:$0x1] }
  0xc8   : > { %v1382_v61 = vrot.slane %v6463_v54, 5  ;;  %v3731_v9 = vrot.slane %v3730_v38, 4  ;;  %v5169_v25 = vrot.slane %v1267_v16, 9  ;;  %v3748_v8 = vshrl.u32 %v5492_v5, 16  ;;  %v6411_v10 = vld [vmem:[%s6585_s30 + $0x84] sm:$0xff]  }
  0xc9   : > { %v3751_v43 = vshll.u32 %v5492_v5, 16  ;;  %v7412_v20 = vcombine.low %v3688_v21, %v3698_v31  ;;  %v7416_v14 = vsel %vm799_vm0, %v7216_v26, 0  ;;  %v3761_v38 = vshrl.u32 %v7398_v7, 16  ;;  %v6412_v21 = vld [vmem:[%s6585_s30 + $0x90] sm:$0xff]   ;;  %v6468_v18 = vld [vmem:[%s6585_s30 + $0xa0] sm:$0xf] }
  0xca   : > { %v3741_v16 = vrot.slane %v3740_v39, 4  ;;  %v3745_v5 = vrot.slane %v3743_v55, 5  ;;  %v1388_v54 = vrot.slane %v1386_v6, 4  ;;  %v3712_v31 = vsel %vm6611_vm4, %v3707_v12, %v7338_v37 }
  0xcb   : > { %v3722_v26 = vsel %vm6611_vm4, %v3717_v52, %v7390_v50  ;;  %v7431_v39 = vsel %vm6837_vm7, %v5168_v24, %v1379_v30  ;;  %v7435_v55 = vsel %vm6837_vm7, %v1381_v46, %v1382_v61  ;;  %v3736_v37 = vsel %vm6611_vm4, %v3731_v9, %v7365_v35  ;;  %v5498_v30 = vld [vmem:[%s6585_s30 + $0x54] sm:$0xf]  ;;  %v7452_v24 = vld [vmem:[%s6585_s30 + $0x58] sm:$0xf]  ;;  %v7457_v61 = vld [vmem:[%s6585_s30 + $0x90] sm:$0xe] }
  0xcc   : > { %v7448_v12 = vsel %vm6837_vm7, %v5169_v25, %v1386_v6  ;;  %v3750_v50 = vrot.slane %v3748_v8, 4  ;;  %v3753_v52 = vrot.slane %v3751_v43, 5  ;;  %v3763_v46 = vrot.slane %v3761_v38, 4 }
  0xcd   : > { %6006 = vmatmul.mubr.msk.bf16.gmra.mrb[12].mxu0 %vm750_vm3, %v6409_v33  ;;  %v8431_v33 = vcombine.low %v7201_v0, %v7220_v23  ;;  %v6464_v0 = vld [vmem:[%s6585_s30 + $0x8c] sm:$0x1]  ;;  %v3746_v36 = vsel %vm6611_vm4, %v3741_v16, %v3745_v5  ;;  %v3796_v25 = vshrl.u32 %v5498_v30, 16  ;;  %v3799_v8 = vshll.u32 %v5498_v30, 16 }
  0xce   : > { %5852 = vmatmul.mubr.msk.bf16.gmra.mrb[28].mxu1 %vm750_vm3, %v8430_v62  ;;  %6009 = vmatprep.mubr.msk.bf16.mxu0 %vm750_vm3, %v6410_v48  ;;  %v3757_v48 = vshll.u32 %v7398_v7, 16  ;;  %v1389_v23 = vrot.slane %v6464_v0, 5  ;;  %v5495_v62 = vld [vmem:[%s6585_s30 + $0x48] sm:$0xf]  ;;  %v7441_v0 = vld [vmem:[%s6585_s30 + $0x4c] sm:$0xf]  ;;  %v8433_v38 = vcombine.low %v7205_v29, %v7209_v53  ;;  %v7475_v16 = vcombine.low %v3712_v31, %v3722_v26 }
  0xcf   : > { %5857 = vmatprep.mubr.msk.bf16.mxu1 %vm750_vm3, %v8431_v33  ;;  %v7438_v33 = vld [vmem:[%s6585_s30 + $0x44] sm:$0x1]  ;;  %v3772_v27 = vshrl.u32 %v5495_v62, 16  ;;  %v3775_v15 = vshll.u32 %v5495_v62, 16  ;;  %v3781_v6 = vshll.u32 %v7441_v0, 16  ;;  %v3785_v9 = vshrl.u32 %v7441_v0, 16 }
  0xd0   : > { %8432 = vst [vmem:[#allocation8_spill] sm:$0xff] %v7438_v33  ;;  %v7454_v28 = vrot.slane %v3757_v48, 5  ;;  %v7463_v35 = vsel %vm6837_vm7, %v1388_v54, %v1389_v23  ;;  %v3805_v43 = vshll.u32 %v7452_v24, 16  ;;  %v3809_v48 = vshrl.u32 %v7452_v24, 16  ;;  %v5501_v31 = vld [vmem:[%s6585_s30 + $0x60] sm:$0xf] }
  0xd1   : > { %v3767_v5 = vshll.u32 %v7438_v33, 16  ;;  %v5170_v54 = vrot.slane %v7457_v61, 9  ;;  %v8434_v23 = vcombine.low %v7246_v34, %v7262_v4  ;;  %v7486_v29 = vcombine.low %v3736_v37, %v3746_v36  ;;  %v6413_v26 = vld [vmem:[%s6585_s30 + $0x9c] sm:$0xff]   ;;  %v6414_v30 = vld [vmem:[%s6585_s30 + $0xa8] sm:$0xff]  }
  0xd2   : > { %v3754_v53 = vor.u32 %v3753_v52, %v3750_v50  ;;  %v3774_v62 = vrot.slane %v3772_v27, 4  ;;  %v7497_v34 = vrot.slane %v3781_v6, 5  ;;  %v3787_v4 = vrot.slane %v3785_v9, 4  ;;  %v6465_v36 = vld [vmem:[%s8401_s1 + $0x8] sm:$0x3] }
  0xd3   : > { %v3798_v27 = vrot.slane %v3796_v25, 4  ;;  %v3801_v37 = vrot.slane %v3799_v8, 5  ;;  %v7506_v50 = vrot.slane %v3805_v43, 5  ;;  %v3811_v52 = vrot.slane %v3809_v48, 4  ;;  %v6466_v6 = vld [vmem:[%s6585_s30 + $0x94] sm:$0xf] }
  0xd4   : > { %v7512_v9 = vld [vmem:[%s6585_s30 + $0x64] sm:$0xf]  ;;  %v3820_v61 = vshrl.u32 %v5501_v31, 16  ;;  %v7514_v22 = vrot.slane %v3754_v53, 4  ;;  %v1400_v25 = vrot.slane %v6468_v18, 5  ;;  %v3788_v43 = vor.u32 %v3787_v4, %v7497_v34 }
  0xd5   : > { %6010 = vmatmul.mubr.msk.bf16.gmra.mrb[16].mxu0 %vm750_vm3, %v6411_v10  ;;  %8435 = vst [vmem:[#allocation9_spill] sm:$0xff] %v7512_v9  ;;  %v3823_v10 = vshll.u32 %v5501_v31, 16  ;;  %v3802_v31 = vor.u32 %v3801_v37, %v3798_v27  ;;  %v3812_v53 = vor.u32 %v3811_v52, %v7506_v50  ;;  %v8436_v18 = vcombine.low %v7253_v19, %v7266_v58  ;;  %v6415_v37 = vld [vmem:[%s6585_s30 + $0xb4] sm:$0xff]  }
  0xd6   : > { %5858 = vmatmul.mubr.msk.bf16.vlgmr.msra.gmra.mrb[0].mxu1 %vm750_vm3, %v8433_v38  ;;  %6013 = vmatprep.mubr.msk.bf16.mxu0 %vm750_vm3, %v6412_v21  ;;  %v3777_v21 = vrot.slane %v3775_v15, 5  ;;  %v7495_v38 = vld [vmem:[%s6585_s30 + $0x50] sm:$0x1]  ;;  %v7504_v15 = vld [vmem:[%s6585_s30 + $0x5c] sm:$0x1]  ;;  %v8437_v27 = vcombine.low %v7271_v2, %v7275_v1  ;;  %v1402_v52 = vrot.slane %v1400_v25, 4 }
  0xd7   : > { %5890 = vmatpush3.bf16.msra.mxu1 %v7242_v49  ;;  %5861 = vmatprep.mubr.msk.bf16.mxu1 %vm750_vm3, %v8434_v23  ;;  %v3764_v49 = vor.u32 %v3763_v46, %v7454_v28  ;;  %v7508_v46 = vrot.slane %v3767_v5, 5  ;;  %v1393_v23 = vrot.slane %v6466_v6, 5  ;;  %v3791_v48 = vshll.u32 %v7495_v38, 16  ;;  %v1269_v5 = vld [vmem:[%s6585_s30 + $0x9c] sm:$0xe] }
  0xd8   : > { %6356 = vmatprep.subr.msk.bf16.mxu1 %vm799_vm0, %v6465_v36  ;;  %v6467_v36 = vld [vmem:[%s6585_s30 + $0x98] sm:$0x1]  ;;  %v3778_v7 = vor.u32 %v3777_v21, %v3774_v62  ;;  %v3815_v6 = vshll.u32 %v7504_v15, 16  ;;  %v3833_v62 = vshrl.u32 %v7512_v9, 16  ;;  %v3825_v4 = vrot.slane %v3823_v10, 5 }
  0xd9   : > { %v1396_v33 = vrot.slane %v6467_v36, 5  ;;  %v3765_v8 = vrot.slane %v3764_v49, 4  ;;  %v3829_v36 = vshll.u32 %v7512_v9, 16  ;;  %v7533_v21 = vsel %vm6837_vm7, %v5170_v54, %v1393_v23  ;;  %v7544_v2 = vld [vmem:[%s6585_s30 + $0x68] sm:$0x1] }
  0xda   : > { %v3822_v49 = vrot.slane %v3820_v61, 4  ;;  %v3779_v19 = vrot.slane %v3778_v7, 4  ;;  %v5171_v58 = vrot.slane %v1269_v5, 9  ;;  %v3789_v3 = vrot.slane %v3788_v43, 4  ;;  %8438 = vst [vmem:[#allocation10_spill] sm:$0xff] %v7544_v2  ;;  %v6416_v5 = vld [vmem:[%s6585_s30 + $0xc0] sm:$0xff]  }
  0xdb   : > { %v3793_v54 = vrot.slane %v3791_v48, 5  ;;  %v3817_v63 = vrot.slane %v3815_v6, 5  ;;  %v1407_v61 = vrot.slane %v6979_v56, 5  ;;  %v3803_v10 = vrot.slane %v3802_v31, 4  ;;  %v1271_v31 = vld [vmem:[%s6585_s30 + $0xb4] sm:$0xe] }
  0xdc   : > { %v3813_v51 = vrot.slane %v3812_v53, 4  ;;  %v7546_v1 = vrot.slane %v3829_v36, 5  ;;  %v3835_v7 = vrot.slane %v3833_v62, 4  ;;  %v3760_v43 = vsel %vm6611_vm4, %v7514_v22, %v7454_v28  ;;  %v6470_v62 = vld [vmem:[%s6585_s30 + $0xb0] sm:$0x1] }
  0xdd   : > { %6014 = vmatmul.mubr.msk.bf16.gmra.mrb[20].mxu0 %vm750_vm3, %v6413_v26  ;;  %v1395_v26 = vrot.slane %v1393_v23, 4  ;;  %v1270_v23 = vld [vmem:[%s6585_s30 + $0xa8] sm:$0xe]  ;;  %v3770_v48 = vsel %vm6611_vm4, %v3765_v8, %v7508_v46  ;;  %v3826_v6 = vor.u32 %v3825_v4, %v3822_v49  ;;  %v3784_v53 = vsel %vm6611_vm4, %v3779_v19, %v7497_v34  ;;  %v5504_v46 = vld [vmem:[%s6585_s30 + $0x6c] sm:$0xf] }
  0xde   : > { %5862 = vmatmul.mubr.msk.bf16.gmra.mrb[4].mxu1 %vm750_vm3, %v8436_v18  ;;  %6017 = vmatprep.mubr.msk.bf16.mxu0 %vm750_vm3, %v6414_v30  ;;  %v6469_v18 = vld [vmem:[%s6585_s30 + $0xa4] sm:$0x1]  ;;  %v7566_v36 = vsel %vm6837_vm7, %v5171_v58, %v1400_v25  ;;  %v5172_v28 = vrot.slane %v1270_v23, 9  ;;  %v1409_v8 = vrot.slane %v1407_v61, 4  ;;  %v3839_v49 = vshll.u32 %v7544_v2, 16 }
  0xdf   : > { %5865 = vmatprep.mubr.msk.bf16.mxu1 %vm750_vm3, %v8437_v27  ;;  %v1403_v30 = vrot.slane %v6469_v18, 5  ;;  %v7558_v56 = vsel %vm6837_vm7, %v1395_v26, %v1396_v33  ;;  %v3794_v33 = vsel %vm6611_vm4, %v3789_v3, %v3793_v54  ;;  %v1410_v26 = vrot.slane %v6470_v62, 5  ;;  %v5507_v18 = vld [vmem:[%s6585_s30 + $0x78] sm:$0xf]  ;;  %v7621_v54 = vld [vmem:[%s6585_s30 + $0xbc] sm:$0x1] }
  0xe0   : > { %v3808_v34 = vsel %vm6611_vm4, %v3803_v10, %v7506_v50  ;;  %v3818_v25 = vsel %vm6611_vm4, %v3813_v51, %v3817_v63  ;;  %v3836_v4 = vor.u32 %v3835_v7, %v7546_v1  ;;  %v5173_v27 = vrot.slane %v1271_v31, 9  ;;  %v7595_v51 = vld [vmem:[%s6585_s30 + $0x70] sm:$0xf]  ;;  %v7625_v10 = vld [vmem:[%s6585_s30 + $0x7c] sm:$0xf] }
  0xe1   : > { %v7570_v22 = vsel %vm6837_vm7, %v1402_v52, %v1403_v30  ;;  %v8440_v3 = vcombine.low %v7288_v45, %v7292_v59  ;;  %v7591_v19 = vrot.slane %v3826_v6, 4  ;;  %v1414_v50 = vrot.slane %v7003_v42, 5  ;;  %8441 = vst [vmem:[#allocation12_spill] sm:$0xff] %v7595_v51  ;;  %8443 = vst [vmem:[#allocation13_spill] sm:$0xff] %v7625_v10  ;;  %v5510_v7 = vld [vmem:[%s6585_s30 + $0x84] sm:$0xf] }
  0xe2   : > { %8439 = vst [vmem:[#allocation11_spill] sm:$0xff] %v7570_v22  ;;  %v3844_v63 = vshrl.u32 %v5504_v46, 16  ;;  %v8442_v45 = vcombine.low %v7296_v47, %v7323_v41  ;;  %v7603_v58 = vcombine.low %v3784_v53, %v3794_v33  ;;  %v7609_v42 = vsel %vm6837_vm7, %v5172_v28, %v1407_v61  ;;  %v6417_v61 = vld [vmem:[%s6585_s30 + $0xcc] sm:$0xff]   ;;  %v7637_v31 = vld [vmem:[%s6585_s30 + $0x88] sm:$0xf] }
  0xe3   : > { %v7612_v30 = vcombine.low %v3808_v34, %v3818_v25  ;;  %v7616_v47 = vsel %vm6837_vm7, %v1409_v8, %v1410_v26  ;;  %v7618_v41 = vrot.slane %v3839_v49, 5  ;;  %v3853_v6 = vshll.u32 %v7595_v51, 16  ;;  %8444 = vst [vmem:[#allocation14_spill] sm:$0xff] %v7637_v31  ;;  %v5513_v62 = vld [vmem:[%s6585_s30 + $0x90] sm:$0xf] }
  0xe4   : > { %v7643_v28 = vrot.slane %v1414_v50, 4  ;;  %v7645_v33 = vrot.slane %v3844_v63, 4  ;;  %v3857_v8 = vshrl.u32 %v7595_v51, 16  ;;  %v3868_v26 = vshrl.u32 %v5507_v18, 16  ;;  %v7652_v25 = vld [vmem:[%s6585_s30 + $0x94] sm:$0xf] }
  0xe5   : > { %6018 = vmatmul.mubr.msk.bf16.gmra.mrb[24].mxu0 %vm750_vm3, %v6415_v37  ;;  %v7589_v37 = vcombine.low %v3760_v43, %v3770_v48  ;;  %v7633_v43 = vsel %vm6837_vm7, %v5173_v27, %v1414_v50  ;;  %v3847_v48 = vshll.u32 %v5504_v46, 16  ;;  %v3871_v49 = vshll.u32 %v5507_v18, 16  ;;  %8445 = vst [vmem:[#allocation15_spill] sm:$0xff] %v7652_v25  ;;  %v7690_v2 = vld [vmem:[%s6585_s30 + $0x8c] sm:$0x1] }
  0xe6   : > { %5866 = vmatmul.mubr.msk.bf16.gmra.mrb[8].mxu1 %vm750_vm3, %v8440_v3  ;;  %6021 = vmatprep.mubr.msk.bf16.mxu0 %vm750_vm3, %v6416_v5  ;;  %v7629_v5 = vrot.slane %v3836_v4, 4  ;;  %v3877_v46 = vshll.u32 %v7625_v10, 16  ;;  %v3881_v34 = vshrl.u32 %v7625_v10, 16  ;;  %v3892_v4 = vshrl.u32 %v5510_v7, 16 }
  0xe7   : > { %5869 = vmatprep.mubr.msk.bf16.mxu1 %vm750_vm3, %v8442_v45  ;;  %v3895_v27 = vshll.u32 %v5510_v7, 16  ;;  %v3901_v3 = vshll.u32 %v7637_v31, 16  ;;  %v3905_v50 = vshrl.u32 %v7637_v31, 16  ;;  %v7662_v45 = vld [vmem:[%s6585_s30 + $0x74] sm:$0x1]  ;;  %v3849_v18 = vrot.slane %v3847_v48, 5 }
  0xe8   : > { %v3916_v52 = vshrl.u32 %v5513_v62, 16  ;;  %v3919_v53 = vshll.u32 %v5513_v62, 16  ;;  %v8446_v7 = vcombine.low %v7307_v60, %v7332_v44  ;;  %v3859_v59 = vrot.slane %v3857_v8, 4  ;;  %v5516_v48 = vld [vmem:[%s6585_s30 + $0x9c] sm:$0xf] }
  0xe9   : > { %v3925_v63 = vshll.u32 %v7652_v25, 16  ;;  %v3929_v23 = vshrl.u32 %v7652_v25, 16  ;;  %v8447_v62 = vcombine.low %v7347_v17, %v7351_v57  ;;  %v7680_v44 = vld [vmem:[%s6585_s30 + $0x80] sm:$0x1]  ;;  %v3870_v60 = vrot.slane %v3868_v26, 4 }
  0xea   : > { %8448 = vst [vmem:[#allocation16_spill] sm:$0xff] %v7680_v44  ;;  %v3894_v31 = vrot.slane %v3892_v4, 4  ;;  %v3897_v8 = vrot.slane %v3895_v27, 5  ;;  %v7684_v10 = vrot.slane %v3901_v3, 5  ;;  %v3907_v51 = vrot.slane %v3905_v50, 4 }
  0xeb   : > { %v7687_v25 = vld [vmem:[%s6585_s30 + $0xa0] sm:$0xf]  ;;  %v3918_v17 = vrot.slane %v3916_v52, 4  ;;  %v3921_v57 = vrot.slane %v3919_v53, 5  ;;  %v3943_v9 = vshll.u32 %v5516_v48, 16  ;;  %v3850_v26 = vor.u32 %v3849_v18, %v7645_v33 }
  0xec   : > { %v3887_v27 = vshll.u32 %v7680_v44, 16  ;;  %v7699_v3 = vld [vmem:[%s6585_s30 + $0x98] sm:$0x1]  ;;  %v3949_v50 = vshll.u32 %v7687_v25, 16  ;;  %v3953_v52 = vshrl.u32 %v7687_v25, 16  ;;  %v3898_v22 = vor.u32 %v3897_v8, %v3894_v31 }
  0xed   : > { %6022 = vmatmul.mubr.msk.bf16.gmra.mrb[28].mxu0 %vm750_vm3, %v6417_v61  ;;  %v7670_v61 = vrot.slane %v3853_v6, 5  ;;  %v3883_v6 = vrot.slane %v3881_v34, 4  ;;  %v3931_v34 = vrot.slane %v3929_v23, 4  ;;  %v3911_v33 = vshll.u32 %v7690_v2, 16 }
  0xee   : > { %5870 = vmatmul.mubr.msk.bf16.gmra.mrb[12].mxu1 %vm750_vm3, %v8446_v7  ;;  %6027 = vmatprep.mubr.msk.bf16.mxu0 %vm750_vm3, %v7412_v20  ;;  %v3873_v7 = vrot.slane %v3871_v49, 5  ;;  %v7682_v20 = vrot.slane %v3877_v46, 5  ;;  %v3863_v49 = vshll.u32 %v7662_v45, 16  ;;  %v7694_v46 = vrot.slane %v3925_v63, 5 }
  0xef   : > { %5873 = vmatprep.mubr.msk.bf16.mxu1 %vm750_vm3, %v8447_v62  ;;  %v3940_v62 = vshrl.u32 %v5516_v48, 16  ;;  %v3860_v4 = vor.u32 %v3859_v59, %v7670_v61  ;;  %v3908_v23 = vor.u32 %v3907_v51, %v7684_v10  ;;  %v3922_v59 = vor.u32 %v3921_v57, %v3918_v17  ;;  %v7732_v57 = vld [vmem:[%s6585_s30 + $0xa4] sm:$0x1] }
  0xf0   : > { %v3874_v53 = vor.u32 %v3873_v7, %v3870_v60  ;;  %v3884_v48 = vor.u32 %v3883_v6, %v7682_v20  ;;  %v3945_v18 = vrot.slane %v3943_v9, 5  ;;  %v8449_v44 = vcombine.low %v7359_v11, %v7363_v40 }
  0xf1   : > { %v3942_v63 = vrot.slane %v3940_v62, 4  ;;  %v8450_v31 = vrot.slane %v7621_v54, 5  ;;  %v3865_v51 = vrot.slane %v3863_v49, 5  ;;  %v3932_v60 = vor.u32 %v3931_v34, %v7694_v46  ;;  %v7735_v34 = vld [vmem:[%s6585_s30 + $0xac] sm:$0xf] }
  0xf2   : > { %v3935_v9 = vshll.u32 %v7699_v3, 16  ;;  %v8451_v11 = vcombine.low %v7431_v39, %v7435_v55  ;;  %v3851_v40 = vrot.slane %v3850_v26, 4  ;;  %v7728_v54 = vrot.slane %v3949_v50, 5 }
  0xf3   : > { %v3875_v7 = vrot.slane %v3874_v53, 4  ;;  %v3885_v6 = vrot.slane %v3884_v48, 4  ;;  %v3889_v8 = vrot.slane %v3887_v27, 5  ;;  %v3913_v17 = vrot.slane %v3911_v33, 5  ;;  %v7745_v48 = vld [vmem:[%s6585_s30 + $0xb0] sm:$0x1] }
  0xf4   : > { %v3899_v39 = vrot.slane %v3898_v22, 4  ;;  %v3909_v55 = vrot.slane %v3908_v23, 4  ;;  %v3923_v62 = vrot.slane %v3922_v59, 4  ;;  %v3946_v49 = vor.u32 %v3945_v18, %v3942_v63 }
  0xf5   : > { %6028 = vmatmul.mubr.msk.bf16.vlgmr.msra.gmra.mrb[0].mxu0 %vm750_vm3, %v7475_v16  ;;  %v7718_v16 = vsel %vm6837_vm7, %v7643_v28, %v8450_v31  ;;  %v3955_v28 = vrot.slane %v3953_v52, 4  ;;  %v3937_v26 = vrot.slane %v3935_v9, 5  ;;  %v3856_v52 = vsel %vm6611_vm4, %v3851_v40, %v7670_v61 }
  0xf6   : > { %5874 = vmatmul.mubr.msk.bf16.gmra.mrb[16].mxu1 %vm750_vm3, %v8449_v44  ;;  %6060 = vmatpush3.bf16.msra.mxu0 %v7416_v14  ;;  %v3861_v14 = vrot.slane %v3860_v4, 4  ;;  %v5519_v44 = vld [vmem:[%s6585_s30 + $0xa8] sm:$0xf]  ;;  %v3959_v22 = vshll.u32 %v7732_v57, 16  ;;  %v3880_v33 = vsel %vm6611_vm4, %v3875_v7, %v7682_v20  ;;  %v3890_v23 = vsel %vm6611_vm4, %v3885_v6, %v3889_v8 }
  0xf7   : > { %5877 = vmatprep.mubr.msk.bf16.mxu1 %vm750_vm3, %v8451_v11  ;;  %6031 = vmatprep.mubr.msk.bf16.mxu0 %vm750_vm3, %v7486_v29  ;;  %v3933_v29 = vrot.slane %v3932_v60, 4  ;;  %v3964_v4 = vshrl.u32 %v5519_v44, 16  ;;  %v3967_v50 = vshll.u32 %v5519_v44, 16  ;;  %v3956_v53 = vor.u32 %v3955_v28, %v7728_v54  ;;  %v5568_v11 = vld [vmem:[%s6585_s30 + $0x48] sm:$0xe] }
  0xf8   : > { %v3866_v27 = vsel %vm6611_vm4, %v3861_v14, %v3865_v51  ;;  %v3973_v59 = vshll.u32 %v7735_v34, 16  ;;  %v3977_v61 = vshrl.u32 %v7735_v34, 16  ;;  %v3904_v63 = vsel %vm6611_vm4, %v3899_v39, %v7684_v10  ;;  %v7810_v39 = vld [vmem:[%s6585_s30 + $0xb8] sm:$0xf] }
  0xf9   : > { %v3914_v18 = vsel %vm6611_vm4, %v3909_v55, %v3913_v17  ;;  %v3928_v20 = vsel %vm6611_vm4, %v3923_v62, %v7694_v46  ;;  %v3947_v31 = vrot.slane %v3946_v49, 4  ;;  %v8452_v51 = vcombine.low %v7448_v12, %v7463_v35 }
  0xfa   : > { %v3966_v10 = vrot.slane %v3964_v4, 4  ;;  %v3969_v60 = vrot.slane %v3967_v50, 5  ;;  %v3983_v9 = vshll.u32 %v7745_v48, 16  ;;  %v8453_v46 = vcombine.low %v7533_v21, %v7558_v56  ;;  %v5522_v21 = vld [vmem:[%s6585_s30 + $0xb4] sm:$0xf] }
  0xfb   : > { %v5189_v12 = vcombine.low %v7609_v42, %v7616_v47  ;;  %v8454_v35 = vsel %vm6611_vm4, %v7629_v5, %v7618_v41  ;;  %v3957_v14 = vrot.slane %v3956_v53, 4  ;;  %v3961_v28 = vrot.slane %v3959_v22, 5  ;;  %v5570_v4 = vld [vmem:[%s6585_s30 + $0x60] sm:$0xe]  ;;  %v5571_v53 = vld [vmem:[%s6585_s30 + $0x6c] sm:$0xe] }
  0xfc   : > { %v5190_v56 = vcombine.low %v7633_v43, %v7718_v16  ;;  %v7793_v44 = vcombine.low %v3856_v52, %v3866_v27  ;;  %v7795_v42 = vrot.slane %v3973_v59, 5  ;;  %v3979_v47 = vrot.slane %v3977_v61, 4  ;;  %v8463_v16 = vld [vmem:[#allocation4_spill] sm:$0xff] }
  0xfd   : > { %6032 = vmatmul.mubr.msk.bf16.gmra.mrb[4].mxu0 %vm750_vm3, %v7589_v37  ;;  %v3938_v37 = vsel %vm6611_vm4, %v3933_v29, %v3937_v26  ;;  %v7797_v41 = vcombine.low %v3880_v33, %v3890_v23  ;;  %v7799_v5 = vcombine.low %v3904_v63, %v3914_v18  ;;  %v3952_v6 = vsel %vm6611_vm4, %v3947_v31, %v7728_v54  ;;  %v8456_v23 = vld [vmem:[#allocation11_spill] sm:$0xff]  ;;  %v5525_v63 = vld [vmem:[%s6585_s30 + $0xc0] sm:$0xf]  ;;  %v8458_v18 = vld [vmem:[#allocation9_spill] sm:$0xff] }
  0xfe   : > { %5878 = vmatmul.mubr.msk.bf16.gmra.mrb[20].mxu1 %vm750_vm3, %v8452_v51  ;;  %6035 = vmatprep.mubr.msk.bf16.mxu0 %vm750_vm3, %v7603_v58  ;;  %v8455_v58 = vsel %vm6611_vm4, %v7591_v19, %v7546_v1  ;;  %v7801_v7 = vcombine.low %v3928_v20, %v3938_v37  ;;  %v5584_v1 = vrot.slane %v5568_v11, 9  ;;  %v5569_v19 = vld [vmem:[%s6585_s30 + $0x54] sm:$0xe]  ;;  %v3970_v8 = vor.u32 %v3969_v60, %v3966_v10  ;;  %v8459_v31 = vld [vmem:[#allocation10_spill] sm:$0xff] }
  0xff   : > { %5881 = vmatprep.mubr.msk.bf16.mxu1 %vm750_vm3, %v8453_v46  ;;  %v5538_v40 = vcombine.low %v8455_v58, %v8454_v35  ;;  %v7807_v17 = vrot.slane %v3983_v9, 5  ;;  %v3988_v55 = vshrl.u32 %v5522_v21, 16  ;;  %v3962_v62 = vsel %vm6611_vm4, %v3957_v14, %v3961_v28  ;;  %v8460_v9 = vld [vmem:[#allocation12_spill] sm:$0xff]  ;;  %v7859_v35 = vld [vmem:[%s6585_s30 + $0xbc] sm:$0x1] }
 0x100   : > { %v3991_v49 = vshll.u32 %v5522_v21, 16  ;;  %v4447_v29 = vrot.slane %v7441_v0, 5  ;;  %v4450_v26 = vrot.slane %v7495_v38, 5  ;;  %v3980_v50 = vor.u32 %v3979_v47, %v7795_v42  ;;  %v7862_v58 = vld [vmem:[%s6585_s30 + $0xc4] sm:$0xf] }
 0x101   : > { %v5585_v52 = vrot.slane %v5569_v19, 9  ;;  %v4454_v54 = vrot.slane %v7452_v24, 5  ;;  %v4457_v27 = vrot.slane %v7504_v15, 5  ;;  %v3997_v22 = vshll.u32 %v7810_v39, 16  ;;  %v5572_v19 = vld [vmem:[%s6585_s30 + $0x78] sm:$0xe] }
 0x102   : > { %v4001_v33 = vshrl.u32 %v7810_v39, 16  ;;  %v7827_v0 = vsel %vm6837_vm7, %v5584_v1, %v4447_v29  ;;  %v4449_v38 = vrot.slane %v4447_v29, 4  ;;  %v8457_v59 = vcombine.low %v7566_v36, %v8456_v23  ;;  %v8461_v23 = vld [vmem:[#allocation13_spill] sm:$0xff] }
 0x103   : > { %v7834_v24 = vcombine.low %v3952_v6, %v3962_v62  ;;  %v7838_v15 = vsel %vm6837_vm7, %v5585_v52, %v4454_v54  ;;  %v5586_v61 = vrot.slane %v5570_v4, 9  ;;  %v4461_v20 = vrot.slane %v8458_v18, 5  ;;  %v6418_v6 = vld [vmem:[%s6585_s30 + $0xc] sm:$0xff]  }
 0x104   : > { %v7844_v36 = vsel %vm6837_vm7, %v4449_v38, %v4450_v26  ;;  %v4464_v51 = vrot.slane %v8459_v31, 5  ;;  %v5587_v37 = vrot.slane %v5571_v53, 9  ;;  %v4468_v11 = vrot.slane %v8460_v9, 5 }
 0x105   : > { %6036 = vmatmul.mubr.msk.bf16.gmra.mrb[8].mxu0 %vm750_vm3, %v7612_v30  ;;  %v4456_v30 = vrot.slane %v4454_v54, 4  ;;  %v5601_v10 = vcombine.low %v7827_v0, %v7844_v36  ;;  %v4471_v46 = vrot.slane %v7662_v45, 5  ;;  %v7868_v14 = vsel %vm6837_vm7, %v5586_v61, %v4461_v20 }
 0x106   : > { %5882 = vmatmul.mubr.msk.bf16.gmra.mrb[24].mxu1 %vm750_vm3, %v8457_v59  ;;  %6039 = vmatprep.mubr.msk.bf16.mxu0 %vm750_vm3, %v5538_v40  ;;  %v4463_v28 = vrot.slane %v4461_v20, 4  ;;  %v7870_v21 = vrot.slane %v3988_v55, 4  ;;  %v4012_v47 = vshrl.u32 %v5525_v63, 16  ;;  %v7874_v45 = vsel %vm6837_vm7, %v5587_v37, %v4468_v11  ;;  %v5299_v55 = vld [vmem:[%s6585_s30 + $0x78] sm:$0xf]  ;;  %v8462_v59 = vld [vmem:[#allocation16_spill] sm:$0xff] }
 0x107   : > { %5885 = vmatprep.mubr.msk.bf16.mxu1 %vm750_vm3, %v5189_v12  ;;  %v7852_v60 = vsel %vm6837_vm7, %v4456_v30, %v4457_v27  ;;  %v7856_v12 = vrot.slane %v3970_v8, 4  ;;  %v4470_v1 = vrot.slane %v4468_v11, 4  ;;  %v7878_v8 = vrot.slane %v3980_v50, 4 }
 0x108   : > { %v5602_v40 = vcombine.low %v7838_v15, %v7852_v60  ;;  %v7880_v62 = vrot.slane %v3991_v49, 5  ;;  %v4015_v29 = vshll.u32 %v5525_v63, 16  ;;  %v7884_v26 = vsel %vm6837_vm7, %v4463_v28, %v4464_v51  ;;  %v8465_v28 = vld [vmem:[#allocation14_spill] sm:$0xff] }
 0x109   : > { %v7887_v4 = vrot.slane %v3997_v22, 5  ;;  %v7889_v52 = vrot.slane %v4001_v33, 4  ;;  %v5603_v54 = vcombine.low %v7868_v14, %v7884_v26  ;;  %v7895_v27 = vsel %vm6837_vm7, %v4470_v1, %v4471_v46  ;;  %v5573_v33 = vld [vmem:[%s6585_s30 + $0x84] sm:$0xe]  ;;  %v6419_v1 = vld [vmem:[%s6585_s30 + $0x18] sm:$0xff]  }
 0x10a   : > { %v4007_v49 = vshll.u32 %v7859_v35, 16  ;;  %v4021_v50 = vshll.u32 %v7862_v58, 16  ;;  %v5604_v53 = vcombine.low %v7874_v45, %v7895_v27  ;;  %v5588_v22 = vrot.slane %v5572_v19, 9  ;;  %v6481_v60 = vld [vmem:[%s6585_s30 + $0xa0] sm:$0xf] }
 0x10b   : > { %v4014_v38 = vrot.slane %v4012_v47, 4  ;;  %v4478_v30 = vrot.slane %v8462_v59, 5  ;;  %v2337_v61 = vshrl.u32 %v5299_v55, 16  ;;  %v4017_v63 = vrot.slane %v4015_v29, 5  ;;  %v5528_v29 = vld [vmem:[%s6585_s30 + $0xcc] sm:$0xf] }
 0x10c   : > { %v4025_v18 = vshrl.u32 %v7862_v58, 16  ;;  %v2340_v43 = vshll.u32 %v5299_v55, 16  ;;  %v5589_v37 = vrot.slane %v5573_v33, 9  ;;  %v3976_v9 = vsel %vm6611_vm4, %v7856_v12, %v7795_v42  ;;  %v7938_v55 = vld [vmem:[%s6585_s30 + $0xd0] sm:$0xf] }
 0x10d   : > { %6040 = vmatmul.mubr.msk.bf16.gmra.mrb[12].mxu0 %vm750_vm3, %v7793_v44  ;;  %v4475_v44 = vrot.slane %v8461_v23, 5  ;;  %v2339_v51 = vrot.slane %v2337_v61, 4  ;;  %v3994_v11 = vor.u32 %v7880_v62, %v7870_v21  ;;  %v4482_v47 = vrot.slane %v8465_v28, 5  ;;  %v6420_v21 = vld [vmem:[%s6585_s30 + $0x24] sm:$0xff]   ;;  %v6485_v27 = vld [vmem:[%s6585_s30 + $0xac] sm:$0xf] }
 0x10e   : > { %5886 = vmatmul.mubr.msk.bf16.gmra.mrb[28].mxu1 %vm750_vm3, %v5190_v56  ;;  %6043 = vmatprep.mubr.msk.bf16.mxu0 %vm750_vm3, %v7797_v41  ;;  %v8464_v56 = vld [vmem:[#allocation5_spill] sm:$0xff]  ;;  %v2342_v46 = vrot.slane %v2340_v43, 5  ;;  %v3986_v19 = vsel %vm6611_vm4, %v7878_v8, %v7807_v17  ;;  %v4485_v12 = vrot.slane %v7690_v2, 5  ;;  %v7946_v62 = vrot.slane %v4021_v50, 5  ;;  %v5574_v8 = vld [vmem:[%s6585_s30 + $0x90] sm:$0xe] }
 0x10f   : > { %5891 = vmatprep.mubr.msk.bf16.mxu1 %vm750_vm3, %v6418_v6  ;;  %v2359_v41 = vsel %vm6611_vm4, %v8464_v56, %v8463_v16  ;;  %v7920_v20 = vsel %vm6837_vm7, %v5588_v22, %v4475_v44  ;;  %v4477_v31 = vrot.slane %v4475_v44, 4  ;;  %v4004_v6 = vor.u32 %v7889_v52, %v7887_v4  ;;  %v7952_v52 = vld [vmem:[%s6585_s30 + $0xc8] sm:$0x1]  ;;  %v8467_v16 = vld [vmem:[#allocation2_spill] sm:$0xff] }
 0x110   : > { %v4027_v22 = vrot.slane %v4025_v18, 4  ;;  %v2343_v17 = vor.u32 %v2342_v46, %v2339_v51  ;;  %v4009_v23 = vrot.slane %v4007_v49, 5  ;;  %v4018_v44 = vor.u32 %v4017_v63, %v4014_v38  ;;  %v8468_v51 = vld [vmem:[#allocation3_spill] sm:$0xff] }
 0x111   : > { %v7942_v42 = vsel %vm6837_vm7, %v4477_v31, %v4478_v30  ;;  %v7956_v59 = vsel %vm6837_vm7, %v5589_v37, %v4482_v47  ;;  %v4484_v30 = vrot.slane %v4482_v47, 4  ;;  %v4036_v2 = vshrl.u32 %v5528_v29, 16 }
 0x112   : > { %v5605_v33 = vcombine.low %v7920_v20, %v7942_v42  ;;  %v4039_v50 = vshll.u32 %v5528_v29, 16  ;;  %v4045_v61 = vshll.u32 %v7938_v55, 16  ;;  %v2344_v18 = vrot.slane %v2343_v17, 4  ;;  %v6421_v29 = vld [vmem:[%s6585_s30 + $0x30] sm:$0xff]  }
 0x113   : > { %v4049_v49 = vshrl.u32 %v7938_v55, 16  ;;  %v7967_v38 = vsel %vm6837_vm7, %v4484_v30, %v4485_v12  ;;  %v5590_v63 = vrot.slane %v5574_v8, 9  ;;  %v4028_v56 = vor.u32 %v4027_v22, %v7946_v62 }
 0x114   : > { %v4031_v31 = vshll.u32 %v7952_v52, 16  ;;  %v5606_v37 = vcombine.low %v7956_v59, %v7967_v38  ;;  %v5544_v46 = vcombine.low %v3976_v9, %v3986_v19  ;;  %v3995_v28 = vrot.slane %v3994_v11, 4  ;;  %v5575_v11 = vld [vmem:[%s6585_s30 + $0x9c] sm:$0xe] }
 0x115   : > { %6044 = vmatmul.mubr.msk.bf16.gmra.mrb[16].mxu0 %vm750_vm3, %v7799_v5  ;;  %v8466_v5 = vld [vmem:[#allocation15_spill] sm:$0xff]  ;;  %v4005_v47 = vrot.slane %v4004_v6, 4  ;;  %v4019_v12 = vrot.slane %v4018_v44, 4  ;;  %v4492_v8 = vrot.slane %v7699_v3, 5  ;;  %v4038_v30 = vrot.slane %v4036_v2, 4  ;;  %v6422_v19 = vld [vmem:[%s6585_s30 + $0x3c] sm:$0xff]  }
 0x116   : > { %5892 = vmatmul.mubr.msk.bf16.vlgmr.msra.gmra.mrb[0].mxu1 %vm750_vm3, %v6419_v1  ;;  %6047 = vmatprep.mubr.msk.bf16.mxu0 %vm750_vm3, %v7801_v7  ;;  %v4489_v43 = vrot.slane %v8466_v5, 5  ;;  %v2349_v7 = vsel %vm6611_vm4, %v2344_v18, %v8468_v51  ;;  %v4041_v18 = vrot.slane %v4039_v50, 5  ;;  %v7990_v5 = vrot.slane %v4045_v61, 5 }
 0x117   : > { %6094 = vmatpush3.bf16.msra.mxu1 %v8467_v16  ;;  %5895 = vmatprep.mubr.msk.bf16.mxu1 %vm750_vm3, %v6420_v21  ;;  %v7979_v1 = vcombine.low %v2349_v7, %v2359_v41  ;;  %v7983_v21 = vld [vmem:[%s6585_s30 + $0xd4] sm:$0x1]  ;;  %v4051_v9 = vrot.slane %v4049_v49, 4  ;;  %v4029_v41 = vrot.slane %v4028_v56, 4  ;;  %v4033_v6 = vrot.slane %v4031_v31, 5 }
 0x118   : > { %v7987_v22 = vsel %vm6837_vm7, %v5590_v63, %v4489_v43  ;;  %v4491_v17 = vrot.slane %v4489_v43, 4  ;;  %v4000_v63 = vsel %vm6611_vm4, %v3995_v28, %v7887_v4  ;;  %v4010_v2 = vsel %vm6611_vm4, %v4005_v47, %v4009_v23  ;;  %v6472_v16 = vld [vmem:[%s6585_s30 + $0x1c] sm:$0xf]  ;;  %v5576_v28 = vld [vmem:[%s6585_s30 + $0xa8] sm:$0xe] }
 0x119   : > { %v4055_v50 = vshll.u32 %v7983_v21, 16  ;;  %v5591_v61 = vrot.slane %v5575_v11, 9  ;;  %v4496_v49 = vrot.slane %v7687_v25, 5  ;;  %v4024_v4 = vsel %vm6611_vm4, %v4019_v12, %v7946_v62  ;;  %v5564_v62 = vld [vmem:[%s6585_s30 + $0x18] sm:$0xe]  ;;  %v6423_v47 = vld [vmem:[%s6585_s30 + $0x48] sm:$0xff]  }
 0x11a   : > { %v7996_v44 = vsel %vm6837_vm7, %v4491_v17, %v4492_v8  ;;  %v4052_v43 = vor.u32 %v4051_v9, %v7990_v5  ;;  %v4499_v23 = vrot.slane %v7732_v57, 5  ;;  %v4034_v25 = vsel %vm6611_vm4, %v4029_v41, %v4033_v6  ;;  %v6473_v11 = vld [vmem:[%s6585_s30 + $0x20] sm:$0x1] }
 0x11b   : > { %v5607_v3 = vcombine.low %v7987_v22, %v7996_v44  ;;  %v4419_v56 = vrot.slane %v6472_v16, 5  ;;  %v8022_v31 = vsel %vm6837_vm7, %v5591_v61, %v4496_v49  ;;  %v4498_v51 = vrot.slane %v4496_v49, 4  ;;  %v5577_v49 = vld [vmem:[%s6585_s30 + $0xb4] sm:$0xe] }
 0x11c   : > { %v5545_v7 = vcombine.low %v4000_v63, %v4010_v2  ;;  %v4053_v17 = vrot.slane %v4052_v43, 4  ;;  %v5592_v41 = vrot.slane %v5576_v28, 9  ;;  %v4503_v6 = vrot.slane %v7735_v34, 5  ;;  %v5565_v2 = vld [vmem:[%s6585_s30 + $0x24] sm:$0xe] }
 0x11d   : > { %6048 = vmatmul.mubr.msk.bf16.gmra.mrb[20].mxu0 %vm750_vm3, %v7834_v24  ;;  %v4042_v24 = vor.u32 %v4041_v18, %v4038_v30  ;;  %v8027_v57 = vsel %vm6837_vm7, %v4498_v51, %v4499_v23  ;;  %v6424_v30 = vld [vmem:[%s6585_s30 + $0x54] sm:$0xff]   ;;  %v5580_v18 = vrot.slane %v5564_v62, 9  ;;  %v4421_v9 = vrot.slane %v4419_v56, 4  ;;  %v6476_v28 = vld [vmem:[%s6585_s30 + $0x2c] sm:$0x1] }
 0x11e   : > { %5896 = vmatmul.mubr.msk.bf16.gmra.mrb[4].mxu1 %vm750_vm3, %v6421_v29  ;;  %6051 = vmatprep.mubr.msk.bf16.mxu0 %vm750_vm3, %v5544_v46  ;;  %v4057_v46 = vrot.slane %v4055_v50, 5  ;;  %v5546_v29 = vcombine.low %v4024_v4, %v4034_v25  ;;  %v5608_v8 = vcombine.low %v8022_v31, %v8027_v57  ;;  %v4506_v63 = vrot.slane %v7745_v48, 5  ;;  %v6474_v50 = vld [vmem:[%s6585_s30 + $0x28] sm:$0xf]  ;;  %v5566_v25 = vld [vmem:[%s6585_s30 + $0x30] sm:$0xe] }
 0x11f   : > { %5899 = vmatprep.mubr.msk.bf16.mxu1 %vm750_vm3, %v6422_v19  ;;  %v4043_v12 = vrot.slane %v4042_v24, 4  ;;  %v4422_v19 = vrot.slane %v6473_v11, 5  ;;  %v4426_v61 = vrot.slane %v6474_v50, 5  ;;  %v8050_v48 = vsel %vm6837_vm7, %v5592_v41, %v4503_v6  ;;  %v6426_v11 = vld [vmem:[%s6585_s30 + $0x6c] sm:$0xff]   ;;  %v8469_v41 = vld [vmem:[#allocation6_spill] sm:$0xff] }
 0x120   : > { %v4058_v34 = vsel %vm6611_vm4, %v4053_v17, %v4057_v46  ;;  %v4505_v24 = vrot.slane %v4503_v6, 4  ;;  %v4420_v43 = vsel %vm6837_vm7, %v5580_v18, %v4419_v56  ;;  %v5581_v51 = vrot.slane %v5565_v2, 9  ;;  %v5578_v50 = vld [vmem:[%s6585_s30 + $0xc0] sm:$0xe]  ;;  %v6490_v31 = vld [vmem:[%s6585_s30 + $0xc8] sm:$0x1] }
 0x121   : > { %v4048_v4 = vsel %vm6611_vm4, %v4043_v12, %v7990_v5  ;;  %v4423_v23 = vsel %vm6837_vm7, %v4421_v9, %v4422_v19  ;;  %v6475_v5 = vld [vmem:[%s6585_s30 + $0x34] sm:$0xf]  ;;  %v6425_v12 = vld [vmem:[%s6585_s30 + $0x60] sm:$0xff]   ;;  %v5582_v18 = vrot.slane %v5566_v25, 9  ;;  %v4513_v9 = vrot.slane %v7859_v35, 5 }
 0x122   : > { %v4433_v16 = vrot.slane %v6475_v5, 5  ;;  %v8061_v62 = vsel %vm6837_vm7, %v4505_v24, %v4506_v63  ;;  %v5547_v46 = vcombine.low %v4048_v4, %v4058_v34  ;;  %v5597_v17 = vcombine.low %v4420_v43, %v4423_v23  ;;  %v5567_v24 = vld [vmem:[%s6585_s30 + $0x3c] sm:$0xe] }
 0x123   : > { %v5609_v56 = vcombine.low %v8050_v48, %v8061_v62  ;;  %v4436_v6 = vrot.slane %v8469_v41, 5  ;;  %v4427_v35 = vsel %vm6837_vm7, %v5581_v51, %v4426_v61  ;;  %v5594_v5 = vrot.slane %v5578_v50, 9 }
 0x124   : > { %v4435_v19 = vrot.slane %v4433_v16, 4  ;;  %v4434_v23 = vsel %vm6837_vm7, %v5582_v18, %v4433_v16  ;;  %v4520_v51 = vrot.slane %v7952_v52, 5  ;;  %v2500_v57 = vshll.u32 %v6490_v31, 16 }
 0x125   : > { %6052 = vmatmul.mubr.msk.bf16.gmra.mrb[24].mxu0 %vm750_vm3, %v5545_v7  ;;  %v5593_v7 = vrot.slane %v5577_v49, 9 }
 0x126   : > { %5900 = vmatmul.mubr.msk.bf16.gmra.mrb[8].mxu1 %vm750_vm3, %v6423_v47  ;;  %6055 = vmatprep.mubr.msk.bf16.mxu0 %vm750_vm3, %v5546_v29  ;;  %v4429_v47 = vrot.slane %v6476_v28, 5  ;;  %v4510_v29 = vrot.slane %v7810_v39, 5  ;;  %v8470_v39 = vld [vmem:[#allocation7_spill] sm:$0xff]  ;;  %v4437_v25 = vsel %vm6837_vm7, %v4435_v19, %v4436_v6  ;;  %v5583_v28 = vrot.slane %v5567_v24, 9 }
 0x127   : > { %5903 = vmatprep.mubr.msk.bf16.mxu1 %vm750_vm3, %v6424_v30  ;;  %v4428_v30 = vrot.slane %v4426_v61, 4  ;;  %v4440_v49 = vrot.slane %v8470_v39, 5  ;;  %v4517_v61 = vrot.slane %v7862_v58, 5  ;;  %v6477_v39 = vld [vmem:[%s6585_s30 + $0x70] sm:$0xf]  ;;  %v4524_v24 = vrot.slane %v7938_v55, 5 }
 0x128   : > { %v8073_v63 = vsel %vm6837_vm7, %v5593_v7, %v4510_v29  ;;  %v4512_v2 = vrot.slane %v4510_v29, 4  ;;  %v5296_v7 = vld [vmem:[%s6585_s30 + $0x6c] sm:$0xf]  ;;  %v8471_v29 = vld [vmem:[#allocation8_spill] sm:$0xff] }
 0x129   : > { %v4430_v34 = vsel %vm6837_vm7, %v4428_v30, %v4429_v47  ;;  %v4442_v47 = vrot.slane %v4440_v49, 4  ;;  %v6427_v30 = vld [vmem:[%s6585_s30 + $0x78] sm:$0xff]   ;;  %v8104_v16 = vsel %vm6837_vm7, %v5594_v5, %v4517_v61  ;;  %v4519_v18 = vrot.slane %v4517_v61, 4 }
 0x12a   : > { %v8080_v4 = vsel %vm6837_vm7, %v4512_v2, %v4513_v9  ;;  %v5599_v9 = vcombine.low %v4434_v23, %v4437_v25  ;;  %v2313_v19 = vshrl.u32 %v5296_v7, 16  ;;  %v2316_v41 = vshll.u32 %v5296_v7, 16 }
 0x12b   : > { %v5610_v43 = vcombine.low %v8073_v63, %v8080_v4  ;;  %v8109_v58 = vsel %vm6837_vm7, %v4519_v18, %v4520_v51  ;;  %v4441_v6 = vsel %vm6837_vm7, %v5583_v28, %v4440_v49  ;;  %v4527_v49 = vrot.slane %v7983_v21, 5  ;;  %v6429_v51 = vld [vmem:[%s6585_s30 + $0x90] sm:$0xff]   ;;  %v6430_v21 = vld [vmem:[%s6585_s30 + $0x9c] sm:$0xff]  }
 0x12c   : > { %v5611_v50 = vcombine.low %v8104_v16, %v8109_v58  ;;  %v2315_v23 = vrot.slane %v2313_v19, 4  ;;  %v2318_v25 = vrot.slane %v2316_v41, 5  ;;  %v4526_v7 = vrot.slane %v4524_v24, 4 }
 0x12d   : > { %6056 = vmatmul.mubr.msk.bf16.gmra.mrb[28].mxu0 %vm750_vm3, %v5547_v46  ;;  %v5598_v46 = vcombine.low %v4427_v35, %v4430_v34  ;;  %v2322_v35 = vshll.u32 %v6477_v39, 16  ;;  %v2326_v34 = vshrl.u32 %v6477_v39, 16 }
 0x12e   : > { %5904 = vmatmul.mubr.msk.bf16.gmra.mrb[12].mxu1 %vm750_vm3, %v6425_v12  ;;  %6061 = vmatprep.mubr.msk.bf16.mxu0 %vm750_vm3, %v5597_v17  ;;  %v4443_v12 = vrot.slane %v8471_v29, 5  ;;  %v5579_v17 = vld [vmem:[%s6585_s30 + $0xcc] sm:$0xe]  ;;  %v8131_v55 = vsel %vm6837_vm7, %v4526_v7, %v4527_v49 }
 0x12f   : > { %5907 = vmatprep.mubr.msk.bf16.mxu1 %vm750_vm3, %v6426_v11  ;;  %v6428_v11 = vld [vmem:[%s6585_s30 + $0x84] sm:$0xff]   ;;  %v5595_v52 = vrot.slane %v5579_v17, 9  ;;  %v2328_v28 = vrot.slane %v2326_v34, 4  ;;  %v6478_v17 = vld [vmem:[%s6585_s30 + $0x74] sm:$0x1] }
 0x130   : > { %v4444_v2 = vsel %vm6837_vm7, %v4442_v47, %v4443_v12  ;;  %v5302_v47 = vld [vmem:[%s6585_s30 + $0x84] sm:$0xf]  ;;  %v2319_v12 = vor.u32 %v2318_v25, %v2315_v23  ;;  %v6432_v34 = vld [vmem:[%s6585_s30 + $0xb4] sm:$0xff]  }
 0x131   : > { %v8126_v5 = vsel %vm6837_vm7, %v5595_v52, %v4524_v24  ;;  %v5600_v61 = vcombine.low %v4441_v6, %v4444_v2  ;;  %v2364_v18 = vshll.u32 %v5302_v47, 16  ;;  %v5305_v6 = vld [vmem:[%s6585_s30 + $0x90] sm:$0xf]  ;;  %v6431_v2 = vld [vmem:[%s6585_s30 + $0xa8] sm:$0xff]  }
 0x132   : > { %v5612_v29 = vcombine.low %v8126_v5, %v8131_v55  ;;  %v2320_v52 = vrot.slane %v2319_v12, 4  ;;  %v2385_v23 = vshrl.u32 %v5305_v6, 16  ;;  %v2388_v25 = vshll.u32 %v5305_v6, 16 }
 0x133   : > { %v2418_v12 = vshll.u32 %v6481_v60, 16 }
 0x134   : > { %v2390_v14 = vrot.slane %v2388_v25, 5  ;;  %v6484_v25 = vld [vmem:[%s6585_s30 + $0xa4] sm:$0x1] }
 0x135   : > { %6062 = vmatmul.mubr.msk.bf16.vlgmr.msra.gmra.mrb[0].mxu0 %vm750_vm3, %v5598_v46  ;;  %v2324_v46 = vrot.slane %v2322_v35, 5  ;;  %v5308_v35 = vld [vmem:[%s6585_s30 + $0x9c] sm:$0xf]  ;;  %v8173_v6 = vrot.slane %v2418_v12, 5 }
 0x136   : > { %5908 = vmatmul.mubr.msk.bf16.gmra.mrb[16].mxu1 %vm750_vm3, %v6427_v30  ;;  %6065 = vmatprep.mubr.msk.bf16.mxu0 %vm750_vm3, %v5599_v9  ;;  %v2332_v30 = vshll.u32 %v6478_v17, 16  ;;  %v2361_v9 = vshrl.u32 %v5302_v47, 16  ;;  %v2412_v47 = vshll.u32 %v5308_v35, 16  ;;  %v6482_v17 = vld [vmem:[%s6585_s30 + $0x8c] sm:$0x1] }
 0x137   : > { %5911 = vmatprep.mubr.msk.bf16.mxu1 %vm750_vm3, %v6428_v11  ;;  %v2329_v13 = vor.u32 %v2328_v28, %v2324_v46  ;;  %v6479_v11 = vld [vmem:[%s6585_s30 + $0x88] sm:$0xf]  ;;  %v2325_v7 = vsel %vm6611_vm4, %v2320_v52, %v2324_v46 }
 0x138   : > { %v2370_v19 = vshll.u32 %v6479_v11, 16  ;;  %v2374_v41 = vshrl.u32 %v6479_v11, 16  ;;  %v2334_v0 = vrot.slane %v2332_v30, 5  ;;  %v2363_v36 = vrot.slane %v2361_v9, 4 }
 0x139   : > { %v2330_v39 = vrot.slane %v2329_v13, 4  ;;  %v2380_v30 = vshll.u32 %v6482_v17, 16  ;;  %v2387_v9 = vrot.slane %v2385_v23, 4  ;;  %v2414_v11 = vrot.slane %v2412_v47, 5 }
 0x13a   : > { %v8150_v24 = vrot.slane %v2370_v19, 5  ;;  %v2376_v49 = vrot.slane %v2374_v41, 4  ;;  %v6433_v19 = vld [vmem:[%s6585_s30 + $0xc0] sm:$0xff]  }
 0x13b   : > { %v2335_v46 = vsel %vm6611_vm4, %v2330_v39, %v2334_v0  ;;  %v5311_v39 = vld [vmem:[%s6585_s30 + $0xa8] sm:$0xf] }
 0x13c   : > { %v2377_v13 = vor.u32 %v2376_v49, %v8150_v24  ;;  %v5329_v41 = vcombine.low %v2325_v7, %v2335_v46  ;;  %v2428_v7 = vshll.u32 %v6484_v25, 16  ;;  %v2436_v45 = vshll.u32 %v5311_v39, 16 }
 0x13d   : > { %6066 = vmatmul.mubr.msk.bf16.gmra.mrb[4].mxu0 %vm750_vm3, %v5600_v61  ;;  %v6480_v61 = vld [vmem:[%s6585_s30 + $0x94] sm:$0xf] }
 0x13e   : > { %5912 = vmatmul.mubr.msk.bf16.gmra.mrb[20].mxu1 %vm750_vm3, %v6429_v51  ;;  %6069 = vmatprep.mubr.msk.bf16.mxu0 %vm750_vm3, %v5601_v10  ;;  %v2366_v10 = vrot.slane %v2364_v18, 5  ;;  %v2394_v51 = vshll.u32 %v6480_v61, 16  ;;  %v2398_v28 = vshrl.u32 %v6480_v61, 16  ;;  %v2378_v0 = vrot.slane %v2377_v13, 4 }
 0x13f   : > { %5915 = vmatprep.mubr.msk.bf16.mxu1 %vm750_vm3, %v6430_v21  ;;  %v2409_v21 = vshrl.u32 %v5308_v35, 16  ;;  %v6483_v35 = vld [vmem:[%s6585_s30 + $0x98] sm:$0x1]  ;;  %v2433_v61 = vshrl.u32 %v5311_v39, 16  ;;  %v5317_v39 = vld [vmem:[%s6585_s30 + $0xc0] sm:$0xf] }
 0x140   : > { %v2367_v15 = vor.u32 %v2366_v10, %v2363_v36  ;;  %v8170_v26 = vrot.slane %v2394_v51, 5  ;;  %v2382_v36 = vrot.slane %v2380_v30, 5  ;;  %v2391_v10 = vor.u32 %v2390_v14, %v2387_v9  ;;  %v5314_v51 = vld [vmem:[%s6585_s30 + $0xb4] sm:$0xf] }
 0x141   : > { %v2411_v18 = vrot.slane %v2409_v21, 4  ;;  %v2446_v21 = vshrl.u32 %v6485_v27, 16  ;;  %v2457_v20 = vshrl.u32 %v5314_v51, 16  ;;  %v2460_v42 = vshll.u32 %v5314_v51, 16 }
 0x142   : > { %v2368_v52 = vrot.slane %v2367_v15, 4  ;;  %v2383_v46 = vsel %vm6611_vm4, %v2378_v0, %v2382_v36  ;;  %v2392_v15 = vrot.slane %v2391_v10, 4  ;;  %v2430_v30 = vrot.slane %v2428_v7, 5 }
 0x143   : > { %v2415_v23 = vor.u32 %v2414_v11, %v2411_v18  ;;  %v2435_v9 = vrot.slane %v2433_v61, 4  ;;  %v2448_v11 = vrot.slane %v2446_v21, 4  ;;  %v6489_v61 = vld [vmem:[%s6585_s30 + $0xbc] sm:$0x1] }
 0x144   : > { %v2373_v47 = vsel %vm6611_vm4, %v2368_v52, %v8150_v24  ;;  %v2397_v0 = vsel %vm6611_vm4, %v2392_v15, %v8170_v26  ;;  %v2476_v22 = vshll.u32 %v6489_v61, 16 }
 0x145   : > { %6070 = vmatmul.mubr.msk.bf16.gmra.mrb[8].mxu0 %vm750_vm3, %v5602_v40  ;;  %v2422_v40 = vshrl.u32 %v6481_v60, 16  ;;  %v2416_v17 = vrot.slane %v2415_v23, 4  ;;  %v5331_v24 = vcombine.low %v2373_v47, %v2383_v46 }
 0x146   : > { %5916 = vmatmul.mubr.msk.bf16.gmra.mrb[24].mxu1 %vm750_vm3, %v6431_v2  ;;  %6073 = vmatprep.mubr.msk.bf16.mxu0 %vm750_vm3, %v5603_v54  ;;  %v2400_v54 = vrot.slane %v2398_v28, 4 }
 0x147   : > { %5919 = vmatprep.mubr.msk.bf16.mxu1 %vm750_vm3, %v6432_v34  ;;  %v2424_v2 = vrot.slane %v2422_v40, 4  ;;  %v2404_v34 = vshll.u32 %v6483_v35, 16  ;;  %v2421_v10 = vsel %vm6611_vm4, %v2416_v17, %v8173_v6  ;;  %v2502_v17 = vrot.slane %v2500_v57, 5 }
 0x148   : > { %v2401_v49 = vor.u32 %v2400_v54, %v8170_v26  ;;  %v2438_v54 = vrot.slane %v2436_v45, 5  ;;  %v6487_v26 = vld [vmem:[%s6585_s30 + $0xb0] sm:$0x1] }
 0x149   : > { %v2425_v28 = vor.u32 %v2424_v2, %v8173_v6  ;;  %v2406_v60 = vrot.slane %v2404_v34, 5  ;;  %v2452_v35 = vshll.u32 %v6487_v26, 16  ;;  %v2481_v34 = vshrl.u32 %v5317_v39, 16 }
 0x14a   : > { %v2402_v13 = vrot.slane %v2401_v49, 4  ;;  %v2439_v38 = vor.u32 %v2438_v54, %v2435_v9  ;;  %v2484_v6 = vshll.u32 %v5317_v39, 16  ;;  %v6488_v49 = vld [vmem:[%s6585_s30 + $0xc4] sm:$0xf] }
 0x14b   : > { %v2426_v14 = vrot.slane %v2425_v28, 4  ;;  %v2490_v23 = vshll.u32 %v6488_v49, 16  ;;  %v2494_v25 = vshrl.u32 %v6488_v49, 16  ;;  %v2454_v45 = vrot.slane %v2452_v35, 5 }
 0x14c   : > { %v2407_v36 = vsel %vm6611_vm4, %v2402_v13, %v2406_v60  ;;  %v2440_v51 = vrot.slane %v2439_v38, 4  ;;  %v2478_v60 = vrot.slane %v2476_v22, 5 }
 0x14d   : > { %6074 = vmatmul.mubr.msk.bf16.gmra.mrb[12].mxu0 %vm750_vm3, %v5604_v53  ;;  %v2442_v53 = vshll.u32 %v6485_v27, 16  ;;  %v2431_v59 = vsel %vm6611_vm4, %v2426_v14, %v2430_v30  ;;  %v5332_v44 = vcombine.low %v2397_v0, %v2407_v36  ;;  %v2483_v27 = vrot.slane %v2481_v34, 4  ;;  %v8281_v36 = vld [vmem:[%s8403_s3] ss:$0 sm:$0xff] }
 0x14e   : > { %5920 = vmatmul.mubr.msk.bf16.gmra.mrb[28].mxu1 %vm750_vm3, %v6433_v19  ;;  %6077 = vmatprep.mubr.msk.bf16.mxu0 %vm750_vm3, %v5605_v33  ;;  %v6486_v33 = vld [vmem:[%s6585_s30 + $0xb8] sm:$0xf]  ;;  %v2459_v19 = vrot.slane %v2457_v20, 4  ;;  %v2492_v21 = vrot.slane %v2490_v23, 5  ;;  %v2496_v47 = vrot.slane %v2494_v25, 4  ;;  %s8291_s30 = scalar_lea.vmem %s8404_s4, %s5633_s27 }
 0x14f   : > { %5941 = vmatprep.mubr.msk.bf16.mxu1 %vm750_vm3, %v5329_v41  ;;  %v2466_v12 = vshll.u32 %v6486_v33, 16  ;;  %v2470_v40 = vshrl.u32 %v6486_v33, 16  ;;  %v2444_v18 = vrot.slane %v2442_v53, 5  ;;  %v2462_v41 = vrot.slane %v2460_v42, 5 }
 0x150   : > { %v2486_v53 = vrot.slane %v2484_v6, 5 }
 0x151   : > { %v2468_v52 = vrot.slane %v2466_v12, 5  ;;  %v2472_v2 = vrot.slane %v2470_v40, 4  ;;  %v2445_v20 = vsel %vm6611_vm4, %v2440_v51, %v2444_v18  ;;  %v2497_v12 = vor.u32 %v2496_v47, %v2492_v21 }
 0x152   : > { %v2487_v33 = vor.u32 %v2486_v53, %v2483_v27 }
 0x153   : > { %v2473_v7 = vor.u32 %v2472_v2, %v2468_v52  ;;  %v2498_v13 = vrot.slane %v2497_v12, 4  ;;  %v8276_v2 = vld [vmem:[%s8402_s2] ss:$0 sm:$0xff] }
 0x154   : > { %v2488_v40 = vrot.slane %v2487_v33, 4 }
 0x155   : > { %6078 = vmatmul.mubr.msk.bf16.gmra.mrb[16].mxu0 %vm750_vm3, %v5606_v37  ;;  %v2449_v37 = vor.u32 %v2448_v11, %v2444_v18  ;;  %v2474_v15 = vrot.slane %v2473_v7, 4  ;;  %v2503_v9 = vsel %vm6611_vm4, %v2498_v13, %v2502_v17 }
 0x156   : > { %5942 = vmatmul.mubr.msk.bf16.vlgmr.msra.gmra.mrb[16].mxu1 %vm750_vm3, %v7979_v1  ;;  %6081 = vmatprep.mubr.msk.bf16.mxu0 %vm750_vm3, %v5607_v3  ;;  %v2463_v1 = vor.u32 %v2462_v41, %v2459_v19  ;;  %v5333_v3 = vcombine.low %v2421_v10, %v2431_v59  ;;  %v2493_v30 = vsel %vm6611_vm4, %v2488_v40, %v2492_v21 }
 0x157   : > { %5945 = vmatprep.mubr.msk.bf16.mxu1 %vm750_vm3, %v5331_v24  ;;  %v2450_v28 = vrot.slane %v2449_v37, 4  ;;  %v2479_v48 = vsel %vm6611_vm4, %v2474_v15, %v2478_v60  ;;  %v5336_v14 = vcombine.low %v2493_v30, %v2503_v9 }
 0x158   : > { %v2464_v46 = vrot.slane %v2463_v1, 4 }
 0x159   : > { %v2455_v42 = vsel %vm6611_vm4, %v2450_v28, %v2454_v45 }
 0x15a   : > { %v5334_v62 = vcombine.low %v2445_v20, %v2455_v42 }
 0x15d   : > { %6082 = vmatmul.mubr.msk.bf16.gmra.mrb[20].mxu0 %vm750_vm3, %v5608_v8  ;;  %v2469_v8 = vsel %vm6611_vm4, %v2464_v46, %v2468_v52 }
 0x15e   : > { %5946 = vmatmul.mubr.msk.bf16.gmra.mrb[20].mxu1 %vm750_vm3, %v5332_v44  ;;  %6085 = vmatprep.mubr.msk.bf16.mxu0 %vm750_vm3, %v5609_v56  ;;  %v5335_v56 = vcombine.low %v2469_v8, %v2479_v48 }
 0x15f   : > { %5949 = vmatprep.mubr.msk.bf16.mxu1 %vm750_vm3, %v5333_v3 }
 0x165   : > { %6086 = vmatmul.mubr.msk.bf16.gmra.mrb[24].mxu0 %vm750_vm3, %v5610_v43 }
 0x166   : > { %5950 = vmatmul.mubr.msk.bf16.gmra.mrb[24].mxu1 %vm750_vm3, %v5334_v62  ;;  %6089 = vmatprep.mubr.msk.bf16.mxu0 %vm750_vm3, %v5611_v50 }
 0x167   : > { %5953 = vmatprep.mubr.msk.bf16.mxu1 %vm750_vm3, %v5335_v56 }
 0x16d   : > { %6090 = vmatmul.mubr.msk.bf16.gmra.mrb[28].mxu0 %vm750_vm3, %v5612_v29 }
 0x16e   : > { %5954 = vmatmul.mubr.msk.bf16.gmra.mrb[28].mxu1 %vm750_vm3, %v5336_v14 }
 0x1e9   : > { %v5893_v63 = vpop.f32.mrb[0].mxu1 }
 0x1ea   : > { %v1913_v4 = vpop.f32.mrb[1].mxu1 }
 0x1eb   : > { %v5894_v43 = vpop.f32.mrb[2].mxu1 }
 0x1ec   : > { %v1916_v16 = vpop.f32.mrb[3].mxu1 }
 0x1f1   : > { %v5897_v58 = vpop.f32.mrb[4].mxu1 }
 0x1f2   : > { %v1929_v50 = vpop.f32.mrb[5].mxu1 }
 0x1f3   : > { %v5898_v54 = vpop.f32.mrb[6].mxu1 }
 0x1f4   : > { %v1932_v18 = vpop.f32.mrb[7].mxu1 }
 0x1f9   : > { %v5901_v11 = vpop.f32.mrb[8].mxu1 }
 0x1fa   : > { %v1945_v32 = vpop.f32.mrb[9].mxu1 }
 0x1fb   : > { %v8261_v24 = vpop.f32.mrb[10].mxu1 }
 0x1fc   : > { %v8263_v19 = vpop.f32.mrb[11].mxu1 }
 0x201   : > { %v8265_v5 = vpop.f32.mrb[12].mxu1 }
 0x202   : > { %v8267_v55 = vpop.f32.mrb[13].mxu1 }
 0x203   : > { %v8269_v29 = vpop.f32.mrb[14].mxu1 }
 0x204   : > { %v8271_v41 = vpop.f32.mrb[15].mxu1 }
 0x208   : > { %v6063_v52 = vpop.f32.mrb[0].mxu0 }
 0x209   : > { %v6095_v39 = vadd.f32 %v6063_v52, %v5893_v63  ;;  %v4664_v0 = vpop.f32.mrb[1].mxu0 }
 0x20a   : > { %v6096_v10 = vadd.f32 %v4664_v0, %v1913_v4  ;;  %v6064_v59 = vpop.f32.mrb[2].mxu0 }
 0x20b   : > { %v4832_v38 = vmul.f32 %v6095_v39, %v8276_v2  ;;  %v6097_v37 = vadd.f32 %v6064_v59, %v5894_v43  ;;  %v4667_v26 = vpop.f32.mrb[3].mxu0 }
 0x20c   : > { %v4830_v35 = vmul.f32 %v6096_v10, %v8276_v2  ;;  %v6098_v34 = vadd.f32 %v4667_v26, %v1916_v16 }
 0x20d   : > { %v4871_v6 = vadd.f32 %v8281_v36, %v4832_v38  ;;  %v4833_v49 = vmul.f32 %v6097_v37, %v8276_v2 }
 0x20e   : > { %v4869_v23 = vadd.f32 %v8281_v36, %v4830_v35  ;;  %v4831_v25 = vmul.f32 %v6098_v34, %v8276_v2 }
 0x20f   : > { %v4903_v1 = vmax.f32 %v4871_v6, 0.0  ;;  %v4872_v7 = vadd.f32 %v8281_v36, %v4833_v49 }
 0x210   : > { %v4901_v61 = vmax.f32 %v4869_v23, 0.0  ;;  %v4870_v22 = vadd.f32 %v8281_v36, %v4831_v25  ;;  %v6067_v44 = vpop.f32.mrb[4].mxu0 }
 0x211   : > { %4935 = vst [vmem:[%s8291_s30 + $0x10] sm:$0xff] %v4903_v1  ;;  %v4904_v3 = vmax.f32 %v4872_v7, 0.0  ;;  %v6099_v51 = vadd.f32 %v6067_v44, %v5897_v58  ;;  %v4680_v28 = vpop.f32.mrb[5].mxu0 }
 0x212   : > { %4933 = vst [vmem:[%s8291_s30] sm:$0xff] %v4901_v61  ;;  %v4902_v45 = vmax.f32 %v4870_v22, 0.0  ;;  %v6100_v27 = vadd.f32 %v4680_v28, %v1929_v50  ;;  %v6068_v53 = vpop.f32.mrb[6].mxu0 }
 0x213   : > { %4936 = vst [vmem:[%s8291_s30 + $0x18] sm:$0xff] %v4904_v3  ;;  %v4836_v21 = vmul.f32 %v6099_v51, %v8276_v2  ;;  %v6101_v47 = vadd.f32 %v6068_v53, %v5898_v54  ;;  %v4683_v46 = vpop.f32.mrb[7].mxu0 }
 0x214   : > { %4934 = vst [vmem:[%s8291_s30 + $0x8] sm:$0xff] %v4902_v45  ;;  %v4834_v15 = vmul.f32 %v6100_v27, %v8276_v2  ;;  %v6102_v60 = vadd.f32 %v4683_v46, %v1932_v18 }
 0x215   : > { %v4875_v20 = vadd.f32 %v8281_v36, %v4836_v21  ;;  %v4837_v42 = vmul.f32 %v6101_v47, %v8276_v2 }
 0x216   : > { %v4873_v33 = vadd.f32 %v8281_v36, %v4834_v15  ;;  %v4835_v12 = vmul.f32 %v6102_v60, %v8276_v2 }
 0x217   : > { %v4907_v31 = vmax.f32 %v4875_v20, 0.0  ;;  %v4876_v57 = vadd.f32 %v8281_v36, %v4837_v42 }
 0x218   : > { %v4905_v8 = vmax.f32 %v4873_v33, 0.0  ;;  %v4874_v48 = vadd.f32 %v8281_v36, %v4835_v12  ;;  %v6071_v62 = vpop.f32.mrb[8].mxu0 }
 0x219   : > { %4939 = vst [vmem:[%s8291_s30 + $0x30] sm:$0xff] %v4907_v31  ;;  %v4908_v56 = vmax.f32 %v4876_v57, 0.0  ;;  %v6103_v40 = vadd.f32 %v6071_v62, %v5901_v11  ;;  %v4696_v13 = vpop.f32.mrb[9].mxu0 }
 0x21a   : > { %4937 = vst [vmem:[%s8291_s30 + $0x20] sm:$0xff] %v4905_v8  ;;  %v4906_v17 = vmax.f32 %v4874_v48, 0.0  ;;  %v6104_v30 = vadd.f32 %v4696_v13, %v1945_v32  ;;  %v6072_v9 = vpop.f32.mrb[10].mxu0 }
 0x21b   : > { %4940 = vst [vmem:[%s8291_s30 + $0x38] sm:$0xff] %v4908_v56  ;;  %v4840_v14 = vmul.f32 %v6103_v40, %v8276_v2  ;;  %v6105_v63 = vadd.f32 %v6072_v9, %v8261_v24  ;;  %v4699_v4 = vpop.f32.mrb[11].mxu0 }
 0x21c   : > { %4938 = vst [vmem:[%s8291_s30 + $0x28] sm:$0xff] %v4906_v17  ;;  %v4838_v43 = vmul.f32 %v6104_v30, %v8276_v2  ;;  %v6106_v16 = vadd.f32 %v4699_v4, %v8263_v19 }
 0x21d   : > { %v4879_v58 = vadd.f32 %v8281_v36, %v4840_v14  ;;  %v4841_v50 = vmul.f32 %v6105_v63, %v8276_v2 }
 0x21e   : > { %v4877_v54 = vadd.f32 %v8281_v36, %v4838_v43  ;;  %v4839_v18 = vmul.f32 %v6106_v16, %v8276_v2 }
 0x21f   : > { %v4911_v11 = vmax.f32 %v4879_v58, 0.0  ;;  %v4880_v32 = vadd.f32 %v8281_v36, %v4841_v50 }
 0x220   : > { %v4909_v24 = vmax.f32 %v4877_v54, 0.0  ;;  %v4878_v52 = vadd.f32 %v8281_v36, %v4839_v18  ;;  %v6075_v39 = vpop.f32.mrb[12].mxu0 }
 0x221   : > { %4943 = vst [vmem:[%s8291_s30 + $0x50] sm:$0xff] %v4911_v11  ;;  %v4912_v0 = vmax.f32 %v4880_v32, 0.0  ;;  %v6107_v19 = vadd.f32 %v6075_v39, %v8265_v5  ;;  %v4712_v10 = vpop.f32.mrb[13].mxu0 }
 0x222   : > { %4941 = vst [vmem:[%s8291_s30 + $0x40] sm:$0xff] %v4909_v24  ;;  %v4910_v59 = vmax.f32 %v4878_v52, 0.0  ;;  %v6108_v38 = vadd.f32 %v4712_v10, %v8267_v55  ;;  %v6076_v37 = vpop.f32.mrb[14].mxu0 }
 0x223   : > { %4944 = vst [vmem:[%s8291_s30 + $0x58] sm:$0xff] %v4912_v0  ;;  %v4844_v26 = vmul.f32 %v6107_v19, %v8276_v2  ;;  %v6109_v35 = vadd.f32 %v6076_v37, %v8269_v29  ;;  %v4715_v34 = vpop.f32.mrb[15].mxu0 }
 0x224   : > { %4942 = vst [vmem:[%s8291_s30 + $0x48] sm:$0xff] %v4910_v59  ;;  %v4842_v6 = vmul.f32 %v6108_v38, %v8276_v2  ;;  %v6110_v49 = vadd.f32 %v4715_v34, %v8271_v41 }
 0x225   : > { %v4883_v5 = vadd.f32 %v8281_v36, %v4844_v26  ;;  %v4845_v23 = vmul.f32 %v6109_v35, %v8276_v2 }
 0x226   : > { %v4881_v55 = vadd.f32 %v8281_v36, %v4842_v6  ;;  %v4843_v25 = vmul.f32 %v6110_v49, %v8276_v2 }
 0x227   : > { %v4915_v1 = vmax.f32 %v4883_v5, 0.0  ;;  %v4884_v7 = vadd.f32 %v8281_v36, %v4845_v23 }
 0x228   : > { %v4913_v29 = vmax.f32 %v4881_v55, 0.0  ;;  %v4882_v61 = vadd.f32 %v8281_v36, %v4843_v25  ;;  %v6079_v22 = vpop.f32.mrb[16].mxu0 }
 0x229   : > { %4947 = vst [vmem:[%s8291_s30 + $0x70] sm:$0xff] %v4915_v1  ;;  %v4916_v44 = vmax.f32 %v4884_v7, 0.0  ;;  %v5943_v41 = vpop.f32.mrb[16].mxu1  ;;  %v4728_v3 = vpop.f32.mrb[17].mxu0 }
 0x22a   : > { %4945 = vst [vmem:[%s8291_s30 + $0x60] sm:$0xff] %v4913_v29  ;;  %v4914_v51 = vmax.f32 %v4882_v61, 0.0  ;;  %v6111_v28 = vadd.f32 %v6079_v22, %v5943_v41  ;;  %v2703_v45 = vpop.f32.mrb[17].mxu1  ;;  %v6080_v27 = vpop.f32.mrb[18].mxu0 }
 0x22b   : > { %4948 = vst [vmem:[%s8291_s30 + $0x78] sm:$0xff] %v4916_v44  ;;  %v6112_v53 = vadd.f32 %v4728_v3, %v2703_v45  ;;  %v5944_v21 = vpop.f32.mrb[18].mxu1  ;;  %v4731_v47 = vpop.f32.mrb[19].mxu0 }
 0x22c   : > { %4946 = vst [vmem:[%s8291_s30 + $0x68] sm:$0xff] %v4914_v51  ;;  %v4848_v46 = vmul.f32 %v6111_v28, %v8276_v2  ;;  %v6113_v15 = vadd.f32 %v6080_v27, %v5944_v21  ;;  %v2706_v60 = vpop.f32.mrb[19].mxu1 }
 0x22d   : > { %v4846_v20 = vmul.f32 %v6112_v53, %v8276_v2  ;;  %v6114_v42 = vadd.f32 %v4731_v47, %v2706_v60 }
 0x22e   : > { %v4887_v33 = vadd.f32 %v8281_v36, %v4848_v46  ;;  %v4849_v12 = vmul.f32 %v6113_v15, %v8276_v2 }
 0x22f   : > { %v4885_v31 = vadd.f32 %v8281_v36, %v4846_v20  ;;  %v4847_v57 = vmul.f32 %v6114_v42, %v8276_v2 }
 0x230   : > { %v4919_v8 = vmax.f32 %v4887_v33, 0.0  ;;  %v4888_v48 = vadd.f32 %v8281_v36, %v4849_v12  ;;  %v6083_v62 = vpop.f32.mrb[20].mxu0 }
 0x231   : > { %v4917_v56 = vmax.f32 %v4885_v31, 0.0  ;;  %v4886_v40 = vadd.f32 %v8281_v36, %v4847_v57  ;;  %v5947_v13 = vpop.f32.mrb[20].mxu1  ;;  %v4744_v17 = vpop.f32.mrb[21].mxu0 }
 0x232   : > { %4951 = vst [vmem:[%s8291_s30 + $0x90] sm:$0xff] %v4919_v8  ;;  %v4920_v30 = vmax.f32 %v4888_v48, 0.0  ;;  %v6115_v9 = vadd.f32 %v6083_v62, %v5947_v13  ;;  %v2719_v14 = vpop.f32.mrb[21].mxu1  ;;  %v6084_v63 = vpop.f32.mrb[22].mxu0 }
 0x233   : > { %4949 = vst [vmem:[%s8291_s30 + $0x80] sm:$0xff] %v4917_v56  ;;  %v4918_v4 = vmax.f32 %v4886_v40, 0.0  ;;  %v6116_v43 = vadd.f32 %v4744_v17, %v2719_v14  ;;  %v5948_v16 = vpop.f32.mrb[22].mxu1  ;;  %v4747_v58 = vpop.f32.mrb[23].mxu0 }
 0x234   : > { %4952 = vst [vmem:[%s8291_s30 + $0x98] sm:$0xff] %v4920_v30  ;;  %v4852_v50 = vmul.f32 %v6115_v9, %v8276_v2  ;;  %v6117_v54 = vadd.f32 %v6084_v63, %v5948_v16  ;;  %v2722_v18 = vpop.f32.mrb[23].mxu1 }
 0x235   : > { %4950 = vst [vmem:[%s8291_s30 + $0x88] sm:$0xff] %v4918_v4  ;;  %v4850_v11 = vmul.f32 %v6116_v43, %v8276_v2  ;;  %v6118_v32 = vadd.f32 %v4747_v58, %v2722_v18 }
 0x236   : > { %v4891_v24 = vadd.f32 %v8281_v36, %v4852_v50  ;;  %v4853_v52 = vmul.f32 %v6117_v54, %v8276_v2 }
 0x237   : > { %v4889_v39 = vadd.f32 %v8281_v36, %v4850_v11  ;;  %v4851_v0 = vmul.f32 %v6118_v32, %v8276_v2 }
 0x238   : > { %v4923_v19 = vmax.f32 %v4891_v24, 0.0  ;;  %v4892_v10 = vadd.f32 %v8281_v36, %v4853_v52  ;;  %v6087_v59 = vpop.f32.mrb[24].mxu0 }
 0x239   : > { %v4921_v38 = vmax.f32 %v4889_v39, 0.0  ;;  %v4890_v37 = vadd.f32 %v8281_v36, %v4851_v0  ;;  %v5951_v26 = vpop.f32.mrb[24].mxu1  ;;  %v4760_v35 = vpop.f32.mrb[25].mxu0 }
 0x23a   : > { %4955 = vst [vmem:[%s8291_s30 + $0xb0] sm:$0xff] %v4923_v19  ;;  %v4924_v34 = vmax.f32 %v4892_v10, 0.0  ;;  %v6119_v6 = vadd.f32 %v6087_v59, %v5951_v26  ;;  %v2735_v49 = vpop.f32.mrb[25].mxu1  ;;  %v6088_v5 = vpop.f32.mrb[26].mxu0 }
 0x23b   : > { %4953 = vst [vmem:[%s8291_s30 + $0xa0] sm:$0xff] %v4921_v38  ;;  %v4922_v23 = vmax.f32 %v4890_v37, 0.0  ;;  %v6120_v55 = vadd.f32 %v4760_v35, %v2735_v49  ;;  %v5952_v25 = vpop.f32.mrb[26].mxu1  ;;  %v4763_v1 = vpop.f32.mrb[27].mxu0 }
 0x23c   : > { %4956 = vst [vmem:[%s8291_s30 + $0xb8] sm:$0xff] %v4924_v34  ;;  %v4856_v7 = vmul.f32 %v6119_v6, %v8276_v2  ;;  %v6121_v29 = vadd.f32 %v6088_v5, %v5952_v25  ;;  %v2738_v61 = vpop.f32.mrb[27].mxu1 }
 0x23d   : > { %4954 = vst [vmem:[%s8291_s30 + $0xa8] sm:$0xff] %v4922_v23  ;;  %v4854_v22 = vmul.f32 %v6120_v55, %v8276_v2  ;;  %v6122_v44 = vadd.f32 %v4763_v1, %v2738_v61 }
 0x23e   : > { %v4895_v41 = vadd.f32 %v8281_v36, %v4856_v7  ;;  %v4857_v3 = vmul.f32 %v6121_v29, %v8276_v2 }
 0x23f   : > { %v4893_v51 = vadd.f32 %v8281_v36, %v4854_v22  ;;  %v4855_v28 = vmul.f32 %v6122_v44, %v8276_v2 }
 0x240   : > { %v4927_v45 = vmax.f32 %v4895_v41, 0.0  ;;  %v4896_v27 = vadd.f32 %v8281_v36, %v4857_v3  ;;  %v6091_v53 = vpop.f32.mrb[28].mxu0 }
 0x241   : > { %v4925_v21 = vmax.f32 %v4893_v51, 0.0  ;;  %v4894_v47 = vadd.f32 %v8281_v36, %v4855_v28  ;;  %v5955_v46 = vpop.f32.mrb[28].mxu1  ;;  %v4776_v15 = vpop.f32.mrb[29].mxu0 }
 0x242   : > { %4959 = vst [vmem:[%s8291_s30 + $0xd0] sm:$0xff] %v4927_v45  ;;  %v4928_v60 = vmax.f32 %v4896_v27, 0.0  ;;  %v6123_v20 = vadd.f32 %v6091_v53, %v5955_v46  ;;  %v2751_v42 = vpop.f32.mrb[29].mxu1  ;;  %v6092_v33 = vpop.f32.mrb[30].mxu0 }
 0x243   : > { %4957 = vst [vmem:[%s8291_s30 + $0xc0] sm:$0xff] %v4925_v21  ;;  %v4926_v12 = vmax.f32 %v4894_v47, 0.0  ;;  %v6124_v31 = vadd.f32 %v4776_v15, %v2751_v42  ;;  %v5956_v57 = vpop.f32.mrb[30].mxu1  ;;  %v4779_v8 = vpop.f32.mrb[31].mxu0 }
 0x244   : > { %4960 = vst [vmem:[%s8291_s30 + $0xd8] sm:$0xff] %v4928_v60  ;;  %v4860_v48 = vmul.f32 %v6123_v20, %v8276_v2  ;;  %v6125_v62 = vadd.f32 %v6092_v33, %v5956_v57  ;;  %v2754_v56 = vpop.f32.mrb[31].mxu1 }
 0x245   : > { %4958 = vst [vmem:[%s8291_s30 + $0xc8] sm:$0xff] %v4926_v12  ;;  %v4858_v40 = vmul.f32 %v6124_v31, %v8276_v2  ;;  %v6126_v13 = vadd.f32 %v4779_v8, %v2754_v56 }
 0x246   : > { %v4899_v17 = vadd.f32 %v8281_v36, %v4860_v48  ;;  %v4861_v30 = vmul.f32 %v6125_v62, %v8276_v2 }
 0x247   : > { %v4897_v9 = vadd.f32 %v8281_v36, %v4858_v40  ;;  %v4859_v14 = vmul.f32 %v6126_v13, %v8276_v2 }
 0x248   : > { %v4931_v63 = vmax.f32 %v4899_v17, 0.0  ;;  %v4900_v4 = vadd.f32 %v8281_v36, %v4861_v30 }
 0x249   : > { %v4929_v43 = vmax.f32 %v4897_v9, 0.0  ;;  %v4898_v16 = vadd.f32 %v8281_v36, %v4859_v14 }
 0x24a   : > { %4963 = vst [vmem:[%s8291_s30 + $0xf0] sm:$0xff] %v4931_v63  ;;  %v4932_v58 = vmax.f32 %v4900_v4, 0.0 }
 0x24b   : > { %4961 = vst [vmem:[%s8291_s30 + $0xe0] sm:$0xff] %v4929_v43  ;;  %v4930_v50 = vmax.f32 %v4898_v16, 0.0 }
 0x24c   : > { %4964 = vst [vmem:[%s8291_s30 + $0xf8] sm:$0xff] %v4932_v58 }
 0x24d   : > { %4962 = vst [vmem:[%s8291_s30 + $0xe8] sm:$0xff] %v4930_v50 }
 0x24e PF: > { %s14_s17 = sadd.s32 1, %s6513_s17   ;;  %s8472_s15 = smov %s6509_s16 }
 0x24f   : > { %p11_p5 = scmp.ge.s32.totalorder %s14_s17, 4   ;;  %s8473_s16 = smov %s8475_s18 }
 0x251   :  { %13 = sbr.rel (!%p11_p5) target bundleno = 2 (0x2), region = 85 }

</bundles_post_ra>
